<compile_context>
chip_gen: v7x
topology: tpu7x:2x2x1
jax: 0.10.0
libtpu: 0.0.40
codegen_flags: <defaults>
</compile_context>

<pallas_src>
import jax
import jax.numpy as jnp
import numpy as np
from jax import lax
from jax.experimental import pallas as pl

# ---- small, module-consistent sizes -----------------------------------------
B = 2          # batch
T = 8          # sequence length
E = 32         # embed_hidden
H = 128        # mlp_hidden (multiple of 128 -> lane-dense tiles everywhere)
N = 16         # number of image "objects"
VOCAB = 20     # vocab_size  (role classifier out dim)
N_VERBS = 10   # n_verbs     (verb classifier out dim)
OUT_PAD = 128  # each classifier output padded to a lane-dense width


# ======================= single fused forward kernel =========================
def topdown_kernel(q_pk_ref, img_ref,
                   w_ih_cat_ref, b_cat_ref, w_hh_cat_ref,
                   wp_ref, bp_ref,
                   att_wv_ref, att_wq_ref, att_b_ref, att_wl_ref,
                   wqn_ref, bqn_ref, wvn_ref, bvn_ref,
                   head_w1_ref, head_b1_ref,
                   role_w2_ref, role_b2_ref, verb_w2_ref, verb_b2_ref,
                   out_ref):
    f32 = jnp.float32
    bf16 = jnp.bfloat16
    Bn, Nn, Hn = img_ref.shape
    T2B = q_pk_ref.shape[0]            # T * 2B packed rows (time-major)
    Tn = T2B // (2 * Bn)
    G = 4 * Hn                         # per-direction gate width (512)

    # ---- hoisted biLSTM input projection --------------------------------------
    # q_pk rows are ordered [t0: fwd_b0, fwd_b1, bwd_b0, bwd_b1, t1: ...] where
    # the bwd rows already carry the time-reversed inputs.  One matmul against
    # the lane-concatenated [W_ih_f | W_ih_b] projects both directions; a row
    # select keeps each row's own direction (combined bias b_ih + b_hh folded in).
    x_all = (jnp.dot(q_pk_ref[...], w_ih_cat_ref[...],
                     preferred_element_type=f32) + b_cat_ref[...])     # (T*2B, 8H)
    row_id = lax.broadcasted_iota(jnp.int32, (T2B, 1), 0)
    row_is_fwd = (row_id % (2 * Bn)) < Bn
    xp = jnp.where(row_is_fwd, x_all[:, :G], x_all[:, G:])             # (T*2B, 4H)

    # ---- packed biLSTM recurrence ----------------------------------------------
    # State packed as (2B, H): rows 0..B-1 = forward direction, B..2B-1 = backward.
    # One bf16 MXU matmul per step against [W_hh_f | W_hh_b]; unused quadrants
    # dropped with a lane-select; gates/state math stays f32.
    whh_bf = w_hh_cat_ref[...].astype(bf16)                            # (H, 8H)
    dir_is_fwd = lax.broadcasted_iota(jnp.int32, (2 * Bn, 1), 0) < Bn  # (2B, 1)
    hc = jnp.zeros((2 * Bn, Hn), f32)
    cc = jnp.zeros((2 * Bn, Hn), f32)
    # Fully unrolled (T is a small static trip count).
    for s in range(Tn):
        g_full = jnp.dot(hc.astype(bf16), whh_bf,
                         preferred_element_type=f32)                   # (2B, 8H)
        g = (xp[s * 2 * Bn:(s + 1) * 2 * Bn, :]
             + jnp.where(dir_is_fwd, g_full[:, :G], g_full[:, G:]))    # (2B, 4H)
        # PyTorch gate order i, f, g, o; each slice is one full 128-lane span.
        i = jax.nn.sigmoid(g[:, 0 * Hn:1 * Hn])
        f = jax.nn.sigmoid(g[:, 1 * Hn:2 * Hn])
        gg = jnp.tanh(g[:, 2 * Hn:3 * Hn])
        o = jax.nn.sigmoid(g[:, 3 * Hn:4 * Hn])
        cc = f * cc + i * gg
        hc = o * jnp.tanh(cc)

    # lstm_proj: lay hf|hb side-by-side along lanes -> single (B,2H)@(2H,H) matmul.
    h_cat = jnp.concatenate([hc[:Bn], hc[Bn:]], axis=1)                # (B, 2H)
    q_emb = jnp.dot(h_cat, wp_ref[...], preferred_element_type=f32) + bp_ref[...]

    # ---- attention over objects (all batches at once) ---------------------------
    img = img_ref[...]                                                 # (B, N, H)
    img2d = img.reshape(Bn * Nn, Hn)
    v_proj = jnp.dot(img2d, att_wv_ref[...],
                     preferred_element_type=f32).reshape(Bn, Nn, Hn)
    q_proj = jnp.dot(q_emb, att_wq_ref[...], preferred_element_type=f32)
    joint = jnp.maximum(v_proj + q_proj[:, None, :] + att_b_ref[...], 0.0)
    # The (1,1) bias of the final attention Linear cancels under softmax.
    logits = jnp.sum(joint * att_wl_ref[...], axis=-1)                 # (B, N)
    m = jnp.max(logits, axis=-1, keepdims=True)
    e = jnp.exp(logits - m)
    att = e * pl.reciprocal(jnp.sum(e, axis=-1, keepdims=True), approx=True)
    v_emb = jnp.sum(att[:, :, None] * img, axis=1)                     # (B, H)

    # ---- q_net / v_net / fused role+verb classifier heads -----------------------
    q_repr = jnp.maximum(
        jnp.dot(q_emb, wqn_ref[...], preferred_element_type=f32) + bqn_ref[...], 0.0)
    v_repr = jnp.maximum(
        jnp.dot(v_emb, wvn_ref[...], preferred_element_type=f32) + bvn_ref[...], 0.0)
    joint_repr = q_repr * v_repr
    # head_w1 = [role_w1 | verb_w1]: both first layers in one matmul.
    h1 = jnp.maximum(
        jnp.dot(joint_repr, head_w1_ref[...], preferred_element_type=f32)
        + head_b1_ref[...], 0.0)                                       # (B, 4H)
    role = (jnp.dot(h1[:, :2 * Hn], role_w2_ref[...], preferred_element_type=f32)
            + role_b2_ref[...])                                        # (B, OUT_PAD)
    verb = (jnp.dot(h1[:, 2 * Hn:], verb_w2_ref[...], preferred_element_type=f32)
            + verb_b2_ref[...])                                        # (B, OUT_PAD)
    out_ref[...] = jnp.concatenate([role, verb], axis=1)               # (B, 2*OUT_PAD)


def topdown_forward(img, q, params):
    """Fused forward: one pallas_call returns BOTH (role_logits, verb_logits),
    replacing the two isVerb=False/True calls of the original module."""
    p = params
    Bq, Tq, Eq = q.shape
    # Pack the word embeddings time-major: per timestep, B fwd rows followed by
    # B (time-reversed) bwd rows -> contiguous (2B, 4H) gate-input slices.
    q_tm = jnp.transpose(q, (1, 0, 2))                                 # (T, B, E)
    q_pk = jnp.concatenate([q_tm, q_tm[::-1]], axis=1).reshape(Tq * 2 * Bq, Eq)

    out = pl.pallas_call(
        topdown_kernel,
        out_shape=jax.ShapeDtypeStruct((Bq, 2 * OUT_PAD), jnp.float32),
    )(q_pk, img,
      p['w_ih_cat'], p['b_cat'], p['w_hh_cat'],
      p['w_proj'], p['b_proj'],
      p['att_wv'], p['att_wq'], p['att_b'], p['att_wl'],
      p['qnet_w'], p['qnet_b'], p['vnet_w'], p['vnet_b'],
      p['head_w1'], p['head_b1'],
      p['role_w2p'], p['role_b2p'], p['verb_w2p'], p['verb_b2p'])
    return out[:, :VOCAB], out[:, OUT_PAD:OUT_PAD + N_VERBS]


# ======================= pure-JAX reference (for correctness check) ==========
def ref_forward(img, q, p, isVerb=False):
    def lstm_dir(xs, wi, wh, b):
        Hn = wh.shape[0]

        def step(carry, x):
            h, c = carry
            g = x @ wi + h @ wh + b[0]
            i = jax.nn.sigmoid(g[:, :Hn])
            f = jax.nn.sigmoid(g[:, Hn:2 * Hn])
            gg = jnp.tanh(g[:, 2 * Hn:3 * Hn])
            o = jax.nn.sigmoid(g[:, 3 * Hn:])
            c = f * c + i * gg
            h = o * jnp.tanh(c)
            return (h, c), None

        h0 = jnp.zeros((xs.shape[1], Hn), jnp.float32)
        (h, _), _ = lax.scan(step, (h0, h0), xs)
        return h

    xs = jnp.transpose(q, (1, 0, 2))
    hf = lstm_dir(xs, p['w_ih_f'], p['w_hh_f'], p['b_f'])
    hb = lstm_dir(xs[::-1], p['w_ih_b'], p['w_hh_b'], p['b_b'])
    q_emb = jnp.concatenate([hf, hb], axis=1) @ p['w_proj'] + p['b_proj'][0]
    joint = jax.nn.relu(jnp.einsum('bnh,hk->bnk', img, p['att_wv'])
                        + (q_emb @ p['att_wq'])[:, None, :] + p['att_b'][0])
    logits = jnp.sum(joint * p['att_wl'][0], axis=-1, keepdims=True) + p['att_bl'][0]
    att = jax.nn.softmax(logits, axis=1)
    v_emb = jnp.sum(att * img, axis=1)
    q_repr = jax.nn.relu(q_emb @ p['qnet_w'] + p['qnet_b'][0])
    v_repr = jax.nn.relu(v_emb @ p['vnet_w'] + p['vnet_b'][0])
    j = q_repr * v_repr
    if isVerb:
        h1 = jax.nn.relu(j @ p['verb_w1'] + p['verb_b1'][0])
        return h1 @ p['verb_w2'] + p['verb_b2'][0]
    h1 = jax.nn.relu(j @ p['role_w1'] + p['role_b1'][0])
    return h1 @ p['role_w2'] + p['role_b2'][0]


# ======================= deterministic parameter init ========================
def init_params(key):
    ks = jax.random.split(key, 30)

    def w(k, shape, scale=0.05):
        return jax.random.normal(k, shape, jnp.float32) * scale

    p = dict(
        # bidirectional LSTM (transposed weights; bias = b_ih + b_hh combined)
        w_ih_f=w(ks[0], (E, 4 * H)), w_hh_f=w(ks[1], (H, 4 * H)), b_f=w(ks[2], (1, 4 * H)),
        w_ih_b=w(ks[3], (E, 4 * H)), w_hh_b=w(ks[4], (H, 4 * H)), b_b=w(ks[5], (1, 4 * H)),
        # lstm_proj: Linear(2H -> H)
        w_proj=w(ks[6], (2 * H, H)), b_proj=w(ks[7], (1, H)),
        # Attention: FCNet([2H, H]) split into v- and q- halves, then Linear(H -> 1)
        att_wv=w(ks[8], (H, H)), att_wq=w(ks[9], (H, H)), att_b=w(ks[10], (1, H)),
        att_wl=w(ks[11], (1, H)), att_bl=w(ks[12], (1, 1)),
        # q_net / v_net: FCNet([H, H])
        qnet_w=w(ks[13], (H, H)), qnet_b=w(ks[14], (1, H)),
        # role classifier: Linear(H -> 2H) -> ReLU -> Linear(2H -> vocab)
        role_w1=w(ks[17], (H, 2 * H)), role_b1=w(ks[18], (1, 2 * H)),
        role_w2=w(ks[19], (2 * H, VOCAB)), role_b2=w(ks[20], (1, VOCAB)),
        # verb classifier: Linear(H -> 2H) -> ReLU -> Linear(2H -> n_verbs)
        verb_w1=w(ks[21], (H, 2 * H)), verb_b1=w(ks[22], (1, 2 * H)),
        verb_w2=w(ks[23], (2 * H, N_VERBS)), verb_b2=w(ks[24], (1, N_VERBS)),
    )
    p['vnet_w'] = w(ks[15], (H, H))
    p['vnet_b'] = w(ks[16], (1, H))

    # --- pre-concatenated weights consumed by the fused kernel ---------------
    # biLSTM: [fwd | bwd] along the gate (output) axis.
    p['w_ih_cat'] = jnp.concatenate([p['w_ih_f'], p['w_ih_b']], axis=1)   # (E, 8H)
    p['b_cat'] = jnp.concatenate([p['b_f'], p['b_b']], axis=1)            # (1, 8H)
    p['w_hh_cat'] = jnp.concatenate([p['w_hh_f'], p['w_hh_b']], axis=1)   # (H, 8H)
    # Fused classifier first layer: [role | verb].
    p['head_w1'] = jnp.concatenate([p['role_w1'], p['verb_w1']], axis=1)  # (H, 4H)
    p['head_b1'] = jnp.concatenate([p['role_b1'], p['verb_b1']], axis=1)  # (1, 4H)
    # Lane-dense (zero-padded to 128) classifier output weights; the wrapper
    # slices the padded logits back to the true widths.
    p['role_w2p'] = jnp.zeros((2 * H, OUT_PAD), jnp.float32).at[:, :VOCAB].set(p['role_w2'])
    p['role_b2p'] = jnp.zeros((1, OUT_PAD), jnp.float32).at[:, :VOCAB].set(p['role_b2'])
    p['verb_w2p'] = jnp.zeros((2 * H, OUT_PAD), jnp.float32).at[:, :N_VERBS].set(p['verb_w2'])
    p['verb_b2p'] = jnp.zeros((1, OUT_PAD), jnp.float32).at[:, :N_VERBS].set(p['verb_b2'])
    return p


if __name__ == "__main__":
    key = jax.random.PRNGKey(0)
    pkey, ikey, qkey = jax.random.split(key, 3)
    params = init_params(pkey)

    img = jax.random.normal(ikey, (B, N, H), jnp.float32)   # (B, objects, mlp_hidden)
    q = jax.random.normal(qkey, (B, T, E), jnp.float32)     # (B, seq, embed_hidden)

    # ONE fused kernel call produces both heads (role + verb).
    role_logits, verb_logits = topdown_forward(img, q, params)
    role_logits = jax.block_until_ready(role_logits)
    verb_logits = jax.block_until_ready(verb_logits)

    ref_role = ref_forward(img, q, params, isVerb=False)
    ref_verb = ref_forward(img, q, params, isVerb=True)

    assert role_logits.shape == (B, VOCAB)
    assert verb_logits.shape == (B, N_VERBS)
    np.testing.assert_allclose(np.asarray(role_logits), np.asarray(ref_role),
                               rtol=1e-2, atol=1e-3)
    np.testing.assert_allclose(np.asarray(verb_logits), np.asarray(ref_verb),
                               rtol=1e-2, atol=1e-3)

    print("KERNEL_OK")
</pallas_src>

<mosaic_0001>
module attributes {stable_mosaic.version = 11 : i64} {
  func.func @topdown_kernel(%arg0: memref<32x32xf32, #tpu.memory_space<vmem>>, %arg1: memref<2x16x128xf32, #tpu.memory_space<vmem>>, %arg2: memref<32x1024xf32, #tpu.memory_space<vmem>>, %arg3: memref<1x1024xf32, #tpu.memory_space<vmem>>, %arg4: memref<128x1024xf32, #tpu.memory_space<vmem>>, %arg5: memref<256x128xf32, #tpu.memory_space<vmem>>, %arg6: memref<1x128xf32, #tpu.memory_space<vmem>>, %arg7: memref<128x128xf32, #tpu.memory_space<vmem>>, %arg8: memref<128x128xf32, #tpu.memory_space<vmem>>, %arg9: memref<1x128xf32, #tpu.memory_space<vmem>>, %arg10: memref<1x128xf32, #tpu.memory_space<vmem>>, %arg11: memref<128x128xf32, #tpu.memory_space<vmem>>, %arg12: memref<1x128xf32, #tpu.memory_space<vmem>>, %arg13: memref<128x128xf32, #tpu.memory_space<vmem>>, %arg14: memref<1x128xf32, #tpu.memory_space<vmem>>, %arg15: memref<128x512xf32, #tpu.memory_space<vmem>>, %arg16: memref<1x512xf32, #tpu.memory_space<vmem>>, %arg17: memref<256x128xf32, #tpu.memory_space<vmem>>, %arg18: memref<1x128xf32, #tpu.memory_space<vmem>>, %arg19: memref<256x128xf32, #tpu.memory_space<vmem>>, %arg20: memref<1x128xf32, #tpu.memory_space<vmem>>, %arg21: memref<2x256xf32, #tpu.memory_space<vmem>>) attributes {dimension_semantics = [], scalar_prefetch = 0 : i64, scratch_operands = 0 : i64, tpu.core_type = #tpu.core_type<tc>} {
    %c0 = arith.constant 0 : index
    %c0_0 = arith.constant 0 : index
    %0 = vector.load %arg0[%c0, %c0_0] : memref<32x32xf32, #tpu.memory_space<vmem>>, vector<32x32xf32>
    %c0_1 = arith.constant 0 : index
    %c0_2 = arith.constant 0 : index
    %1 = vector.load %arg2[%c0_1, %c0_2] : memref<32x1024xf32, #tpu.memory_space<vmem>>, vector<32x1024xf32>
    %cst = arith.constant dense<0.000000e+00> : vector<32x1024xf32>
    %2 = tpu.matmul %0, %1, %cst {dimension_numbers = #tpu.dot_dimension_numbers<[1], [0], [0], [1], [0, 0, 1, 1], [], []>} : vector<32x32xf32>, vector<32x1024xf32>, vector<32x1024xf32> -> vector<32x1024xf32>
    %c0_3 = arith.constant 0 : index
    %c0_4 = arith.constant 0 : index
    %3 = vector.load %arg3[%c0_3, %c0_4] : memref<1x1024xf32, #tpu.memory_space<vmem>>, vector<1x1024xf32>
    %4 = vector.broadcast %3 : vector<1x1024xf32> to vector<32x1024xf32>
    %5 = arith.addf %2, %4 : vector<32x1024xf32>
    %6 = tpu.iota {dimensions = array<i32: 0>} : vector<32x1xi32>
    %c4_i32 = arith.constant 4 : i32
    %c0_i32 = arith.constant 0 : i32
    %7 = arith.cmpi eq, %c4_i32, %c0_i32 : i32
    %c1_i32 = arith.constant 1 : i32
    %8 = arith.select %7, %c1_i32, %c4_i32 : i32
    %9 = vector.broadcast %8 : i32 to vector<32x1xi32>
    %10 = arith.remsi %6, %9 : vector<32x1xi32>
    %c0_i32_5 = arith.constant 0 : i32
    %11 = vector.broadcast %c0_i32_5 : i32 to vector<32x1xi32>
    %12 = arith.cmpi ne, %10, %11 : vector<32x1xi32>
    %c0_i32_6 = arith.constant 0 : i32
    %13 = vector.broadcast %c0_i32_6 : i32 to vector<32x1xi32>
    %14 = arith.cmpi slt, %10, %13 : vector<32x1xi32>
    %c0_i32_7 = arith.constant 0 : i32
    %15 = arith.cmpi slt, %8, %c0_i32_7 : i32
    %16 = vector.broadcast %15 : i1 to vector<32x1xi1>
    %17 = vector.broadcast %16 : vector<32x1xi1> to vector<32x1xi1>
    %18 = arith.xori %14, %17 : vector<32x1xi1>
    %19 = arith.andi %18, %12 : vector<32x1xi1>
    %20 = vector.broadcast %8 : i32 to vector<32x1xi32>
    %21 = arith.addi %10, %20 : vector<32x1xi32>
    %22 = arith.select %19, %21, %10 : vector<32x1xi1>, vector<32x1xi32>
    %c2_i32 = arith.constant 2 : i32
    %23 = vector.broadcast %c2_i32 : i32 to vector<32x1xi32>
    %24 = arith.cmpi slt, %22, %23 : vector<32x1xi32>
    %25 = vector.extract_strided_slice %5 {offsets = [0, 0], sizes = [32, 512], strides = [1, 1]} : vector<32x1024xf32> to vector<32x512xf32>
    %26 = vector.extract_strided_slice %5 {offsets = [0, 512], sizes = [32, 512], strides = [1, 1]} : vector<32x1024xf32> to vector<32x512xf32>
    %27 = vector.shape_cast %24 : vector<32x1xi1> to vector<32x1xi1>
    %28 = vector.broadcast %27 : vector<32x1xi1> to vector<32x512xi1>
    %29 = arith.select %28, %25, %26 : vector<32x512xi1>, vector<32x512xf32>
    %c0_8 = arith.constant 0 : index
    %c0_9 = arith.constant 0 : index
    %30 = vector.load %arg4[%c0_8, %c0_9] : memref<128x1024xf32, #tpu.memory_space<vmem>>, vector<128x1024xf32>
    %31 = arith.truncf %30 : vector<128x1024xf32> to vector<128x1024xbf16>
    %32 = tpu.iota {dimensions = array<i32: 0>} : vector<4x1xi32>
    %c2_i32_10 = arith.constant 2 : i32
    %33 = vector.broadcast %c2_i32_10 : i32 to vector<4x1xi32>
    %34 = arith.cmpi slt, %32, %33 : vector<4x1xi32>
    %cst_11 = arith.constant 0.000000e+00 : f32
    %35 = vector.broadcast %cst_11 : f32 to vector<4x128xf32>
    %cst_12 = arith.constant 0.000000e+00 : f32
    %36 = vector.broadcast %cst_12 : f32 to vector<4x128xf32>
    %37 = arith.truncf %35 : vector<4x128xf32> to vector<4x128xbf16>
    %cst_13 = arith.constant dense<0.000000e+00> : vector<4x1024xf32>
    %38 = tpu.matmul %37, %31, %cst_13 {dimension_numbers = #tpu.dot_dimension_numbers<[1], [0], [0], [1], [0, 0, 1, 1], [], []>} : vector<4x128xbf16>, vector<128x1024xbf16>, vector<4x1024xf32> -> vector<4x1024xf32>
    %39 = vector.extract_strided_slice %29 {offsets = [0, 0], sizes = [4, 512], strides = [1, 1]} : vector<32x512xf32> to vector<4x512xf32>
    %40 = vector.extract_strided_slice %38 {offsets = [0, 0], sizes = [4, 512], strides = [1, 1]} : vector<4x1024xf32> to vector<4x512xf32>
    %41 = vector.extract_strided_slice %38 {offsets = [0, 512], sizes = [4, 512], strides = [1, 1]} : vector<4x1024xf32> to vector<4x512xf32>
    %42 = vector.shape_cast %34 : vector<4x1xi1> to vector<4x1xi1>
    %43 = vector.broadcast %42 : vector<4x1xi1> to vector<4x512xi1>
    %44 = arith.select %43, %40, %41 : vector<4x512xi1>, vector<4x512xf32>
    %45 = arith.addf %39, %44 : vector<4x512xf32>
    %46 = vector.extract_strided_slice %45 {offsets = [0, 0], sizes = [4, 128], strides = [1, 1]} : vector<4x512xf32> to vector<4x128xf32>
    %47 = arith.negf %46 : vector<4x128xf32>
    %48 = math.exp %47 : vector<4x128xf32>
    %cst_14 = arith.constant 1.000000e+00 : f32
    %49 = vector.broadcast %cst_14 : f32 to vector<4x128xf32>
    %50 = arith.addf %49, %48 : vector<4x128xf32>
    %51 = arith.divf %49, %50 : vector<4x128xf32>
    %52 = vector.extract_strided_slice %45 {offsets = [0, 128], sizes = [4, 128], strides = [1, 1]} : vector<4x512xf32> to vector<4x128xf32>
    %53 = arith.negf %52 : vector<4x128xf32>
    %54 = math.exp %53 : vector<4x128xf32>
    %cst_15 = arith.constant 1.000000e+00 : f32
    %55 = vector.broadcast %cst_15 : f32 to vector<4x128xf32>
    %56 = arith.addf %55, %54 : vector<4x128xf32>
    %57 = arith.divf %55, %56 : vector<4x128xf32>
    %58 = vector.extract_strided_slice %45 {offsets = [0, 256], sizes = [4, 128], strides = [1, 1]} : vector<4x512xf32> to vector<4x128xf32>
    %59 = math.tanh %58 : vector<4x128xf32>
    %60 = vector.extract_strided_slice %45 {offsets = [0, 384], sizes = [4, 128], strides = [1, 1]} : vector<4x512xf32> to vector<4x128xf32>
    %61 = arith.negf %60 : vector<4x128xf32>
    %62 = math.exp %61 : vector<4x128xf32>
    %cst_16 = arith.constant 1.000000e+00 : f32
    %63 = vector.broadcast %cst_16 : f32 to vector<4x128xf32>
    %64 = arith.addf %63, %62 : vector<4x128xf32>
    %65 = arith.divf %63, %64 : vector<4x128xf32>
    %66 = arith.mulf %57, %36 : vector<4x128xf32>
    %67 = arith.mulf %51, %59 : vector<4x128xf32>
    %68 = arith.addf %66, %67 : vector<4x128xf32>
    %69 = math.tanh %68 : vector<4x128xf32>
    %70 = arith.mulf %65, %69 : vector<4x128xf32>
    %71 = arith.truncf %70 : vector<4x128xf32> to vector<4x128xbf16>
    %cst_17 = arith.constant dense<0.000000e+00> : vector<4x1024xf32>
    %72 = tpu.matmul %71, %31, %cst_17 {dimension_numbers = #tpu.dot_dimension_numbers<[1], [0], [0], [1], [0, 0, 1, 1], [], []>} : vector<4x128xbf16>, vector<128x1024xbf16>, vector<4x1024xf32> -> vector<4x1024xf32>
    %73 = vector.extract_strided_slice %29 {offsets = [4, 0], sizes = [4, 512], strides = [1, 1]} : vector<32x512xf32> to vector<4x512xf32>
    %74 = vector.extract_strided_slice %72 {offsets = [0, 0], sizes = [4, 512], strides = [1, 1]} : vector<4x1024xf32> to vector<4x512xf32>
    %75 = vector.extract_strided_slice %72 {offsets = [0, 512], sizes = [4, 512], strides = [1, 1]} : vector<4x1024xf32> to vector<4x512xf32>
    %76 = vector.shape_cast %34 : vector<4x1xi1> to vector<4x1xi1>
    %77 = vector.broadcast %76 : vector<4x1xi1> to vector<4x512xi1>
    %78 = arith.select %77, %74, %75 : vector<4x512xi1>, vector<4x512xf32>
    %79 = arith.addf %73, %78 : vector<4x512xf32>
    %80 = vector.extract_strided_slice %79 {offsets = [0, 0], sizes = [4, 128], strides = [1, 1]} : vector<4x512xf32> to vector<4x128xf32>
    %81 = arith.negf %80 : vector<4x128xf32>
    %82 = math.exp %81 : vector<4x128xf32>
    %cst_18 = arith.constant 1.000000e+00 : f32
    %83 = vector.broadcast %cst_18 : f32 to vector<4x128xf32>
    %84 = arith.addf %83, %82 : vector<4x128xf32>
    %85 = arith.divf %83, %84 : vector<4x128xf32>
    %86 = vector.extract_strided_slice %79 {offsets = [0, 128], sizes = [4, 128], strides = [1, 1]} : vector<4x512xf32> to vector<4x128xf32>
    %87 = arith.negf %86 : vector<4x128xf32>
    %88 = math.exp %87 : vector<4x128xf32>
    %cst_19 = arith.constant 1.000000e+00 : f32
    %89 = vector.broadcast %cst_19 : f32 to vector<4x128xf32>
    %90 = arith.addf %89, %88 : vector<4x128xf32>
    %91 = arith.divf %89, %90 : vector<4x128xf32>
    %92 = vector.extract_strided_slice %79 {offsets = [0, 256], sizes = [4, 128], strides = [1, 1]} : vector<4x512xf32> to vector<4x128xf32>
    %93 = math.tanh %92 : vector<4x128xf32>
    %94 = vector.extract_strided_slice %79 {offsets = [0, 384], sizes = [4, 128], strides = [1, 1]} : vector<4x512xf32> to vector<4x128xf32>
    %95 = arith.negf %94 : vector<4x128xf32>
    %96 = math.exp %95 : vector<4x128xf32>
    %cst_20 = arith.constant 1.000000e+00 : f32
    %97 = vector.broadcast %cst_20 : f32 to vector<4x128xf32>
    %98 = arith.addf %97, %96 : vector<4x128xf32>
    %99 = arith.divf %97, %98 : vector<4x128xf32>
    %100 = arith.mulf %91, %68 : vector<4x128xf32>
    %101 = arith.mulf %85, %93 : vector<4x128xf32>
    %102 = arith.addf %100, %101 : vector<4x128xf32>
    %103 = math.tanh %102 : vector<4x128xf32>
    %104 = arith.mulf %99, %103 : vector<4x128xf32>
    %105 = arith.truncf %104 : vector<4x128xf32> to vector<4x128xbf16>
    %cst_21 = arith.constant dense<0.000000e+00> : vector<4x1024xf32>
    %106 = tpu.matmul %105, %31, %cst_21 {dimension_numbers = #tpu.dot_dimension_numbers<[1], [0], [0], [1], [0, 0, 1, 1], [], []>} : vector<4x128xbf16>, vector<128x1024xbf16>, vector<4x1024xf32> -> vector<4x1024xf32>
    %107 = vector.extract_strided_slice %29 {offsets = [8, 0], sizes = [4, 512], strides = [1, 1]} : vector<32x512xf32> to vector<4x512xf32>
    %108 = vector.extract_strided_slice %106 {offsets = [0, 0], sizes = [4, 512], strides = [1, 1]} : vector<4x1024xf32> to vector<4x512xf32>
    %109 = vector.extract_strided_slice %106 {offsets = [0, 512], sizes = [4, 512], strides = [1, 1]} : vector<4x1024xf32> to vector<4x512xf32>
    %110 = vector.shape_cast %34 : vector<4x1xi1> to vector<4x1xi1>
    %111 = vector.broadcast %110 : vector<4x1xi1> to vector<4x512xi1>
    %112 = arith.select %111, %108, %109 : vector<4x512xi1>, vector<4x512xf32>
    %113 = arith.addf %107, %112 : vector<4x512xf32>
    %114 = vector.extract_strided_slice %113 {offsets = [0, 0], sizes = [4, 128], strides = [1, 1]} : vector<4x512xf32> to vector<4x128xf32>
    %115 = arith.negf %114 : vector<4x128xf32>
    %116 = math.exp %115 : vector<4x128xf32>
    %cst_22 = arith.constant 1.000000e+00 : f32
    %117 = vector.broadcast %cst_22 : f32 to vector<4x128xf32>
    %118 = arith.addf %117, %116 : vector<4x128xf32>
    %119 = arith.divf %117, %118 : vector<4x128xf32>
    %120 = vector.extract_strided_slice %113 {offsets = [0, 128], sizes = [4, 128], strides = [1, 1]} : vector<4x512xf32> to vector<4x128xf32>
    %121 = arith.negf %120 : vector<4x128xf32>
    %122 = math.exp %121 : vector<4x128xf32>
    %cst_23 = arith.constant 1.000000e+00 : f32
    %123 = vector.broadcast %cst_23 : f32 to vector<4x128xf32>
    %124 = arith.addf %123, %122 : vector<4x128xf32>
    %125 = arith.divf %123, %124 : vector<4x128xf32>
    %126 = vector.extract_strided_slice %113 {offsets = [0, 256], sizes = [4, 128], strides = [1, 1]} : vector<4x512xf32> to vector<4x128xf32>
    %127 = math.tanh %126 : vector<4x128xf32>
    %128 = vector.extract_strided_slice %113 {offsets = [0, 384], sizes = [4, 128], strides = [1, 1]} : vector<4x512xf32> to vector<4x128xf32>
    %129 = arith.negf %128 : vector<4x128xf32>
    %130 = math.exp %129 : vector<4x128xf32>
    %cst_24 = arith.constant 1.000000e+00 : f32
    %131 = vector.broadcast %cst_24 : f32 to vector<4x128xf32>
    %132 = arith.addf %131, %130 : vector<4x128xf32>
    %133 = arith.divf %131, %132 : vector<4x128xf32>
    %134 = arith.mulf %125, %102 : vector<4x128xf32>
    %135 = arith.mulf %119, %127 : vector<4x128xf32>
    %136 = arith.addf %134, %135 : vector<4x128xf32>
    %137 = math.tanh %136 : vector<4x128xf32>
    %138 = arith.mulf %133, %137 : vector<4x128xf32>
    %139 = arith.truncf %138 : vector<4x128xf32> to vector<4x128xbf16>
    %cst_25 = arith.constant dense<0.000000e+00> : vector<4x1024xf32>
    %140 = tpu.matmul %139, %31, %cst_25 {dimension_numbers = #tpu.dot_dimension_numbers<[1], [0], [0], [1], [0, 0, 1, 1], [], []>} : vector<4x128xbf16>, vector<128x1024xbf16>, vector<4x1024xf32> -> vector<4x1024xf32>
    %141 = vector.extract_strided_slice %29 {offsets = [12, 0], sizes = [4, 512], strides = [1, 1]} : vector<32x512xf32> to vector<4x512xf32>
    %142 = vector.extract_strided_slice %140 {offsets = [0, 0], sizes = [4, 512], strides = [1, 1]} : vector<4x1024xf32> to vector<4x512xf32>
    %143 = vector.extract_strided_slice %140 {offsets = [0, 512], sizes = [4, 512], strides = [1, 1]} : vector<4x1024xf32> to vector<4x512xf32>
    %144 = vector.shape_cast %34 : vector<4x1xi1> to vector<4x1xi1>
    %145 = vector.broadcast %144 : vector<4x1xi1> to vector<4x512xi1>
    %146 = arith.select %145, %142, %143 : vector<4x512xi1>, vector<4x512xf32>
    %147 = arith.addf %141, %146 : vector<4x512xf32>
    %148 = vector.extract_strided_slice %147 {offsets = [0, 0], sizes = [4, 128], strides = [1, 1]} : vector<4x512xf32> to vector<4x128xf32>
    %149 = arith.negf %148 : vector<4x128xf32>
    %150 = math.exp %149 : vector<4x128xf32>
    %cst_26 = arith.constant 1.000000e+00 : f32
    %151 = vector.broadcast %cst_26 : f32 to vector<4x128xf32>
    %152 = arith.addf %151, %150 : vector<4x128xf32>
    %153 = arith.divf %151, %152 : vector<4x128xf32>
    %154 = vector.extract_strided_slice %147 {offsets = [0, 128], sizes = [4, 128], strides = [1, 1]} : vector<4x512xf32> to vector<4x128xf32>
    %155 = arith.negf %154 : vector<4x128xf32>
    %156 = math.exp %155 : vector<4x128xf32>
    %cst_27 = arith.constant 1.000000e+00 : f32
    %157 = vector.broadcast %cst_27 : f32 to vector<4x128xf32>
    %158 = arith.addf %157, %156 : vector<4x128xf32>
    %159 = arith.divf %157, %158 : vector<4x128xf32>
    %160 = vector.extract_strided_slice %147 {offsets = [0, 256], sizes = [4, 128], strides = [1, 1]} : vector<4x512xf32> to vector<4x128xf32>
    %161 = math.tanh %160 : vector<4x128xf32>
    %162 = vector.extract_strided_slice %147 {offsets = [0, 384], sizes = [4, 128], strides = [1, 1]} : vector<4x512xf32> to vector<4x128xf32>
    %163 = arith.negf %162 : vector<4x128xf32>
    %164 = math.exp %163 : vector<4x128xf32>
    %cst_28 = arith.constant 1.000000e+00 : f32
    %165 = vector.broadcast %cst_28 : f32 to vector<4x128xf32>
    %166 = arith.addf %165, %164 : vector<4x128xf32>
    %167 = arith.divf %165, %166 : vector<4x128xf32>
    %168 = arith.mulf %159, %136 : vector<4x128xf32>
    %169 = arith.mulf %153, %161 : vector<4x128xf32>
    %170 = arith.addf %168, %169 : vector<4x128xf32>
    %171 = math.tanh %170 : vector<4x128xf32>
    %172 = arith.mulf %167, %171 : vector<4x128xf32>
    %173 = arith.truncf %172 : vector<4x128xf32> to vector<4x128xbf16>
    %cst_29 = arith.constant dense<0.000000e+00> : vector<4x1024xf32>
    %174 = tpu.matmul %173, %31, %cst_29 {dimension_numbers = #tpu.dot_dimension_numbers<[1], [0], [0], [1], [0, 0, 1, 1], [], []>} : vector<4x128xbf16>, vector<128x1024xbf16>, vector<4x1024xf32> -> vector<4x1024xf32>
    %175 = vector.extract_strided_slice %29 {offsets = [16, 0], sizes = [4, 512], strides = [1, 1]} : vector<32x512xf32> to vector<4x512xf32>
    %176 = vector.extract_strided_slice %174 {offsets = [0, 0], sizes = [4, 512], strides = [1, 1]} : vector<4x1024xf32> to vector<4x512xf32>
    %177 = vector.extract_strided_slice %174 {offsets = [0, 512], sizes = [4, 512], strides = [1, 1]} : vector<4x1024xf32> to vector<4x512xf32>
    %178 = vector.shape_cast %34 : vector<4x1xi1> to vector<4x1xi1>
    %179 = vector.broadcast %178 : vector<4x1xi1> to vector<4x512xi1>
    %180 = arith.select %179, %176, %177 : vector<4x512xi1>, vector<4x512xf32>
    %181 = arith.addf %175, %180 : vector<4x512xf32>
    %182 = vector.extract_strided_slice %181 {offsets = [0, 0], sizes = [4, 128], strides = [1, 1]} : vector<4x512xf32> to vector<4x128xf32>
    %183 = arith.negf %182 : vector<4x128xf32>
    %184 = math.exp %183 : vector<4x128xf32>
    %cst_30 = arith.constant 1.000000e+00 : f32
    %185 = vector.broadcast %cst_30 : f32 to vector<4x128xf32>
    %186 = arith.addf %185, %184 : vector<4x128xf32>
    %187 = arith.divf %185, %186 : vector<4x128xf32>
    %188 = vector.extract_strided_slice %181 {offsets = [0, 128], sizes = [4, 128], strides = [1, 1]} : vector<4x512xf32> to vector<4x128xf32>
    %189 = arith.negf %188 : vector<4x128xf32>
    %190 = math.exp %189 : vector<4x128xf32>
    %cst_31 = arith.constant 1.000000e+00 : f32
    %191 = vector.broadcast %cst_31 : f32 to vector<4x128xf32>
    %192 = arith.addf %191, %190 : vector<4x128xf32>
    %193 = arith.divf %191, %192 : vector<4x128xf32>
    %194 = vector.extract_strided_slice %181 {offsets = [0, 256], sizes = [4, 128], strides = [1, 1]} : vector<4x512xf32> to vector<4x128xf32>
    %195 = math.tanh %194 : vector<4x128xf32>
    %196 = vector.extract_strided_slice %181 {offsets = [0, 384], sizes = [4, 128], strides = [1, 1]} : vector<4x512xf32> to vector<4x128xf32>
    %197 = arith.negf %196 : vector<4x128xf32>
    %198 = math.exp %197 : vector<4x128xf32>
    %cst_32 = arith.constant 1.000000e+00 : f32
    %199 = vector.broadcast %cst_32 : f32 to vector<4x128xf32>
    %200 = arith.addf %199, %198 : vector<4x128xf32>
    %201 = arith.divf %199, %200 : vector<4x128xf32>
    %202 = arith.mulf %193, %170 : vector<4x128xf32>
    %203 = arith.mulf %187, %195 : vector<4x128xf32>
    %204 = arith.addf %202, %203 : vector<4x128xf32>
    %205 = math.tanh %204 : vector<4x128xf32>
    %206 = arith.mulf %201, %205 : vector<4x128xf32>
    %207 = arith.truncf %206 : vector<4x128xf32> to vector<4x128xbf16>
    %cst_33 = arith.constant dense<0.000000e+00> : vector<4x1024xf32>
    %208 = tpu.matmul %207, %31, %cst_33 {dimension_numbers = #tpu.dot_dimension_numbers<[1], [0], [0], [1], [0, 0, 1, 1], [], []>} : vector<4x128xbf16>, vector<128x1024xbf16>, vector<4x1024xf32> -> vector<4x1024xf32>
    %209 = vector.extract_strided_slice %29 {offsets = [20, 0], sizes = [4, 512], strides = [1, 1]} : vector<32x512xf32> to vector<4x512xf32>
    %210 = vector.extract_strided_slice %208 {offsets = [0, 0], sizes = [4, 512], strides = [1, 1]} : vector<4x1024xf32> to vector<4x512xf32>
    %211 = vector.extract_strided_slice %208 {offsets = [0, 512], sizes = [4, 512], strides = [1, 1]} : vector<4x1024xf32> to vector<4x512xf32>
    %212 = vector.shape_cast %34 : vector<4x1xi1> to vector<4x1xi1>
    %213 = vector.broadcast %212 : vector<4x1xi1> to vector<4x512xi1>
    %214 = arith.select %213, %210, %211 : vector<4x512xi1>, vector<4x512xf32>
    %215 = arith.addf %209, %214 : vector<4x512xf32>
    %216 = vector.extract_strided_slice %215 {offsets = [0, 0], sizes = [4, 128], strides = [1, 1]} : vector<4x512xf32> to vector<4x128xf32>
    %217 = arith.negf %216 : vector<4x128xf32>
    %218 = math.exp %217 : vector<4x128xf32>
    %cst_34 = arith.constant 1.000000e+00 : f32
    %219 = vector.broadcast %cst_34 : f32 to vector<4x128xf32>
    %220 = arith.addf %219, %218 : vector<4x128xf32>
    %221 = arith.divf %219, %220 : vector<4x128xf32>
    %222 = vector.extract_strided_slice %215 {offsets = [0, 128], sizes = [4, 128], strides = [1, 1]} : vector<4x512xf32> to vector<4x128xf32>
    %223 = arith.negf %222 : vector<4x128xf32>
    %224 = math.exp %223 : vector<4x128xf32>
    %cst_35 = arith.constant 1.000000e+00 : f32
    %225 = vector.broadcast %cst_35 : f32 to vector<4x128xf32>
    %226 = arith.addf %225, %224 : vector<4x128xf32>
    %227 = arith.divf %225, %226 : vector<4x128xf32>
    %228 = vector.extract_strided_slice %215 {offsets = [0, 256], sizes = [4, 128], strides = [1, 1]} : vector<4x512xf32> to vector<4x128xf32>
    %229 = math.tanh %228 : vector<4x128xf32>
    %230 = vector.extract_strided_slice %215 {offsets = [0, 384], sizes = [4, 128], strides = [1, 1]} : vector<4x512xf32> to vector<4x128xf32>
    %231 = arith.negf %230 : vector<4x128xf32>
    %232 = math.exp %231 : vector<4x128xf32>
    %cst_36 = arith.constant 1.000000e+00 : f32
    %233 = vector.broadcast %cst_36 : f32 to vector<4x128xf32>
    %234 = arith.addf %233, %232 : vector<4x128xf32>
    %235 = arith.divf %233, %234 : vector<4x128xf32>
    %236 = arith.mulf %227, %204 : vector<4x128xf32>
    %237 = arith.mulf %221, %229 : vector<4x128xf32>
    %238 = arith.addf %236, %237 : vector<4x128xf32>
    %239 = math.tanh %238 : vector<4x128xf32>
    %240 = arith.mulf %235, %239 : vector<4x128xf32>
    %241 = arith.truncf %240 : vector<4x128xf32> to vector<4x128xbf16>
    %cst_37 = arith.constant dense<0.000000e+00> : vector<4x1024xf32>
    %242 = tpu.matmul %241, %31, %cst_37 {dimension_numbers = #tpu.dot_dimension_numbers<[1], [0], [0], [1], [0, 0, 1, 1], [], []>} : vector<4x128xbf16>, vector<128x1024xbf16>, vector<4x1024xf32> -> vector<4x1024xf32>
    %243 = vector.extract_strided_slice %29 {offsets = [24, 0], sizes = [4, 512], strides = [1, 1]} : vector<32x512xf32> to vector<4x512xf32>
    %244 = vector.extract_strided_slice %242 {offsets = [0, 0], sizes = [4, 512], strides = [1, 1]} : vector<4x1024xf32> to vector<4x512xf32>
    %245 = vector.extract_strided_slice %242 {offsets = [0, 512], sizes = [4, 512], strides = [1, 1]} : vector<4x1024xf32> to vector<4x512xf32>
    %246 = vector.shape_cast %34 : vector<4x1xi1> to vector<4x1xi1>
    %247 = vector.broadcast %246 : vector<4x1xi1> to vector<4x512xi1>
    %248 = arith.select %247, %244, %245 : vector<4x512xi1>, vector<4x512xf32>
    %249 = arith.addf %243, %248 : vector<4x512xf32>
    %250 = vector.extract_strided_slice %249 {offsets = [0, 0], sizes = [4, 128], strides = [1, 1]} : vector<4x512xf32> to vector<4x128xf32>
    %251 = arith.negf %250 : vector<4x128xf32>
    %252 = math.exp %251 : vector<4x128xf32>
    %cst_38 = arith.constant 1.000000e+00 : f32
    %253 = vector.broadcast %cst_38 : f32 to vector<4x128xf32>
    %254 = arith.addf %253, %252 : vector<4x128xf32>
    %255 = arith.divf %253, %254 : vector<4x128xf32>
    %256 = vector.extract_strided_slice %249 {offsets = [0, 128], sizes = [4, 128], strides = [1, 1]} : vector<4x512xf32> to vector<4x128xf32>
    %257 = arith.negf %256 : vector<4x128xf32>
    %258 = math.exp %257 : vector<4x128xf32>
    %cst_39 = arith.constant 1.000000e+00 : f32
    %259 = vector.broadcast %cst_39 : f32 to vector<4x128xf32>
    %260 = arith.addf %259, %258 : vector<4x128xf32>
    %261 = arith.divf %259, %260 : vector<4x128xf32>
    %262 = vector.extract_strided_slice %249 {offsets = [0, 256], sizes = [4, 128], strides = [1, 1]} : vector<4x512xf32> to vector<4x128xf32>
    %263 = math.tanh %262 : vector<4x128xf32>
    %264 = vector.extract_strided_slice %249 {offsets = [0, 384], sizes = [4, 128], strides = [1, 1]} : vector<4x512xf32> to vector<4x128xf32>
    %265 = arith.negf %264 : vector<4x128xf32>
    %266 = math.exp %265 : vector<4x128xf32>
    %cst_40 = arith.constant 1.000000e+00 : f32
    %267 = vector.broadcast %cst_40 : f32 to vector<4x128xf32>
    %268 = arith.addf %267, %266 : vector<4x128xf32>
    %269 = arith.divf %267, %268 : vector<4x128xf32>
    %270 = arith.mulf %261, %238 : vector<4x128xf32>
    %271 = arith.mulf %255, %263 : vector<4x128xf32>
    %272 = arith.addf %270, %271 : vector<4x128xf32>
    %273 = math.tanh %272 : vector<4x128xf32>
    %274 = arith.mulf %269, %273 : vector<4x128xf32>
    %275 = arith.truncf %274 : vector<4x128xf32> to vector<4x128xbf16>
    %cst_41 = arith.constant dense<0.000000e+00> : vector<4x1024xf32>
    %276 = tpu.matmul %275, %31, %cst_41 {dimension_numbers = #tpu.dot_dimension_numbers<[1], [0], [0], [1], [0, 0, 1, 1], [], []>} : vector<4x128xbf16>, vector<128x1024xbf16>, vector<4x1024xf32> -> vector<4x1024xf32>
    %277 = vector.extract_strided_slice %29 {offsets = [28, 0], sizes = [4, 512], strides = [1, 1]} : vector<32x512xf32> to vector<4x512xf32>
    %278 = vector.extract_strided_slice %276 {offsets = [0, 0], sizes = [4, 512], strides = [1, 1]} : vector<4x1024xf32> to vector<4x512xf32>
    %279 = vector.extract_strided_slice %276 {offsets = [0, 512], sizes = [4, 512], strides = [1, 1]} : vector<4x1024xf32> to vector<4x512xf32>
    %280 = vector.shape_cast %34 : vector<4x1xi1> to vector<4x1xi1>
    %281 = vector.broadcast %280 : vector<4x1xi1> to vector<4x512xi1>
    %282 = arith.select %281, %278, %279 : vector<4x512xi1>, vector<4x512xf32>
    %283 = arith.addf %277, %282 : vector<4x512xf32>
    %284 = vector.extract_strided_slice %283 {offsets = [0, 0], sizes = [4, 128], strides = [1, 1]} : vector<4x512xf32> to vector<4x128xf32>
    %285 = arith.negf %284 : vector<4x128xf32>
    %286 = math.exp %285 : vector<4x128xf32>
    %cst_42 = arith.constant 1.000000e+00 : f32
    %287 = vector.broadcast %cst_42 : f32 to vector<4x128xf32>
    %288 = arith.addf %287, %286 : vector<4x128xf32>
    %289 = arith.divf %287, %288 : vector<4x128xf32>
    %290 = vector.extract_strided_slice %283 {offsets = [0, 128], sizes = [4, 128], strides = [1, 1]} : vector<4x512xf32> to vector<4x128xf32>
    %291 = arith.negf %290 : vector<4x128xf32>
    %292 = math.exp %291 : vector<4x128xf32>
    %cst_43 = arith.constant 1.000000e+00 : f32
    %293 = vector.broadcast %cst_43 : f32 to vector<4x128xf32>
    %294 = arith.addf %293, %292 : vector<4x128xf32>
    %295 = arith.divf %293, %294 : vector<4x128xf32>
    %296 = vector.extract_strided_slice %283 {offsets = [0, 256], sizes = [4, 128], strides = [1, 1]} : vector<4x512xf32> to vector<4x128xf32>
    %297 = math.tanh %296 : vector<4x128xf32>
    %298 = vector.extract_strided_slice %283 {offsets = [0, 384], sizes = [4, 128], strides = [1, 1]} : vector<4x512xf32> to vector<4x128xf32>
    %299 = arith.negf %298 : vector<4x128xf32>
    %300 = math.exp %299 : vector<4x128xf32>
    %cst_44 = arith.constant 1.000000e+00 : f32
    %301 = vector.broadcast %cst_44 : f32 to vector<4x128xf32>
    %302 = arith.addf %301, %300 : vector<4x128xf32>
    %303 = arith.divf %301, %302 : vector<4x128xf32>
    %304 = arith.mulf %295, %272 : vector<4x128xf32>
    %305 = arith.mulf %289, %297 : vector<4x128xf32>
    %306 = arith.addf %304, %305 : vector<4x128xf32>
    %307 = math.tanh %306 : vector<4x128xf32>
    %308 = arith.mulf %303, %307 : vector<4x128xf32>
    %309 = vector.extract_strided_slice %308 {offsets = [0, 0], sizes = [2, 128], strides = [1, 1]} : vector<4x128xf32> to vector<2x128xf32>
    %310 = vector.extract_strided_slice %308 {offsets = [2, 0], sizes = [2, 128], strides = [1, 1]} : vector<4x128xf32> to vector<2x128xf32>
    %311 = tpu.concatenate %309, %310 in 1 : vector<2x128xf32>, vector<2x128xf32> -> vector<2x256xf32>
    %c0_45 = arith.constant 0 : index
    %c0_46 = arith.constant 0 : index
    %312 = vector.load %arg5[%c0_45, %c0_46] : memref<256x128xf32, #tpu.memory_space<vmem>>, vector<256x128xf32>
    %cst_47 = arith.constant dense<0.000000e+00> : vector<2x128xf32>
    %313 = tpu.matmul %311, %312, %cst_47 {dimension_numbers = #tpu.dot_dimension_numbers<[1], [0], [0], [1], [0, 0, 1, 1], [], []>} : vector<2x256xf32>, vector<256x128xf32>, vector<2x128xf32> -> vector<2x128xf32>
    %c0_48 = arith.constant 0 : index
    %c0_49 = arith.constant 0 : index
    %314 = vector.load %arg6[%c0_48, %c0_49] : memref<1x128xf32, #tpu.memory_space<vmem>>, vector<1x128xf32>
    %315 = vector.broadcast %314 : vector<1x128xf32> to vector<2x128xf32>
    %316 = arith.addf %313, %315 : vector<2x128xf32>
    %c0_50 = arith.constant 0 : index
    %c0_51 = arith.constant 0 : index
    %c0_52 = arith.constant 0 : index
    %317 = vector.load %arg1[%c0_50, %c0_51, %c0_52] : memref<2x16x128xf32, #tpu.memory_space<vmem>>, vector<2x16x128xf32>
    %318 = vector.shape_cast %317 : vector<2x16x128xf32> to vector<32x128xf32>
    %c0_53 = arith.constant 0 : index
    %c0_54 = arith.constant 0 : index
    %319 = vector.load %arg7[%c0_53, %c0_54] : memref<128x128xf32, #tpu.memory_space<vmem>>, vector<128x128xf32>
    %cst_55 = arith.constant dense<0.000000e+00> : vector<32x128xf32>
    %320 = tpu.matmul %318, %319, %cst_55 {dimension_numbers = #tpu.dot_dimension_numbers<[1], [0], [0], [1], [0, 0, 1, 1], [], []>} : vector<32x128xf32>, vector<128x128xf32>, vector<32x128xf32> -> vector<32x128xf32>
    %321 = vector.shape_cast %320 : vector<32x128xf32> to vector<2x16x128xf32>
    %c0_56 = arith.constant 0 : index
    %c0_57 = arith.constant 0 : index
    %322 = vector.load %arg8[%c0_56, %c0_57] : memref<128x128xf32, #tpu.memory_space<vmem>>, vector<128x128xf32>
    %cst_58 = arith.constant dense<0.000000e+00> : vector<2x128xf32>
    %323 = tpu.matmul %316, %322, %cst_58 {dimension_numbers = #tpu.dot_dimension_numbers<[1], [0], [0], [1], [0, 0, 1, 1], [], []>} : vector<2x128xf32>, vector<128x128xf32>, vector<2x128xf32> -> vector<2x128xf32>
    %324 = vector.shape_cast %323 : vector<2x128xf32> to vector<2x1x128xf32>
    %325 = vector.broadcast %324 : vector<2x1x128xf32> to vector<2x16x128xf32>
    %326 = arith.addf %321, %325 : vector<2x16x128xf32>
    %c0_59 = arith.constant 0 : index
    %c0_60 = arith.constant 0 : index
    %327 = vector.load %arg9[%c0_59, %c0_60] : memref<1x128xf32, #tpu.memory_space<vmem>>, vector<1x128xf32>
    %328 = vector.shape_cast %327 : vector<1x128xf32> to vector<1x1x128xf32>
    %329 = vector.broadcast %328 : vector<1x1x128xf32> to vector<2x16x128xf32>
    %330 = arith.addf %326, %329 : vector<2x16x128xf32>
    %cst_61 = arith.constant 0.000000e+00 : f32
    %331 = vector.broadcast %cst_61 : f32 to vector<2x16x128xf32>
    %332 = arith.maximumf %330, %331 : vector<2x16x128xf32>
    %c0_62 = arith.constant 0 : index
    %c0_63 = arith.constant 0 : index
    %333 = vector.load %arg10[%c0_62, %c0_63] : memref<1x128xf32, #tpu.memory_space<vmem>>, vector<1x128xf32>
    %334 = vector.shape_cast %333 : vector<1x128xf32> to vector<1x1x128xf32>
    %335 = vector.broadcast %334 : vector<1x1x128xf32> to vector<2x16x128xf32>
    %336 = arith.mulf %332, %335 : vector<2x16x128xf32>
    %cst_64 = arith.constant dense<0.000000e+00> : vector<2x16xf32>
    %337 = vector.multi_reduction <add>, %336, %cst_64 [2] : vector<2x16x128xf32> to vector<2x16xf32>
    %cst_65 = arith.constant dense<0xFF800000> : vector<2xf32>
    %338 = vector.multi_reduction <maximumf>, %337, %cst_65 [1] : vector<2x16xf32> to vector<2xf32>
    %339 = vector.shape_cast %338 : vector<2xf32> to vector<2x1xf32>
    %340 = vector.broadcast %339 : vector<2x1xf32> to vector<2x16xf32>
    %341 = arith.subf %337, %340 : vector<2x16xf32>
    %342 = math.exp %341 : vector<2x16xf32>
    %cst_66 = arith.constant dense<0.000000e+00> : vector<2xf32>
    %343 = vector.multi_reduction <add>, %342, %cst_66 [1] : vector<2x16xf32> to vector<2xf32>
    %344 = vector.shape_cast %343 : vector<2xf32> to vector<2x1xf32>
    %345 = tpu.reciprocal %344 {approx = true} : vector<2x1xf32> -> vector<2x1xf32>
    %346 = vector.broadcast %345 : vector<2x1xf32> to vector<2x16xf32>
    %347 = arith.mulf %342, %346 : vector<2x16xf32>
    %348 = vector.shape_cast %347 : vector<2x16xf32> to vector<2x16x1xf32>
    %349 = vector.broadcast %348 : vector<2x16x1xf32> to vector<2x16x128xf32>
    %350 = arith.mulf %349, %317 : vector<2x16x128xf32>
    %cst_67 = arith.constant dense<0.000000e+00> : vector<2x128xf32>
    %351 = vector.multi_reduction <add>, %350, %cst_67 [1] : vector<2x16x128xf32> to vector<2x128xf32>
    %c0_68 = arith.constant 0 : index
    %c0_69 = arith.constant 0 : index
    %352 = vector.load %arg11[%c0_68, %c0_69] : memref<128x128xf32, #tpu.memory_space<vmem>>, vector<128x128xf32>
    %cst_70 = arith.constant dense<0.000000e+00> : vector<2x128xf32>
    %353 = tpu.matmul %316, %352, %cst_70 {dimension_numbers = #tpu.dot_dimension_numbers<[1], [0], [0], [1], [0, 0, 1, 1], [], []>} : vector<2x128xf32>, vector<128x128xf32>, vector<2x128xf32> -> vector<2x128xf32>
    %c0_71 = arith.constant 0 : index
    %c0_72 = arith.constant 0 : index
    %354 = vector.load %arg12[%c0_71, %c0_72] : memref<1x128xf32, #tpu.memory_space<vmem>>, vector<1x128xf32>
    %355 = vector.broadcast %354 : vector<1x128xf32> to vector<2x128xf32>
    %356 = arith.addf %353, %355 : vector<2x128xf32>
    %cst_73 = arith.constant 0.000000e+00 : f32
    %357 = vector.broadcast %cst_73 : f32 to vector<2x128xf32>
    %358 = arith.maximumf %356, %357 : vector<2x128xf32>
    %c0_74 = arith.constant 0 : index
    %c0_75 = arith.constant 0 : index
    %359 = vector.load %arg13[%c0_74, %c0_75] : memref<128x128xf32, #tpu.memory_space<vmem>>, vector<128x128xf32>
    %cst_76 = arith.constant dense<0.000000e+00> : vector<2x128xf32>
    %360 = tpu.matmul %351, %359, %cst_76 {dimension_numbers = #tpu.dot_dimension_numbers<[1], [0], [0], [1], [0, 0, 1, 1], [], []>} : vector<2x128xf32>, vector<128x128xf32>, vector<2x128xf32> -> vector<2x128xf32>
    %c0_77 = arith.constant 0 : index
    %c0_78 = arith.constant 0 : index
    %361 = vector.load %arg14[%c0_77, %c0_78] : memref<1x128xf32, #tpu.memory_space<vmem>>, vector<1x128xf32>
    %362 = vector.broadcast %361 : vector<1x128xf32> to vector<2x128xf32>
    %363 = arith.addf %360, %362 : vector<2x128xf32>
    %cst_79 = arith.constant 0.000000e+00 : f32
    %364 = vector.broadcast %cst_79 : f32 to vector<2x128xf32>
    %365 = arith.maximumf %363, %364 : vector<2x128xf32>
    %366 = arith.mulf %358, %365 : vector<2x128xf32>
    %c0_80 = arith.constant 0 : index
    %c0_81 = arith.constant 0 : index
    %367 = vector.load %arg15[%c0_80, %c0_81] : memref<128x512xf32, #tpu.memory_space<vmem>>, vector<128x512xf32>
    %cst_82 = arith.constant dense<0.000000e+00> : vector<2x512xf32>
    %368 = tpu.matmul %366, %367, %cst_82 {dimension_numbers = #tpu.dot_dimension_numbers<[1], [0], [0], [1], [0, 0, 1, 1], [], []>} : vector<2x128xf32>, vector<128x512xf32>, vector<2x512xf32> -> vector<2x512xf32>
    %c0_83 = arith.constant 0 : index
    %c0_84 = arith.constant 0 : index
    %369 = vector.load %arg16[%c0_83, %c0_84] : memref<1x512xf32, #tpu.memory_space<vmem>>, vector<1x512xf32>
    %370 = vector.broadcast %369 : vector<1x512xf32> to vector<2x512xf32>
    %371 = arith.addf %368, %370 : vector<2x512xf32>
    %cst_85 = arith.constant 0.000000e+00 : f32
    %372 = vector.broadcast %cst_85 : f32 to vector<2x512xf32>
    %373 = arith.maximumf %371, %372 : vector<2x512xf32>
    %374 = vector.extract_strided_slice %373 {offsets = [0, 0], sizes = [2, 256], strides = [1, 1]} : vector<2x512xf32> to vector<2x256xf32>
    %c0_86 = arith.constant 0 : index
    %c0_87 = arith.constant 0 : index
    %375 = vector.load %arg17[%c0_86, %c0_87] : memref<256x128xf32, #tpu.memory_space<vmem>>, vector<256x128xf32>
    %cst_88 = arith.constant dense<0.000000e+00> : vector<2x128xf32>
    %376 = tpu.matmul %374, %375, %cst_88 {dimension_numbers = #tpu.dot_dimension_numbers<[1], [0], [0], [1], [0, 0, 1, 1], [], []>} : vector<2x256xf32>, vector<256x128xf32>, vector<2x128xf32> -> vector<2x128xf32>
    %c0_89 = arith.constant 0 : index
    %c0_90 = arith.constant 0 : index
    %377 = vector.load %arg18[%c0_89, %c0_90] : memref<1x128xf32, #tpu.memory_space<vmem>>, vector<1x128xf32>
    %378 = vector.broadcast %377 : vector<1x128xf32> to vector<2x128xf32>
    %379 = arith.addf %376, %378 : vector<2x128xf32>
    %380 = vector.extract_strided_slice %373 {offsets = [0, 256], sizes = [2, 256], strides = [1, 1]} : vector<2x512xf32> to vector<2x256xf32>
    %c0_91 = arith.constant 0 : index
    %c0_92 = arith.constant 0 : index
    %381 = vector.load %arg19[%c0_91, %c0_92] : memref<256x128xf32, #tpu.memory_space<vmem>>, vector<256x128xf32>
    %cst_93 = arith.constant dense<0.000000e+00> : vector<2x128xf32>
    %382 = tpu.matmul %380, %381, %cst_93 {dimension_numbers = #tpu.dot_dimension_numbers<[1], [0], [0], [1], [0, 0, 1, 1], [], []>} : vector<2x256xf32>, vector<256x128xf32>, vector<2x128xf32> -> vector<2x128xf32>
    %c0_94 = arith.constant 0 : index
    %c0_95 = arith.constant 0 : index
    %383 = vector.load %arg20[%c0_94, %c0_95] : memref<1x128xf32, #tpu.memory_space<vmem>>, vector<1x128xf32>
    %384 = vector.broadcast %383 : vector<1x128xf32> to vector<2x128xf32>
    %385 = arith.addf %382, %384 : vector<2x128xf32>
    %386 = tpu.concatenate %379, %385 in 1 : vector<2x128xf32>, vector<2x128xf32> -> vector<2x256xf32>
    %c0_96 = arith.constant 0 : index
    %c0_97 = arith.constant 0 : index
    %387 = vector.load %arg21[%c0_96, %c0_97] : memref<2x256xf32, #tpu.memory_space<vmem>>, vector<2x256xf32>
    tpu.vector_store %arg21[%c0_96, %c0_97], %386 {strides = array<i32>} : memref<2x256xf32, #tpu.memory_space<vmem>>, vector<2x256xf32>,
    return
  }
}

</mosaic_0001>

<bundles_post_ra>
// kernel: tpu_custom_call.1
= control target key start
LH: loop header
LB: loop body
LE: loop exit
PB: predicated region body
PF: predicated region fallthrough
CT: control target
= control target key end

     0   :  { %s6338_s0 = inlined_call_operand.hbm [shape: f32[32,32], index: 0, kind: input, shape index: {}]   ;;  %s6339_s1 = inlined_call_operand.hbm [shape: f32[2,16,128], index: 1, kind: input, shape index: {}]   ;;  %s6340_s2 = inlined_call_operand.hbm [shape: f32[32,1024], index: 2, kind: input, shape index: {}]   ;;  %s6341_s3 = inlined_call_operand.vmem [shape: f32[1,1024], index: 3, kind: input, shape index: {}]   ;;  %s6342_s4 = inlined_call_operand.hbm [shape: f32[128,1024], index: 4, kind: input, shape index: {}]   ;;  %s6343_s5 = inlined_call_operand.hbm [shape: f32[256,128], index: 5, kind: input, shape index: {}]   ;;  %s6344_s6 = inlined_call_operand.vmem [shape: f32[1,128], index: 6, kind: input, shape index: {}]   ;;  %s6345_s7 = inlined_call_operand.hbm [shape: f32[128,128], index: 7, kind: input, shape index: {}]   ;;  %s6346_s8 = inlined_call_operand.hbm [shape: f32[128,128], index: 8, kind: input, shape index: {}]   ;;  %s6347_s9 = inlined_call_operand.vmem [shape: f32[1,128], index: 9, kind: input, shape index: {}]   ;;  %s6348_s10 = inlined_call_operand.vmem [shape: f32[1,128], index: 10, kind: input, shape index: {}]   ;;  %s6349_s11 = inlined_call_operand.hbm [shape: f32[128,128], index: 11, kind: input, shape index: {}]   ;;  %s6350_s12 = inlined_call_operand.vmem [shape: f32[1,128], index: 12, kind: input, shape index: {}]   ;;  %s6351_s13 = inlined_call_operand.hbm [shape: f32[128,128], index: 13, kind: input, shape index: {}]   ;;  %s6352_s14 = inlined_call_operand.vmem [shape: f32[1,128], index: 14, kind: input, shape index: {}]   ;;  %s6353_s15 = inlined_call_operand.hbm [shape: f32[128,512], index: 15, kind: input, shape index: {}]   ;;  %s6354_s16 = inlined_call_operand.vmem [shape: f32[1,512], index: 16, kind: input, shape index: {}]   ;;  %s6355_s17 = inlined_call_operand.hbm [shape: f32[256,128], index: 17, kind: input, shape index: {}]   ;;  %s6356_s18 = inlined_call_operand.vmem [shape: f32[1,128], index: 18, kind: input, shape index: {}]   ;;  %s6357_s19 = inlined_call_operand.hbm [shape: f32[256,128], index: 19, kind: input, shape index: {}]   ;;  %s6358_s20 = inlined_call_operand.vmem [shape: f32[1,128], index: 20, kind: input, shape index: {}]   ;;  %s6359_s21 = inlined_call_operand.hbm [shape: f32[2,256], index: 21, kind: output, shape index: {}]  }
   0x1   :  { %6464 = sst [smem:[#allocation81_spill]] %s6338_s0 }
   0x2   :  { %6465 = sst [smem:[#allocation82_spill]] %s6339_s1 }
   0x3   :  { %6466 = sst [smem:[#allocation83_spill]] %s6340_s2 }
   0x4   :  { %6467 = sst [smem:[#allocation84_spill]] %s6341_s3 }
   0x5   :  { %6468 = sst [smem:[#allocation85_spill]] %s6342_s4 }
   0x6   :  { %6469 = sst [smem:[#allocation86_spill]] %s6343_s5 }
   0x7   :  { %6470 = sst [smem:[#allocation87_spill]] %s6356_s18 }
   0x8   :  { %6471 = sst [smem:[#allocation88_spill]] %s6358_s20 }
   0x9   :  { %6472 = sst [smem:[#allocation89_spill]] %s6359_s21 }
   0xa   :  { %26 = vsyncpa [#allocation3], 0 }
   0xb   :  { %27 = vsyncpa [#allocation6], 0 }
   0xc   :  { %28 = vsyncpa [#allocation9], 0 }
   0xd   :  { %29 = vsyncpa [#allocation12], 0 }
   0xe   :  { %30 = vsyncpa [#allocation15], 0 }
   0xf   :  { %31 = vsyncpa [#allocation18], 0 }
  0x10   :  { %32 = vsyncpa [#allocation21], 0 }
  0x11   :  { %33 = vsyncpa [#allocation4], 0  ;;  %s4941_s2 = smov [#allocation5]   ;;  %s6473_s3 = sld [smem:[#allocation82_spill]] }
  0x12   :  { %s51_s25 = sshll.u32 %s4941_s2, 4  ;;  %s52_s25 = int_to_ptr.vmem [resolvable:$true] %s51_s25 }
  0x17   :  { %s4639_s28 = scalar_lea.hbm %s6473_s3, 512 }
  0x18   :  { %p4640_p0 = scmp.ne.s32.totalorder %s6473_s3, %s4639_s28  ;;  %p4643_p1 = scmp.lt.u32.totalorder %s4639_s28, %s6473_s3 }
  0x1a   :  { %p4645_p2 = pnand %p4643_p1, %p4640_p0 }
  0x1c   :  { %4648 = shalt.err (!%p4645_p2)
}
  0x1d   :  { %s4649_s5 = scalar_lea.vmem %s52_s25, 512  ;;  %p4654_p4 = scmp.lt.s32.totalorder %s52_s25, %s52_s25 }
  0x1e   :  { %p4650_p3 = scmp.ne.s32.totalorder %s52_s25, %s4649_s5  ;;  %p4655_p5 = scmp.lt.s32.totalorder %s4649_s5, %s4649_s5 }
  0x20   :  { %p4656_p6 = por %p4655_p5, %p4654_p4 }
  0x22   :  { %p4657_p7 = pnand %p4656_p6, %p4650_p3 }
  0x24   :  { %4660 = shalt.err (!%p4657_p7)
}
  0x25   :  { %s4942_s22 = smov 128   ;;  %s4943_s23 = smov 8  }
  0x26   :  { %57 = dma.hbm_to_vmem [thread:$0]  %s6473_s3, 512, %s52_s25, [#allocation6], %s4942_s22, %s4942_s22, %s4943_s23  }
  0x27   :  { %s4944_s2 = smov [#allocation8]   ;;  %s4945_s27 = smov [#allocation11]  }
  0x28   :  { %s77_s26 = sshll.u32 %s4944_s2, 4  ;;  %s103_s28 = sshll.u32 %s4945_s27, 4  ;;  %s78_s26 = int_to_ptr.vmem [resolvable:$true] %s77_s26  ;;  %s104_s28 = int_to_ptr.vmem [resolvable:$true] %s103_s28 }
  0x29   :  { %s6474_s4 = sld [smem:[#allocation85_spill]] }
  0x2f   :  { %s4661_s30 = scalar_lea.hbm %s6474_s4, 16384 }
  0x30   :  { %p4662_p8 = scmp.ne.s32.totalorder %s6474_s4, %s4661_s30  ;;  %p4665_p9 = scmp.lt.u32.totalorder %s4661_s30, %s6474_s4 }
  0x32   :  { %p4667_p10 = pnand %p4665_p9, %p4662_p8 }
  0x34   :  { %4670 = shalt.err (!%p4667_p10)
}
  0x35   :  { %s4671_s25 = scalar_lea.vmem %s78_s26, 16384  ;;  %p4676_p12 = scmp.lt.s32.totalorder %s78_s26, %s78_s26 }
  0x36   :  { %p4672_p11 = scmp.ne.s32.totalorder %s78_s26, %s4671_s25  ;;  %p4677_p13 = scmp.lt.s32.totalorder %s4671_s25, %s4671_s25 }
  0x38   :  { %p4678_p0 = por %p4677_p13, %p4676_p12 }
  0x3a   :  { %p4679_p1 = pnand %p4678_p0, %p4672_p11 }
  0x3c   :  { %4682 = shalt.err (!%p4679_p1)
}
  0x3d   :  { %s6366_s3 = smov 1024   ;;  %s4947_s1 = smov 64  }
  0x3e   :  { %83 = dma.hbm_to_vmem [thread:$0]  %s6474_s4, 16384, %s78_s26, [#allocation9], %s6366_s3, %s6366_s3, %s4947_s1  }
  0x3f   :  { %s4683_s2 = scalar_lea.hbm %s6345_s7, 2048 }
  0x40   :  { %p4684_p2 = scmp.ne.s32.totalorder %s6345_s7, %s4683_s2  ;;  %p4687_p3 = scmp.lt.u32.totalorder %s4683_s2, %s6345_s7 }
  0x42   :  { %p4689_p4 = pnand %p4687_p3, %p4684_p2 }
  0x44   :  { %4692 = shalt.err (!%p4689_p4)
}
  0x45   :  { %s4693_s5 = scalar_lea.vmem %s104_s28, 2048  ;;  %p4698_p6 = scmp.lt.s32.totalorder %s104_s28, %s104_s28 }
  0x46   :  { %p4694_p5 = scmp.ne.s32.totalorder %s104_s28, %s4693_s5  ;;  %p4699_p7 = scmp.lt.s32.totalorder %s4693_s5, %s4693_s5 }
  0x48   :  { %p4700_p8 = por %p4699_p7, %p4698_p6 }
  0x4a   :  { %p4701_p9 = pnand %p4700_p8, %p4694_p5 }
  0x4c   :  { %4704 = shalt.err (!%p4701_p9)
}
  0x4d   :  { %109 = dma.hbm_to_vmem [thread:$0]  %s6345_s7, 2048, %s104_s28, [#allocation12], %s4942_s22, %s4942_s22, %s4943_s23  }
  0x4e   :  { %s4948_s25 = smov [#allocation14]   ;;  %s4949_s24 = smov [#allocation17]  }
  0x4f   :  { %s131_s21 = sshll.u32 %s4948_s25, 4  ;;  %s159_s18 = sshll.u32 %s4949_s24, 4  ;;  %s132_s21 = int_to_ptr.vmem [resolvable:$true] %s131_s21  ;;  %s160_s18 = int_to_ptr.vmem [resolvable:$true] %s159_s18 }
  0x50   :  { %s4705_s27 = scalar_lea.hbm %s6349_s11, 2048 }
  0x51   :  { %p4706_p10 = scmp.ne.s32.totalorder %s6349_s11, %s4705_s27  ;;  %p4709_p11 = scmp.lt.u32.totalorder %s4705_s27, %s6349_s11 }
  0x53   :  { %p4711_p12 = pnand %p4709_p11, %p4706_p10 }
  0x55   :  { %4714 = shalt.err (!%p4711_p12)
}
  0x56   :  { %s4715_s7 = scalar_lea.vmem %s132_s21, 2048  ;;  %p4720_p0 = scmp.lt.s32.totalorder %s132_s21, %s132_s21 }
  0x57   :  { %p4716_p13 = scmp.ne.s32.totalorder %s132_s21, %s4715_s7  ;;  %p4721_p1 = scmp.lt.s32.totalorder %s4715_s7, %s4715_s7 }
  0x59   :  { %p4722_p2 = por %p4721_p1, %p4720_p0 }
  0x5b   :  { %p4723_p3 = pnand %p4722_p2, %p4716_p13 }
  0x5d   :  { %4726 = shalt.err (!%p4723_p3)
}
  0x5e   :  { %137 = dma.hbm_to_vmem [thread:$0]  %s6349_s11, 2048, %s132_s21, [#allocation15], %s4942_s22, %s4942_s22, %s4943_s23  }
  0x5f   :  { %s4727_s24 = scalar_lea.hbm %s6353_s15, 8192 }
  0x60   :  { %p4728_p4 = scmp.ne.s32.totalorder %s6353_s15, %s4727_s24  ;;  %p4731_p5 = scmp.lt.u32.totalorder %s4727_s24, %s6353_s15 }
  0x62   :  { %p4733_p6 = pnand %p4731_p5, %p4728_p4 }
  0x64   :  { %4736 = shalt.err (!%p4733_p6)
}
  0x65   :  { %s4737_s0 = scalar_lea.vmem %s160_s18, 8192  ;;  %p4742_p8 = scmp.lt.s32.totalorder %s160_s18, %s160_s18 }
  0x66   :  { %p4738_p7 = scmp.ne.s32.totalorder %s160_s18, %s4737_s0  ;;  %p4743_p9 = scmp.lt.s32.totalorder %s4737_s0, %s4737_s0 }
  0x68   :  { %p4744_p10 = por %p4743_p9, %p4742_p8 }
  0x6a   :  { %p4745_p11 = pnand %p4744_p10, %p4738_p7 }
  0x6c   :  { %4748 = shalt.err (!%p4745_p11)
}
  0x6d   :  { %s4950_s11 = smov 512   ;;  %s4951_s21 = smov 32  }
  0x6e   :  { %165 = dma.hbm_to_vmem [thread:$0]  %s6353_s15, 8192, %s160_s18, [#allocation18], %s4950_s11, %s4950_s11, %s4951_s21  }
  0x6f   :  { %s4952_s7 = smov [#allocation2]   ;;  %s4953_s26 = smov [#allocation7]  }
  0x70   :  { %s39_s28 = sshll.u32 %s4952_s7, 4  ;;  %s63_s4 = sshll.u32 %s4953_s26, 4  ;;  %s40_s28 = int_to_ptr.vmem [resolvable:$true] %s39_s28  ;;  %s64_s4 = int_to_ptr.vmem [resolvable:$true] %s63_s4 }
  0x71   :  { %s6475_s20 = sld [smem:[#allocation81_spill]] }
  0x77   :  { %s4749_s2 = scalar_lea.hbm %s6475_s20, 512 }
  0x78   :  { %p4750_p12 = scmp.ne.s32.totalorder %s6475_s20, %s4749_s2  ;;  %p4753_p13 = scmp.lt.u32.totalorder %s4749_s2, %s6475_s20 }
  0x7a   :  { %p4755_p0 = pnand %p4753_p13, %p4750_p12 }
  0x7c   :  { %4758 = shalt.err (!%p4755_p0)
}
  0x7d   :  { %s4759_s15 = scalar_lea.vmem %s40_s28, 512  ;;  %p4764_p2 = scmp.lt.s32.totalorder %s40_s28, %s40_s28 }
  0x7e   :  { %p4760_p1 = scmp.ne.s32.totalorder %s40_s28, %s4759_s15  ;;  %p4765_p3 = scmp.lt.s32.totalorder %s4759_s15, %s4759_s15 }
  0x80   :  { %p4766_p4 = por %p4765_p3, %p4764_p2 }
  0x82   :  { %p4767_p5 = pnand %p4766_p4, %p4760_p1 }
  0x84   :  { %4770 = shalt.err (!%p4767_p5)
}
  0x85   :  { %45 = dma.hbm_to_vmem [thread:$0]  %s6475_s20, 512, %s40_s28, [#allocation3], %s4942_s22, %s4942_s22, %s4943_s23  }
  0x86   :  { %s6476_s30 = sld [smem:[#allocation83_spill]] }
  0x8c   :  { %s4771_s5 = scalar_lea.hbm %s6476_s30, 4096 }
  0x8d   :  { %p4772_p6 = scmp.ne.s32.totalorder %s6476_s30, %s4771_s5  ;;  %p4775_p7 = scmp.lt.u32.totalorder %s4771_s5, %s6476_s30 }
  0x8f   :  { %p4777_p8 = pnand %p4775_p7, %p4772_p6 }
  0x91   :  { %4780 = shalt.err (!%p4777_p8)
}
  0x92   :  { %s4781_s2 = scalar_lea.vmem %s64_s4, 4096  ;;  %p4786_p10 = scmp.lt.s32.totalorder %s64_s4, %s64_s4 }
  0x93   :  { %p4782_p9 = scmp.ne.s32.totalorder %s64_s4, %s4781_s2  ;;  %p4787_p11 = scmp.lt.s32.totalorder %s4781_s2, %s4781_s2 }
  0x95   :  { %p4788_p12 = por %p4787_p11, %p4786_p10 }
  0x97   :  { %p4789_p13 = pnand %p4788_p12, %p4782_p9 }
  0x99   :  { %4792 = shalt.err (!%p4789_p13)
}
  0x9a   :  { %s6477_s28 = smov 1024   ;;  %s4954_s29 = smov [#allocation10]  }
  0x9b   :  { %69 = dma.hbm_to_vmem [thread:$0]  %s6476_s30, 4096, %s64_s4, [#allocation6], %s6477_s28, %s6477_s28, %s4947_s1  }
  0x9c   :  { %s89_s0 = sshll.u32 %s4954_s29, 4  ;;  %s4955_s15 = smov [#allocation13]   ;;  %s90_s0 = int_to_ptr.vmem [resolvable:$true] %s89_s0 }
  0x9d   :  { %s115_s18 = sshll.u32 %s4955_s15, 4  ;;  %s6478_s3 = sld [smem:[#allocation86_spill]]  ;;  %s116_s18 = int_to_ptr.vmem [resolvable:$true] %s115_s18 }
  0xa3   :  { %s4793_s5 = scalar_lea.hbm %s6478_s3, 4096 }
  0xa4   :  { %p4794_p0 = scmp.ne.s32.totalorder %s6478_s3, %s4793_s5  ;;  %p4797_p1 = scmp.lt.u32.totalorder %s4793_s5, %s6478_s3 }
  0xa6   :  { %p4799_p2 = pnand %p4797_p1, %p4794_p0 }
  0xa8   :  { %4802 = shalt.err (!%p4799_p2)
}
  0xa9   :  { %s4803_s1 = scalar_lea.vmem %s90_s0, 4096  ;;  %p4808_p4 = scmp.lt.s32.totalorder %s90_s0, %s90_s0 }
  0xaa   :  { %p4804_p3 = scmp.ne.s32.totalorder %s90_s0, %s4803_s1  ;;  %p4809_p5 = scmp.lt.s32.totalorder %s4803_s1, %s4803_s1 }
  0xac   :  { %p4810_p6 = por %p4809_p5, %p4808_p4 }
  0xae   :  { %p4811_p7 = pnand %p4810_p6, %p4804_p3 }
  0xb0   :  { %4814 = shalt.err (!%p4811_p7)
}
  0xb1   :  { %95 = dma.hbm_to_vmem [thread:$0]  %s6478_s3, 4096, %s90_s0, [#allocation9], %s4942_s22, %s4942_s22, %s4943_s23  }
  0xb2   :  { %s4815_s20 = scalar_lea.hbm %s6346_s8, 2048 }
  0xb3   :  { %p4816_p8 = scmp.ne.s32.totalorder %s6346_s8, %s4815_s20  ;;  %p4819_p9 = scmp.lt.u32.totalorder %s4815_s20, %s6346_s8 }
  0xb5   :  { %p4821_p10 = pnand %p4819_p9, %p4816_p8 }
  0xb7   :  { %4824 = shalt.err (!%p4821_p10)
}
  0xb8   :  { %s4825_s21 = scalar_lea.vmem %s116_s18, 2048  ;;  %p4830_p12 = scmp.lt.s32.totalorder %s116_s18, %s116_s18 }
  0xb9   :  { %p4826_p11 = scmp.ne.s32.totalorder %s116_s18, %s4825_s21  ;;  %p4831_p13 = scmp.lt.s32.totalorder %s4825_s21, %s4825_s21 }
  0xbb   :  { %p4832_p0 = por %p4831_p13, %p4830_p12 }
  0xbd   :  { %p4833_p1 = pnand %p4832_p0, %p4826_p11 }
  0xbf   :  { %4836 = shalt.err (!%p4833_p1)
}
  0xc0   :  { %121 = dma.hbm_to_vmem [thread:$0]  %s6346_s8, 2048, %s116_s18, [#allocation12], %s4942_s22, %s4942_s22, %s4943_s23  }
  0xc1   :  { %s4956_s5 = smov [#allocation16]   ;;  %s4957_s26 = smov [#allocation19]  }
  0xc2   :  { %s145_s7 = sshll.u32 %s4956_s5, 4  ;;  %s173_s25 = sshll.u32 %s4957_s26, 4  ;;  %s146_s7 = int_to_ptr.vmem [resolvable:$true] %s145_s7  ;;  %s174_s25 = int_to_ptr.vmem [resolvable:$true] %s173_s25 }
  0xc3   :  { %s4837_s4 = scalar_lea.hbm %s6351_s13, 2048 }
  0xc4   :  { %p4838_p2 = scmp.ne.s32.totalorder %s6351_s13, %s4837_s4  ;;  %p4841_p3 = scmp.lt.u32.totalorder %s4837_s4, %s6351_s13 }
  0xc6   :  { %p4843_p4 = pnand %p4841_p3, %p4838_p2 }
  0xc8   :  { %4846 = shalt.err (!%p4843_p4)
}
  0xc9   :  { %s4847_s8 = scalar_lea.vmem %s146_s7, 2048  ;;  %p4852_p6 = scmp.lt.s32.totalorder %s146_s7, %s146_s7 }
  0xca   :  { %p4848_p5 = scmp.ne.s32.totalorder %s146_s7, %s4847_s8  ;;  %p4853_p7 = scmp.lt.s32.totalorder %s4847_s8, %s4847_s8 }
  0xcc   :  { %p4854_p8 = por %p4853_p7, %p4852_p6 }
  0xce   :  { %p4855_p9 = pnand %p4854_p8, %p4848_p5 }
  0xd0   :  { %4858 = shalt.err (!%p4855_p9)
}
  0xd1   :  { %151 = dma.hbm_to_vmem [thread:$0]  %s6351_s13, 2048, %s146_s7, [#allocation15], %s4942_s22, %s4942_s22, %s4943_s23  }
  0xd2   :  { %s4859_s11 = scalar_lea.hbm %s6355_s17, 4096 }
  0xd3   :  { %p4860_p10 = scmp.ne.s32.totalorder %s6355_s17, %s4859_s11  ;;  %p4863_p11 = scmp.lt.u32.totalorder %s4859_s11, %s6355_s17 }
  0xd5   :  { %p4865_p12 = pnand %p4863_p11, %p4860_p10 }
  0xd7   :  { %4868 = shalt.err (!%p4865_p12)
}
  0xd8   :  { %s4869_s26 = scalar_lea.vmem %s174_s25, 4096  ;;  %p4874_p0 = scmp.lt.s32.totalorder %s174_s25, %s174_s25 }
  0xd9   :  { %p4870_p13 = scmp.ne.s32.totalorder %s174_s25, %s4869_s26  ;;  %p4875_p1 = scmp.lt.s32.totalorder %s4869_s26, %s4869_s26 }
  0xdb   :  { %p4876_p2 = por %p4875_p1, %p4874_p0 }
  0xdd   :  { %p4877_p3 = pnand %p4876_p2, %p4870_p13 }
  0xdf   :  { %4880 = shalt.err (!%p4877_p3)
}
  0xe0   :  { %179 = dma.hbm_to_vmem [thread:$0]  %s6355_s17, 4096, %s174_s25, [#allocation18], %s4942_s22, %s4942_s22, %s4943_s23  }
  0xe1   :  { %s4958_s24 = smov [#allocation20]   ;;  %s4881_s2 = scalar_lea.hbm %s6357_s19, 4096 }
  0xe2   :  { %s187_s1 = sshll.u32 %s4958_s24, 4  ;;  %p4882_p4 = scmp.ne.s32.totalorder %s6357_s19, %s4881_s2  ;;  %s188_s1 = int_to_ptr.vmem [resolvable:$true] %s187_s1 }
  0xe3   :  { %p4885_p5 = scmp.lt.u32.totalorder %s4881_s2, %s6357_s19 }
  0xe5   :  { %p4887_p6 = pnand %p4885_p5, %p4882_p4 }
  0xe7   :  { %4890 = shalt.err (!%p4887_p6)
}
  0xe8   :  { %s4891_s27 = scalar_lea.vmem %s188_s1, 4096  ;;  %p4896_p8 = scmp.lt.s32.totalorder %s188_s1, %s188_s1 }
  0xe9   :  { %p4892_p7 = scmp.ne.s32.totalorder %s188_s1, %s4891_s27  ;;  %p4897_p9 = scmp.lt.s32.totalorder %s4891_s27, %s4891_s27 }
  0xeb   :  { %p4898_p10 = por %p4897_p9, %p4896_p8 }
  0xed   :  { %p4899_p11 = pnand %p4898_p10, %p4892_p7 }
  0xef   :  { %4902 = shalt.err (!%p4899_p11)
}
  0xf0   :  { %193 = dma.hbm_to_vmem [thread:$0]  %s6357_s19, 4096, %s188_s1, [#allocation21], %s4942_s22, %s4942_s22, %s4943_s23  }
  0xf1   :  { %4925 = dma.done.wait [#allocation3], 512  }
  0xf2   :  { %4926 = vsyncadd [#allocation3], 4294966784 }
  0xf3   :  { %4927 = dma.done.wait [#allocation6], 4608  }
  0xf4   :  { %4928 = vsyncadd [#allocation6], 4294962688 }
  0xf5   :  { %4929 = dma.done.wait [#allocation9], 20480  }
  0xf6   :  { %4930 = vsyncadd [#allocation9], 4294946816 }
  0xf7   :  { %4931 = dma.done.wait [#allocation12], 4096  }
  0xf8   :  { %4932 = vsyncadd [#allocation12], 4294963200 }
  0xf9   :  { %4933 = dma.done.wait [#allocation15], 4096  }
  0xfa   :  { %4934 = vsyncadd [#allocation15], 4294963200 }
  0xfb   :  { %4935 = dma.done.wait [#allocation18], 12288  }
  0xfc   :  { %4936 = vsyncadd [#allocation18], 4294955008 }
  0xfd   :  { %4937 = dma.done.wait [#allocation21], 4096  }
  0xfe   :  { %4938 = vsyncadd [#allocation21], 4294963200  ;;  %v6367_v0 = vmov 0.0   ;;  %v6369_v1 = vmov 0   ;;  %v238_v2 = vld [vmem:[#allocation7 + $0x8] sm:$0xff]  ;;  %v237_v7 = vld [vmem:[#allocation7] sm:$0xff] }
  0xff   :  { %388 = vmatprep.mubr.f32.mxu1 %v6367_v0  ;;  %566 = vmatprep.mubr.f32.mxu0 %v6367_v0  ;;  %v246_v3 = vld [vmem:[#allocation7 + $0x48] sm:$0xff]  ;;  %v245_v8 = vld [vmem:[#allocation7 + $0x40] sm:$0xff]  ;;  %v240_v25 = vld [vmem:[#allocation7 + $0x18] sm:$0xff]  ;;  %vm311_vm0 = vcmask 261120   ;;  %s6517_s23 = sld [smem:[#allocation84_spill]]  ;;  %vm4962_vm6 = vmmov 0  }
 0x100   :  { %4500 = vset.pattern.permute.xlu0 %v6369_v1  ;;  %4499 = vset.pattern.permute.xlu1 %v6369_v1  ;;  %v242_v4 = vld [vmem:[#allocation7 + $0x28] sm:$0xff]  ;;  %v4179_v5 = vpack.c.bf16 %v246_v3, %v238_v2  ;;  %v4181_v10 = vpack.c.bf16 %v245_v8, %v237_v7  ;;  %v241_v11 = vld [vmem:[#allocation7 + $0x20] sm:$0xff]  ;;  %v248_v27 = vld [vmem:[#allocation7 + $0x58] sm:$0xff]  ;;  %vm3001_vm7 = vcmask 130112   ;;  %vm3012_vm8 = vcmask 1041409   ;;  %s6723_s13 = sld [smem:[#allocation87_spill]] }
 0x101   :  { %v250_v6 = vld [vmem:[#allocation7 + $0x68] sm:$0xff]  ;;  %v249_v12 = vld [vmem:[#allocation7 + $0x60] sm:$0xff]  ;;  %v4187_v30 = vpack.c.bf16 %v248_v27, %v240_v25  ;;  %v239_v32 = vld [vmem:[#allocation7 + $0x10] sm:$0xff]  ;;  %vm3015_vm9 = vcmask 123904   ;;  %s6724_s1 = sld [smem:[#allocation88_spill]]  ;;  %s4964_s4 = smov [#allocation22]  }
 0x102   :  { %v4195_v9 = vpack.c.bf16 %v250_v6, %v242_v4  ;;  %v254_v13 = vld [vmem:[#allocation7 + $0x88] sm:$0xff]  ;;  %4180 = vmatprep.subr.bf16.mxu1 %v4179_v5  ;;  %v4197_v14 = vpack.c.bf16 %v249_v12, %v241_v11  ;;  %v253_v20 = vld [vmem:[#allocation7 + $0x80] sm:$0xff]  ;;  %v247_v33 = vld [vmem:[#allocation7 + $0x50] sm:$0xff]  ;;  %s3796_s30 = sshll.u32 %s4964_s4, 4  ;;  %s3797_s30 = int_to_ptr.vmem [resolvable:$true] %s3796_s30 }
 0x103   :  { %v262_v15 = vld [vmem:[#allocation7 + $0xc8] sm:$0xff]  ;;  %4182 = vmatpush1.bf16.msra.mxu1 %v4181_v10  ;;  %v261_v21 = vld [vmem:[#allocation7 + $0xc0] sm:$0xff]  ;;  %v4189_v36 = vpack.c.bf16 %v247_v33, %v239_v32  ;;  %v256_v44 = vld [vmem:[#allocation7 + $0x98] sm:$0xff]  ;;  %s4903_s2 = scalar_lea.vmem %s3797_s30, 64  ;;  %p4908_p13 = scmp.lt.s32.totalorder %s3797_s30, %s3797_s30 }
 0x104   :  { %v258_v16 = vld [vmem:[#allocation7 + $0xa8] sm:$0xff]  ;;  %4196 = vmatprep.subr.bf16.mxu0 %v4195_v9  ;;  %v4183_v18 = vpack.c.bf16 %v262_v15, %v254_v13  ;;  %v257_v22 = vld [vmem:[#allocation7 + $0xa0] sm:$0xff]  ;;  %v4185_v23 = vpack.c.bf16 %v261_v21, %v253_v20  ;;  %v264_v45 = vld [vmem:[#allocation7 + $0xd8] sm:$0xff]  ;;  %p4904_p12 = scmp.ne.s32.totalorder %s3797_s30, %s4903_s2  ;;  %p4909_p0 = scmp.lt.s32.totalorder %s4903_s2, %s4903_s2 }
 0x105   :  { %v266_v17 = vld [vmem:[#allocation7 + $0xe8] sm:$0xff]  ;;  %4198 = vmatpush1.bf16.msra.mxu0 %v4197_v14  ;;  %v265_v24 = vld [vmem:[#allocation7 + $0xe0] sm:$0xff]  ;;  %v4191_v46 = vpack.c.bf16 %v264_v45, %v256_v44  ;;  %v255_v49 = vld [vmem:[#allocation7 + $0x90] sm:$0xff] }
 0x106   :  { %v4199_v19 = vpack.c.bf16 %v266_v17, %v258_v16  ;;  %4184 = vmatprep.subr.bf16.mxu1 %v4183_v18  ;;  %v4201_v26 = vpack.c.bf16 %v265_v24, %v257_v22  ;;  %v762_v28 = vld [vmem:[#allocation8 + $0x8] sm:$0xff]  ;;  %v761_v34 = vld [vmem:[#allocation8] sm:$0xff]  ;;  %v263_v51 = vld [vmem:[#allocation7 + $0xd0] sm:$0xff]  ;;  %p4910_p1 = por %p4909_p0, %p4908_p13 }
 0x107   :  { %v770_v29 = vld [vmem:[#allocation8 + $0x48] sm:$0xff]  ;;  %4186 = vmatpush1.bf16.msra.mxu1 %v4185_v23  ;;  %v5258_v35 = vld [vmem:[#allocation2] sm:$0xff]  ;;  %v4193_v54 = vpack.c.bf16 %v263_v51, %v255_v49  ;;  %v244_v57 = vld [vmem:[#allocation7 + $0x38] sm:$0xff] }
 0x108   :  { %4200 = vmatprep.subr.bf16.mxu0 %v4199_v19  ;;  %v5256_v31 = vpack.c.bf16 %v770_v29, %v762_v28  ;;  %v769_v37 = vld [vmem:[#allocation8 + $0x40] sm:$0xff]  ;;  %v778_v38 = vld [vmem:[#allocation8 + $0x88] sm:$0xff]  ;;  %4188 = vmatprep.subr.bf16.mxu1 %v4187_v30  ;;  %v252_v60 = vld [vmem:[#allocation7 + $0x78] sm:$0xff]  ;;  %p4911_p2 = pnand %p4910_p1, %p4904_p12 }
 0x109   :  { %4202 = vmatpush1.bf16.msra.mxu0 %v4201_v26  ;;  %v5260_v39 = vpack.c.bf16 %v769_v37, %v761_v34  ;;  %v786_v40 = vld [vmem:[#allocation8 + $0xc8] sm:$0xff]  ;;  %v777_v41 = vld [vmem:[#allocation8 + $0x80] sm:$0xff]  ;;  %v5284_v61 = vld [vmem:[#allocation2 + $0x10] sm:$0xff]  ;;  %v4203_v62 = vpack.c.bf16 %v252_v60, %v244_v57 }
 0x10a   :  { %6479 = vst [vmem:[#allocation31_spill] sm:$0xff] %v5256_v31  ;;  %954 = vmatprep.subr.bf16.mxu0 %v5256_v31  ;;  %v5263_v42 = vpack.c.bf16 %v786_v40, %v778_v38  ;;  %v785_v43 = vld [vmem:[#allocation8 + $0xc0] sm:$0xff]  ;;  %3811 = vmatmul.mubr.msk.f32.vlgmr.msra.gmra.mrb[0].mxu1 %vm311_vm0, %v5258_v35  ;;  %v794_v47 = vld [vmem:[#allocation8 + $0x108] sm:$0xff]  ;;  %v5298_v7 = vld [vmem:[#allocation2 + $0x18] sm:$0xff] }
 0x10b   :  { %6480 = vst [vmem:[#allocation32_spill] sm:$0xff] %v5260_v39  ;;  %v802_v48 = vld [vmem:[#allocation8 + $0x148] sm:$0xff]  ;;  %4190 = vmatpush1.bf16.msra.mxu1 %v4189_v36  ;;  %394 = vmatprep.mubr.f32.mxu1 %v6367_v0  ;;  %v5273_v52 = vpack.c.bf16 %v785_v43, %v777_v41  ;;  %v793_v55 = vld [vmem:[#allocation8 + $0x100] sm:$0xff]  ;;  %v243_v9 = vld [vmem:[#allocation7 + $0x30] sm:$0xff] }
 0x10c   :  { %6481 = vst [vmem:[#allocation33_spill] sm:$0xff] %v5263_v42  ;;  %3819 = vmatmul.mubr.msk.f32.vlgmr.msra.gmra.mrb[0].mxu0 %vm311_vm0, %v5258_v35  ;;  %v5269_v50 = vld [vmem:[#allocation2 + $0x8] sm:$0xff]  ;;  %v5277_v53 = vpack.c.bf16 %v802_v48, %v794_v47  ;;  %v801_v56 = vld [vmem:[#allocation8 + $0x140] sm:$0xff]  ;;  %4192 = vmatprep.subr.bf16.mxu1 %v4191_v46  ;;  %v251_v10 = vld [vmem:[#allocation7 + $0x70] sm:$0xff] }
 0x10d   :  { %955 = vmatpush1.bf16.msra.mxu0 %v5260_v39  ;;  %6482 = vst [vmem:[#allocation34_spill] sm:$0xff] %v5273_v52  ;;  %572 = vmatprep.mubr.f32.mxu0 %v6367_v0  ;;  %v810_v58 = vld [vmem:[#allocation8 + $0x188] sm:$0xff]  ;;  %v5288_v63 = vpack.c.bf16 %v801_v56, %v793_v55  ;;  %v809_v3 = vld [vmem:[#allocation8 + $0x180] sm:$0xff]  ;;  %v260_v14 = vld [vmem:[#allocation7 + $0xb8] sm:$0xff]  ;;  %v4205_v18 = vpack.c.bf16 %v251_v10, %v243_v9 }
 0x10e   :  { %956 = vmatprep.subr.bf16.mxu0 %v5263_v42  ;;  %6483 = vst [vmem:[#allocation35_spill] sm:$0xff] %v5277_v53  ;;  %3812 = vmatmul.mubr.msk.f32.gmra.mrb[2].mxu1 %vm311_vm0, %v5269_v50  ;;  %v818_v59 = vld [vmem:[#allocation8 + $0x1c8] sm:$0xff]  ;;  %v817_v4 = vld [vmem:[#allocation8 + $0x1c0] sm:$0xff]  ;;  %v268_v15 = vld [vmem:[#allocation7 + $0xf8] sm:$0xff] }
 0x10f   :  { %400 = vmatprep.mubr.f32.mxu1 %v6367_v0  ;;  %6484 = vst [vmem:[#allocation36_spill] sm:$0xff] %v5288_v63  ;;  %4194 = vmatpush1.bf16.msra.mxu1 %v4193_v54  ;;  %v5291_v2 = vpack.c.bf16 %v818_v59, %v810_v58  ;;  %v826_v5 = vld [vmem:[#allocation8 + $0x208] sm:$0xff]  ;;  %v5302_v8 = vpack.c.bf16 %v817_v4, %v809_v3  ;;  %v825_v11 = vld [vmem:[#allocation8 + $0x200] sm:$0xff]  ;;  %v259_v22 = vld [vmem:[#allocation7 + $0xb0] sm:$0xff] }
 0x110   :  { %3820 = vmatmul.mubr.msk.f32.gmra.mrb[2].mxu0 %vm311_vm0, %v5269_v50  ;;  %4204 = vmatprep.subr.bf16.mxu1 %v4203_v62  ;;  %v834_v6 = vld [vmem:[#allocation8 + $0x248] sm:$0xff]  ;;  %v833_v13 = vld [vmem:[#allocation8 + $0x240] sm:$0xff]  ;;  %v4207_v21 = vpack.c.bf16 %v268_v15, %v260_v14  ;;  %v267_v23 = vld [vmem:[#allocation7 + $0xf0] sm:$0xff] }
 0x111   :  { %957 = vmatpush1.bf16.msra.mxu0 %v5273_v52  ;;  %578 = vmatprep.mubr.f32.mxu0 %v6367_v0  ;;  %6485 = vst [vmem:[#allocation37_spill] sm:$0xff] %v5291_v2  ;;  %6486 = vst [vmem:[#allocation38_spill] sm:$0xff] %v5302_v8  ;;  %v5305_v12 = vpack.c.bf16 %v834_v6, %v826_v5  ;;  %v842_v16 = vld [vmem:[#allocation8 + $0x288] sm:$0xff]  ;;  %v5313_v19 = vpack.c.bf16 %v833_v13, %v825_v11  ;;  %v841_v20 = vld [vmem:[#allocation8 + $0x280] sm:$0xff] }
 0x112   :  { %958 = vmatprep.subr.bf16.mxu0 %v5277_v53  ;;  %3813 = vmatmul.mubr.msk.f32.gmra.mrb[4].mxu1 %vm311_vm0, %v5284_v61  ;;  %v850_v17 = vld [vmem:[#allocation8 + $0x2c8] sm:$0xff]  ;;  %v849_v25 = vld [vmem:[#allocation8 + $0x2c0] sm:$0xff]  ;;  %v764_v26 = vld [vmem:[#allocation8 + $0x18] sm:$0xff]  ;;  %v4209_v30 = vpack.c.bf16 %v267_v23, %v259_v22 }
 0x113   :  { %406 = vmatprep.mubr.f32.mxu1 %v6367_v0  ;;  %6487 = vst [vmem:[#allocation39_spill] sm:$0xff] %v5305_v12  ;;  %6488 = vst [vmem:[#allocation40_spill] sm:$0xff] %v5313_v19  ;;  %v5317_v24 = vpack.c.bf16 %v850_v17, %v842_v16  ;;  %v772_v27 = vld [vmem:[#allocation8 + $0x58] sm:$0xff]  ;;  %v858_v28 = vld [vmem:[#allocation8 + $0x308] sm:$0xff]  ;;  %v5323_v32 = vpack.c.bf16 %v849_v25, %v841_v20 }
 0x114   :  { %3821 = vmatmul.mubr.msk.f32.gmra.mrb[4].mxu0 %vm311_vm0, %v5284_v61  ;;  %v866_v29 = vld [vmem:[#allocation8 + $0x348] sm:$0xff]  ;;  %v5325_v33 = vpack.c.bf16 %v772_v27, %v764_v26  ;;  %v857_v36 = vld [vmem:[#allocation8 + $0x300] sm:$0xff]  ;;  %v763_v49 = vld [vmem:[#allocation8 + $0x10] sm:$0xff] }
 0x115   :  { %959 = vmatpush1.bf16.msra.mxu0 %v5288_v63  ;;  %584 = vmatprep.mubr.f32.mxu0 %v6367_v0  ;;  %6489 = vst [vmem:[#allocation41_spill] sm:$0xff] %v5317_v24  ;;  %6490 = vst [vmem:[#allocation42_spill] sm:$0xff] %v5323_v32  ;;  %v5328_v34 = vpack.c.bf16 %v866_v29, %v858_v28  ;;  %v865_v37 = vld [vmem:[#allocation8 + $0x340] sm:$0xff]  ;;  %v874_v38 = vld [vmem:[#allocation8 + $0x388] sm:$0xff] }
 0x116   :  { %960 = vmatprep.subr.bf16.mxu0 %v5291_v2  ;;  %3814 = vmatmul.mubr.msk.f32.gmra.mrb[6].mxu1 %vm311_vm0, %v5298_v7  ;;  %6491 = vst [vmem:[#allocation43_spill] sm:$0xff] %v5325_v33  ;;  %v882_v40 = vld [vmem:[#allocation8 + $0x3c8] sm:$0xff]  ;;  %v5334_v41 = vpack.c.bf16 %v865_v37, %v857_v36  ;;  %v873_v44 = vld [vmem:[#allocation8 + $0x380] sm:$0xff]  ;;  %v771_v51 = vld [vmem:[#allocation8 + $0x50] sm:$0xff] }
 0x117   :  { %477 = vmatprep.mubr.f32.mxu1 %v6367_v0  ;;  %6492 = vst [vmem:[#allocation44_spill] sm:$0xff] %v5328_v34  ;;  %v5338_v43 = vpack.c.bf16 %v882_v40, %v874_v38  ;;  %v881_v45 = vld [vmem:[#allocation8 + $0x3c0] sm:$0xff]  ;;  %v766_v46 = vld [vmem:[#allocation8 + $0x28] sm:$0xff]  ;;  %v780_v57 = vld [vmem:[#allocation8 + $0x98] sm:$0xff]  ;;  %v5352_v62 = vpack.c.bf16 %v771_v51, %v763_v49 }
 0x118   :  { %3822 = vmatmul.mubr.msk.f32.gmra.mrb[6].mxu0 %vm311_vm0, %v5298_v7  ;;  %6493 = vst [vmem:[#allocation45_spill] sm:$0xff] %v5334_v41  ;;  %v774_v47 = vld [vmem:[#allocation8 + $0x68] sm:$0xff]  ;;  %v5344_v48 = vpack.c.bf16 %v881_v45, %v873_v44  ;;  %v765_v55 = vld [vmem:[#allocation8 + $0x20] sm:$0xff]  ;;  %v788_v58 = vld [vmem:[#allocation8 + $0xd8] sm:$0xff] }
 0x119   :  { %961 = vmatpush1.bf16.msra.mxu0 %v5302_v8  ;;  %986 = vmatprep.mubr.bf16.mxu0 %v6369_v1  ;;  %6494 = vst [vmem:[#allocation46_spill] sm:$0xff] %v5338_v43  ;;  %v5347_v54 = vpack.c.bf16 %v774_v47, %v766_v46  ;;  %v773_v56 = vld [vmem:[#allocation8 + $0x60] sm:$0xff]  ;;  %v782_v59 = vld [vmem:[#allocation8 + $0xa8] sm:$0xff]  ;;  %6497 = vst [vmem:[#allocation49_spill] sm:$0xff] %v5352_v62  ;;  %v5358_v9 = vpack.c.bf16 %v788_v58, %v780_v57 }
 0x11a   :  { %962 = vmatprep.subr.bf16.mxu0 %v5305_v12  ;;  %3815 = vmatmul.mubr.msk.f32.vlgmr.msra.gmra.mrb[8].mxu1 %vm311_vm0, %v5258_v35  ;;  %6495 = vst [vmem:[#allocation47_spill] sm:$0xff] %v5344_v48  ;;  %v790_v60 = vld [vmem:[#allocation8 + $0xe8] sm:$0xff]  ;;  %v5355_v3 = vpack.c.bf16 %v773_v56, %v765_v55  ;;  %v779_v4 = vld [vmem:[#allocation8 + $0x90] sm:$0xff]  ;;  %v781_v6 = vld [vmem:[#allocation8 + $0xa0] sm:$0xff] }
 0x11b   :  { %4206 = vmatpush1.bf16.msra.mxu1 %v4205_v18  ;;  %483 = vmatprep.mubr.f32.mxu1 %v6367_v0  ;;  %6496 = vst [vmem:[#allocation48_spill] sm:$0xff] %v5347_v54  ;;  %v787_v5 = vld [vmem:[#allocation8 + $0xd0] sm:$0xff]  ;;  %6498 = vst [vmem:[#allocation50_spill] sm:$0xff] %v5358_v9  ;;  %v5360_v10 = vpack.c.bf16 %v790_v60, %v782_v59  ;;  %v789_v11 = vld [vmem:[#allocation8 + $0xe0] sm:$0xff] }
 0x11c   :  { %4208 = vmatprep.subr.bf16.mxu1 %v4207_v21  ;;  %v796_v13 = vld [vmem:[#allocation8 + $0x118] sm:$0xff]  ;;  %v798_v15 = vld [vmem:[#allocation8 + $0x128] sm:$0xff]  ;;  %v5366_v17 = vpack.c.bf16 %v787_v5, %v779_v4  ;;  %v5370_v18 = vpack.c.bf16 %v789_v11, %v781_v6  ;;  %v795_v21 = vld [vmem:[#allocation8 + $0x110] sm:$0xff] }
 0x11d   :  { %963 = vmatpush1.bf16.msra.mxu0 %v5313_v19  ;;  %v804_v14 = vld [vmem:[#allocation8 + $0x158] sm:$0xff]  ;;  %v806_v16 = vld [vmem:[#allocation8 + $0x168] sm:$0xff]  ;;  %v803_v22 = vld [vmem:[#allocation8 + $0x150] sm:$0xff] }
 0x11e   :  { %964 = vmatprep.subr.bf16.mxu0 %v5317_v24  ;;  %3816 = vmatmul.mubr.msk.f32.gmra.mrb[10].mxu1 %vm311_vm0, %v5269_v50  ;;  %6499 = vst [vmem:[#allocation51_spill] sm:$0xff] %v5366_v17  ;;  %v5372_v20 = vpack.c.bf16 %v804_v14, %v796_v13  ;;  %v797_v23 = vld [vmem:[#allocation8 + $0x120] sm:$0xff]  ;;  %v812_v26 = vld [vmem:[#allocation8 + $0x198] sm:$0xff]  ;;  %v814_v28 = vld [vmem:[#allocation8 + $0x1a8] sm:$0xff] }
 0x11f   :  { %489 = vmatprep.mubr.f32.mxu1 %v6367_v0  ;;  %4210 = vmatpush1.bf16.msra.mxu1 %v4209_v30  ;;  %v805_v25 = vld [vmem:[#allocation8 + $0x160] sm:$0xff]  ;;  %v820_v27 = vld [vmem:[#allocation8 + $0x1d8] sm:$0xff]  ;;  %v822_v29 = vld [vmem:[#allocation8 + $0x1e8] sm:$0xff]  ;;  %v5383_v30 = vpack.c.bf16 %v803_v22, %v795_v21 }
 0x120   :  { %995 = vmatprep.subr.bf16.mxu1 %v5325_v33  ;;  %6500 = vst [vmem:[#allocation52_spill] sm:$0xff] %v5372_v20  ;;  %v5387_v36 = vpack.c.bf16 %v805_v25, %v797_v23  ;;  %v5389_v37 = vpack.c.bf16 %v820_v27, %v812_v26  ;;  %v811_v38 = vld [vmem:[#allocation8 + $0x190] sm:$0xff]  ;;  %v813_v40 = vld [vmem:[#allocation8 + $0x1a0] sm:$0xff]  ;;  %v5392_v44 = vpack.c.bf16 %v822_v29, %v814_v28  ;;  %v828_v46 = vld [vmem:[#allocation8 + $0x218] sm:$0xff] }
 0x121   :  { %965 = vmatpush1.bf16.msra.mxu0 %v5323_v32  ;;  %6501 = vst [vmem:[#allocation53_spill] sm:$0xff] %v5383_v30  ;;  %v821_v45 = vld [vmem:[#allocation8 + $0x1e0] sm:$0xff]  ;;  %v836_v47 = vld [vmem:[#allocation8 + $0x258] sm:$0xff]  ;;  %v830_v49 = vld [vmem:[#allocation8 + $0x228] sm:$0xff] }
 0x122   :  { %966 = vmatprep.subr.bf16.mxu0 %v5328_v34  ;;  %3817 = vmatmul.mubr.msk.f32.gmra.mrb[12].mxu1 %vm311_vm0, %v5284_v61  ;;  %6502 = vst [vmem:[#allocation54_spill] sm:$0xff] %v5389_v37  ;;  %v838_v51 = vld [vmem:[#allocation8 + $0x268] sm:$0xff]  ;;  %v5402_v56 = vpack.c.bf16 %v821_v45, %v813_v40  ;;  %v5404_v57 = vpack.c.bf16 %v836_v47, %v828_v46  ;;  %v827_v58 = vld [vmem:[#allocation8 + $0x210] sm:$0xff]  ;;  %v829_v60 = vld [vmem:[#allocation8 + $0x220] sm:$0xff] }
 0x123   :  { %495 = vmatprep.mubr.f32.mxu1 %v6367_v0  ;;  %v835_v59 = vld [vmem:[#allocation8 + $0x250] sm:$0xff]  ;;  %v837_v4 = vld [vmem:[#allocation8 + $0x260] sm:$0xff]  ;;  %v844_v5 = vld [vmem:[#allocation8 + $0x298] sm:$0xff] }
 0x124   :  { %6504 = vst [vmem:[#allocation56_spill] sm:$0xff] %v5404_v57  ;;  %v852_v6 = vld [vmem:[#allocation8 + $0x2d8] sm:$0xff]  ;;  %v846_v11 = vld [vmem:[#allocation8 + $0x2a8] sm:$0xff]  ;;  %v5412_v14 = vpack.c.bf16 %v835_v59, %v827_v58  ;;  %v843_v21 = vld [vmem:[#allocation8 + $0x290] sm:$0xff] }
 0x125   :  { %967 = vmatpush1.bf16.msra.mxu0 %v5334_v41  ;;  %v854_v13 = vld [vmem:[#allocation8 + $0x2e8] sm:$0xff]  ;;  %v851_v22 = vld [vmem:[#allocation8 + $0x2d0] sm:$0xff]  ;;  %v845_v23 = vld [vmem:[#allocation8 + $0x2a0] sm:$0xff] }
 0x126   :  { %968 = vmatprep.subr.bf16.mxu0 %v5338_v43  ;;  %3818 = vmatmul.mubr.msk.f32.gmra.mrb[14].mxu1 %vm311_vm0, %v5298_v7  ;;  %6505 = vst [vmem:[#allocation57_spill] sm:$0xff] %v5412_v14  ;;  %v853_v25 = vld [vmem:[#allocation8 + $0x2e0] sm:$0xff]  ;;  %v860_v26 = vld [vmem:[#allocation8 + $0x318] sm:$0xff]  ;;  %v862_v28 = vld [vmem:[#allocation8 + $0x328] sm:$0xff] }
 0x127   :  { %655 = vmatprep.mubr.f32.mxu1 %v6367_v0  ;;  %v868_v27 = vld [vmem:[#allocation8 + $0x358] sm:$0xff]  ;;  %v870_v29 = vld [vmem:[#allocation8 + $0x368] sm:$0xff]  ;;  %v859_v45 = vld [vmem:[#allocation8 + $0x310] sm:$0xff] }
 0x128   :  { %v5431_v40 = vpack.c.bf16 %v868_v27, %v860_v26  ;;  %v867_v46 = vld [vmem:[#allocation8 + $0x350] sm:$0xff]  ;;  %v861_v47 = vld [vmem:[#allocation8 + $0x320] sm:$0xff]  ;;  %v876_v58 = vld [vmem:[#allocation8 + $0x398] sm:$0xff] }
 0x129   :  { %969 = vmatpush1.bf16.msra.mxu0 %v5344_v48  ;;  %v884_v59 = vld [vmem:[#allocation8 + $0x3d8] sm:$0xff] }
 0x12a   :  { %1036 = vmatprep.subr.bf16.mxu0 %v5347_v54  ;;  %3823 = vmatmul.mubr.msk.f32.vlgmr.msra.gmra.mrb[16].mxu1 %vm311_vm0, %v5258_v35  ;;  %v5376_v35 = vpack.c.bf16 %v806_v16, %v798_v15  ;;  %v5417_v15 = vpack.c.bf16 %v837_v4, %v829_v60  ;;  %v5419_v16 = vpack.c.bf16 %v852_v6, %v844_v5  ;;  %v878_v60 = vld [vmem:[#allocation8 + $0x3a8] sm:$0xff]  ;;  %v768_v26 = vld [vmem:[#allocation8 + $0x38] sm:$0xff] }
 0x12b   :  { %996 = vmatpush1.bf16.msra.mxu1 %v5352_v62  ;;  %661 = vmatprep.mubr.f32.mxu1 %v6367_v0  ;;  %6508 = vst [vmem:[#allocation60_spill] sm:$0xff] %v5431_v40  ;;  %v886_v4 = vld [vmem:[#allocation8 + $0x3e8] sm:$0xff]  ;;  %v5437_v5 = vpack.c.bf16 %v867_v46, %v859_v45  ;;  %v776_v27 = vld [vmem:[#allocation8 + $0x78] sm:$0xff]  ;;  %v767_v46 = vld [vmem:[#allocation8 + $0x30] sm:$0xff] }
 0x12c   :  { %987 = vmatmul.mubr.bf16.vlgmr.msra.gmra.mrb[8].mxu0 %v6369_v1  ;;  %997 = vmatprep.subr.bf16.mxu1 %v5358_v9  ;;  %6506 = vst [vmem:[#allocation58_spill] sm:$0xff] %v5419_v16  ;;  %v5455_v45 = vpack.c.bf16 %v776_v27, %v768_v26  ;;  %v799_v27 = vld [vmem:[#allocation8 + $0x130] sm:$0xff] }
 0x12d   :  { %1037 = vmatpush1.bf16.msra.mxu0 %v5355_v3  ;;  %1068 = vmatprep.mubr.bf16.mxu0 %v6369_v1  ;;  %6509 = vst [vmem:[#allocation61_spill] sm:$0xff] %v5437_v5 }
 0x12e   :  { %1038 = vmatprep.subr.bf16.mxu0 %v5360_v10  ;;  %3824 = vmatmul.mubr.msk.f32.gmra.mrb[18].mxu1 %vm311_vm0, %v5269_v50  ;;  %v819_v50 = vld [vmem:[#allocation8 + $0x1d0] sm:$0xff]  ;;  %6513 = vst [vmem:[#allocation65_spill] sm:$0xff] %v5455_v45 }
 0x12f   :  { %998 = vmatpush1.bf16.msra.mxu1 %v5366_v17  ;;  %667 = vmatprep.mubr.f32.mxu1 %v6367_v0  ;;  %v5398_v55 = vpack.c.bf16 %v819_v50, %v811_v38  ;;  %v5425_v38 = vpack.c.bf16 %v851_v22, %v843_v21  ;;  %v5429_v50 = vpack.c.bf16 %v853_v25, %v845_v23  ;;  %v883_v21 = vld [vmem:[#allocation8 + $0x3d0] sm:$0xff]  ;;  %v877_v22 = vld [vmem:[#allocation8 + $0x3a0] sm:$0xff] }
 0x130   :  { %999 = vmatprep.subr.bf16.mxu1 %v5372_v20  ;;  %v5446_v23 = vpack.c.bf16 %v886_v4, %v878_v60  ;;  %v885_v25 = vld [vmem:[#allocation8 + $0x3e0] sm:$0xff]  ;;  %v783_v4 = vld [vmem:[#allocation8 + $0xb0] sm:$0xff] }
 0x131   :  { %1039 = vmatpush1.bf16.msra.mxu0 %v5370_v18  ;;  %6503 = vst [vmem:[#allocation55_spill] sm:$0xff] %v5398_v55  ;;  %6507 = vst [vmem:[#allocation59_spill] sm:$0xff] %v5425_v38 }
 0x132   :  { %1040 = vmatprep.subr.bf16.mxu0 %v5376_v35  ;;  %3825 = vmatmul.mubr.msk.f32.gmra.mrb[20].mxu1 %vm311_vm0, %v5284_v61  ;;  %v5407_v61 = vpack.c.bf16 %v838_v51, %v830_v49  ;;  %v5434_v49 = vpack.c.bf16 %v870_v29, %v862_v28  ;;  %v869_v51 = vld [vmem:[#allocation8 + $0x360] sm:$0xff]  ;;  %v5453_v29 = vpack.c.bf16 %v885_v25, %v877_v22  ;;  %v808_v22 = vld [vmem:[#allocation8 + $0x178] sm:$0xff] }
 0x133   :  { %1000 = vmatpush1.bf16.msra.mxu1 %v5383_v30  ;;  %673 = vmatprep.mubr.f32.mxu1 %v6367_v0  ;;  %v5441_v6 = vpack.c.bf16 %v869_v51, %v861_v47  ;;  %v775_v47 = vld [vmem:[#allocation8 + $0x70] sm:$0xff]  ;;  %v784_v51 = vld [vmem:[#allocation8 + $0xb8] sm:$0xff] }
 0x134   :  { %1001 = vmatprep.subr.bf16.mxu1 %v5389_v37  ;;  %6512 = vst [vmem:[#allocation64_spill] sm:$0xff] %v5453_v29  ;;  %v840_v0 = vld [vmem:[#allocation8 + $0x278] sm:$0xff] }
 0x135   :  { %1041 = vmatpush1.bf16.msra.mxu0 %v5387_v36 }
 0x136   :  { %1042 = vmatprep.subr.bf16.mxu0 %v5392_v44  ;;  %3826 = vmatmul.mubr.msk.f32.gmra.mrb[22].mxu1 %vm311_vm0, %v5298_v7  ;;  %v5422_v7 = vpack.c.bf16 %v854_v13, %v846_v11  ;;  %v5443_v11 = vpack.c.bf16 %v884_v59, %v876_v58  ;;  %v875_v13 = vld [vmem:[#allocation8 + $0x390] sm:$0xff]  ;;  %v792_v58 = vld [vmem:[#allocation8 + $0xf8] sm:$0xff]  ;;  %v5459_v59 = vpack.c.bf16 %v775_v47, %v767_v46 }
 0x137   :  { %1002 = vmatpush1.bf16.msra.mxu1 %v5398_v55  ;;  %1027 = vmatprep.mubr.bf16.mxu1 %v6369_v1  ;;  %v5449_v28 = vpack.c.bf16 %v883_v21, %v875_v13  ;;  %v5463_v60 = vpack.c.bf16 %v792_v58, %v784_v51  ;;  %v791_v13 = vld [vmem:[#allocation8 + $0xf0] sm:$0xff]  ;;  %v800_v21 = vld [vmem:[#allocation8 + $0x138] sm:$0xff] }
 0x138   :  { %1003 = vmatprep.subr.bf16.mxu1 %v5404_v57  ;;  %6510 = vst [vmem:[#allocation62_spill] sm:$0xff] %v5443_v11  ;;  %v5469_v25 = vpack.c.bf16 %v791_v13, %v783_v4  ;;  %v5472_v26 = vpack.c.bf16 %v808_v22, %v800_v21  ;;  %v807_v46 = vld [vmem:[#allocation8 + $0x170] sm:$0xff]  ;;  %v816_v47 = vld [vmem:[#allocation8 + $0x1b8] sm:$0xff] }
 0x139   :  { %1043 = vmatpush1.bf16.msra.mxu0 %v5402_v56  ;;  %6511 = vst [vmem:[#allocation63_spill] sm:$0xff] %v5449_v28  ;;  %v824_v51 = vld [vmem:[#allocation8 + $0x1f8] sm:$0xff]  ;;  %v5479_v58 = vpack.c.bf16 %v807_v46, %v799_v27  ;;  %v815_v13 = vld [vmem:[#allocation8 + $0x1b0] sm:$0xff] }
 0x13a   :  { %1044 = vmatprep.subr.bf16.mxu0 %v5407_v61  ;;  %v5482_v4 = vpack.c.bf16 %v824_v51, %v816_v47  ;;  %v823_v21 = vld [vmem:[#allocation8 + $0x1f0] sm:$0xff]  ;;  %v832_v22 = vld [vmem:[#allocation8 + $0x238] sm:$0xff] }
 0x13b   :  { %1004 = vmatpush1.bf16.msra.mxu1 %v5412_v14  ;;  %v5490_v27 = vpack.c.bf16 %v840_v0, %v832_v22  ;;  %v831_v46 = vld [vmem:[#allocation8 + $0x230] sm:$0xff]  ;;  %v848_v47 = vld [vmem:[#allocation8 + $0x2b8] sm:$0xff] }
 0x13c   :  { %1005 = vmatprep.subr.bf16.mxu1 %v5419_v16  ;;  %v856_v51 = vld [vmem:[#allocation8 + $0x2f8] sm:$0xff] }
 0x13d   :  { %1045 = vmatpush1.bf16.msra.mxu0 %v5417_v15  ;;  %v864_v0 = vld [vmem:[#allocation8 + $0x338] sm:$0xff] }
 0x13e   :  { %1046 = vmatprep.subr.bf16.mxu0 %v5422_v7  ;;  %v872_v22 = vld [vmem:[#allocation8 + $0x378] sm:$0xff] }
 0x13f   :  { %1006 = vmatpush1.bf16.msra.mxu1 %v5425_v38 }
 0x140   :  { %1007 = vmatprep.subr.bf16.mxu1 %v5431_v40 }
 0x141   :  { %1047 = vmatpush1.bf16.msra.mxu0 %v5429_v50 }
 0x142   :  { %1048 = vmatprep.subr.bf16.mxu0 %v5434_v49 }
 0x143   :  { %1008 = vmatpush1.bf16.msra.mxu1 %v5437_v5 }
 0x144   :  { %1009 = vmatprep.subr.bf16.mxu1 %v5443_v11 }
 0x145   :  { %1049 = vmatpush1.bf16.msra.mxu0 %v5441_v6 }
 0x146   :  { %1050 = vmatprep.subr.bf16.mxu0 %v5446_v23 }
 0x147   :  { %1010 = vmatpush1.bf16.msra.mxu1 %v5449_v28 }
 0x148   :  { %1077 = vmatprep.subr.bf16.mxu1 %v5455_v45 }
 0x149   :  { %1051 = vmatpush1.bf16.msra.mxu0 %v5453_v29 }
 0x14a   :  { %1153 = vmatprep.subr.bf16.mxu0 %v5256_v31  ;;  %1028 = vmatmul.mubr.bf16.vlgmr.msra.gmra.mrb[24].mxu1 %v6369_v1 }
 0x14b   :  { %1078 = vmatpush1.bf16.msra.mxu1 %v5459_v59  ;;  %1109 = vmatprep.mubr.bf16.mxu1 %v6369_v1 }
 0x14c   :  { %1069 = vmatmul.mubr.bf16.vlgmr.msra.gmra.mrb[12].mxu0 %v6369_v1  ;;  %1079 = vmatprep.subr.bf16.mxu1 %v5463_v60 }
 0x14d   :  { %1154 = vmatpush1.bf16.msra.mxu0 %v5260_v39  ;;  %1185 = vmatprep.mubr.bf16.mxu0 %v6369_v1  ;;  %v5487_v1 = vpack.c.bf16 %v823_v21, %v815_v13  ;;  %v5498_v13 = vpack.c.bf16 %v856_v51, %v848_v47  ;;  %v847_v21 = vld [vmem:[#allocation8 + $0x2b0] sm:$0xff]  ;;  %v880_v47 = vld [vmem:[#allocation8 + $0x3b8] sm:$0xff] }
 0x14e   :  { %1155 = vmatprep.subr.bf16.mxu0 %v5263_v42  ;;  %v839_v42 = vld [vmem:[#allocation8 + $0x270] sm:$0xff]  ;;  %v888_v51 = vld [vmem:[#allocation8 + $0x3f8] sm:$0xff] }
 0x14f   :  { %1080 = vmatpush1.bf16.msra.mxu1 %v5469_v25 }
 0x150   :  { %1081 = vmatprep.subr.bf16.mxu1 %v5472_v26 }
 0x151   :  { %1156 = vmatpush1.bf16.msra.mxu0 %v5273_v52  ;;  %v5495_v52 = vpack.c.bf16 %v839_v42, %v831_v46  ;;  %v5506_v42 = vpack.c.bf16 %v872_v22, %v864_v0  ;;  %v863_v46 = vld [vmem:[#allocation8 + $0x330] sm:$0xff] }
 0x152   :  { %1157 = vmatprep.subr.bf16.mxu0 %v5277_v53  ;;  %v855_v53 = vld [vmem:[#allocation8 + $0x2f0] sm:$0xff] }
 0x153   :  { %1082 = vmatpush1.bf16.msra.mxu1 %v5479_v58 }
 0x154   :  { %1083 = vmatprep.subr.bf16.mxu1 %v5482_v4 }
 0x155   :  { %1158 = vmatpush1.bf16.msra.mxu0 %v5288_v63  ;;  %v5503_v63 = vpack.c.bf16 %v855_v53, %v847_v21  ;;  %v5514_v53 = vpack.c.bf16 %v888_v51, %v880_v47  ;;  %v879_v21 = vld [vmem:[#allocation8 + $0x3b0] sm:$0xff]  ;;  %v5555_v47 = vld [vmem:[%s6517_s23] sm:$0xff] }
 0x156   :  { %1159 = vmatprep.subr.bf16.mxu0 %v5291_v2  ;;  %v871_v2 = vld [vmem:[#allocation8 + $0x370] sm:$0xff] }
 0x157   :  { %1084 = vmatpush1.bf16.msra.mxu1 %v5487_v1 }
 0x158   :  { %1085 = vmatprep.subr.bf16.mxu1 %v5490_v27 }
 0x159   :  { %1160 = vmatpush1.bf16.msra.mxu0 %v5302_v8  ;;  %v5511_v8 = vpack.c.bf16 %v871_v2, %v863_v46  ;;  %v6515_v2 = vmov 0  }
 0x15a   :  { %1161 = vmatprep.subr.bf16.mxu0 %v5305_v12  ;;  %v887_v12 = vld [vmem:[#allocation8 + $0x3f0] sm:$0xff] }
 0x15b   :  { %1086 = vmatpush1.bf16.msra.mxu1 %v5495_v52  ;;  %v5519_v0 = vpack.c.bf16 %v887_v12, %v879_v21  ;;  %v6389_v12 = vlaneseq }
 0x15c   :  { %1087 = vmatprep.subr.bf16.mxu1 %v5498_v13 }
 0x15d   :  { %1162 = vmatpush1.bf16.msra.mxu0 %v5313_v19  ;;  %6514 = vst [vmem:[#allocation66_spill] sm:$0xff] %v5519_v0  ;;  %v5547_v22 = vshrl.u32 %v6389_v12, 7 }
 0x15e   :  { %1163 = vmatprep.subr.bf16.mxu0 %v5317_v24 }
 0x15f   :  { %1088 = vmatpush1.bf16.msra.mxu1 %v5503_v63  ;;  %v5550_v46 = vsub.s32 0, %v5547_v22  ;;  %v289_v51 = vsub.s32 4, %v5547_v22  ;;  %v5559_v21 = vsub.s32 1, %v5547_v22  ;;  %vm953_vm5 = vcmp.lt.s32.totalorder %v5547_v22, 2 }
 0x160   :  { %1089 = vmatprep.subr.bf16.mxu1 %v5506_v42 }
 0x161   :  { %1164 = vmatpush1.bf16.msra.mxu0 %v5323_v32  ;;  %6516 = vst [vmem:[#allocation67_spill] sm:$0xff] %v5550_v46  ;;  %6518 = vst [vmem:[#allocation68_spill] sm:$0xff] %v5559_v21  ;;  %v274_v12 = vrot.slane %v5555_v47, %v5550_v46  ;;  %v683_v46 = vadd.s32 16, %v5547_v22 }
 0x162   :  { %1165 = vmatprep.subr.bf16.mxu0 %v5328_v34 }
 0x163   :  { %1090 = vmatpush1.bf16.msra.mxu1 %v5511_v8 }
 0x164   :  { %1091 = vmatprep.subr.bf16.mxu1 %v5514_v53 }
 0x165   :  { %1166 = vmatpush1.bf16.msra.mxu0 %v5334_v41 }
 0x166   :  { %1167 = vmatprep.subr.bf16.mxu0 %v5338_v43 }
 0x167   :  { %1092 = vmatpush1.bf16.msra.mxu1 %v5519_v0 }
 0x168   :  { %1194 = vmatprep.subr.bf16.mxu1 %v5325_v33 }
 0x169   :  { %1168 = vmatpush1.bf16.msra.mxu0 %v5344_v48  ;;  %v290_v48 = vrot.slane %v5555_v47, %v289_v51 }
 0x16a   :  { %1110 = vmatmul.mubr.bf16.vlgmr.msra.gmra.mrb[28].mxu1 %v6515_v2  ;;  %1235 = vmatprep.subr.bf16.mxu0 %v5347_v54  ;;  %v293_v54 = vsub.s32 5, %v5547_v22 }
 0x16b   :  { %1195 = vmatpush1.bf16.msra.mxu1 %v5352_v62  ;;  %1226 = vmatprep.mubr.bf16.mxu1 %v6515_v2 }
 0x16c   :  { %1196 = vmatprep.subr.bf16.mxu1 %v5358_v9  ;;  %v294_v43 = vrot.slane %v5555_v47, %v293_v54 }
 0x16f   :  { %1197 = vmatpush1.bf16.msra.mxu1 %v5366_v17 }
 0x170   :  { %1198 = vmatprep.subr.bf16.mxu1 %v5372_v20 }
 0x173   :  { %1199 = vmatpush1.bf16.msra.mxu1 %v5383_v30 }
 0x174   :  { %1200 = vmatprep.subr.bf16.mxu1 %v5389_v37 }
 0x177   :  { %1201 = vmatpush1.bf16.msra.mxu1 %v5398_v55 }
 0x178   :  { %1202 = vmatprep.subr.bf16.mxu1 %v5404_v57 }
 0x17b   :  { %1203 = vmatpush1.bf16.msra.mxu1 %v5412_v14 }
 0x17c   :  { %1204 = vmatprep.subr.bf16.mxu1 %v5419_v16 }
 0x17f   :  { %1205 = vmatpush1.bf16.msra.mxu1 %v5425_v38 }
 0x180   :  { %1206 = vmatprep.subr.bf16.mxu1 %v5431_v40 }
 0x183   :  { %1207 = vmatpush1.bf16.msra.mxu1 %v5437_v5 }
 0x184   :  { %1208 = vmatprep.subr.bf16.mxu1 %v5443_v11  ;;  %v278_v11 = vrot.slane %v5555_v47, %v5559_v21 }
 0x187   :  { %1209 = vmatpush1.bf16.msra.mxu1 %v5449_v28  ;;  %v689_v28 = vand.u32 3, %v5547_v22 }
 0x188   :  { %1276 = vmatprep.subr.bf16.mxu1 %v5455_v45  ;;  %v682_v45 = vadd.s32 8, %v5547_v22 }
 0x189   :  { %vm5570_vm1 = vcmp.lt.s32.totalorder %v689_v28, 2 }
 0x18a   :  { %v696_v41 = vand.u32 3, %v682_v45 }
 0x18c   :  { %vm5579_vm2 = vcmp.lt.s32.totalorder %v696_v41, 2 }
 0x1dd   :  { %v390_v5 = vpop.f32.mrb[0].mxu1 }
 0x1de   :  { %v391_v40 = vadd.f32 %v390_v5, %v274_v12  ;;  %v392_v38 = vpop.f32.mrb[1].mxu1 }
 0x1df   :  { %v568_v34 = vpop.f32.mrb[0].mxu0  ;;  %v393_v24 = vadd.f32 %v392_v38, %v278_v11  ;;  %v684_v38 = vadd.s32 24, %v5547_v22 }
 0x1e0   :  { %v569_v16 = vadd.f32 %v568_v34, %v290_v48  ;;  %v570_v14 = vpop.f32.mrb[1].mxu0  ;;  %v703_v34 = vand.u32 3, %v683_v46 }
 0x1e1   :  { %v571_v51 = vadd.f32 %v570_v14, %v294_v43  ;;  %v396_v19 = vpop.f32.mrb[2].mxu1  ;;  %v710_v46 = vand.u32 3, %v684_v38 }
 0x1e2   :  { %v5577_v21 = vsel %vm5570_vm1, %v391_v40, %v569_v16  ;;  %v397_v5 = vadd.f32 %v396_v19, %v274_v12  ;;  %v398_v45 = vpop.f32.mrb[3].mxu1  ;;  %vm5596_vm3 = vcmp.lt.s32.totalorder %v703_v34, 2 }
 0x1e3   :  { %v574_v28 = vpop.f32.mrb[2].mxu0  ;;  %v5585_v57 = vsel %vm5570_vm1, %v393_v24, %v571_v51  ;;  %v399_v55 = vadd.f32 %v398_v45, %v278_v11  ;;  %vm5608_vm4 = vcmp.lt.s32.totalorder %v710_v46, 2 }
 0x1e4   :  { %v575_v14 = vadd.f32 %v574_v28, %v290_v48  ;;  %v576_v37 = vpop.f32.mrb[3].mxu0 }
 0x1e5   :  { %v577_v30 = vadd.f32 %v576_v37, %v294_v43  ;;  %v402_v16 = vpop.f32.mrb[4].mxu1 }
 0x1e6   :  { %v5590_v41 = vsel %vm5579_vm2, %v397_v5, %v575_v14  ;;  %v403_v40 = vadd.f32 %v402_v16, %v274_v12  ;;  %v404_v20 = vpop.f32.mrb[5].mxu1 }
 0x1e7   :  { %6523 = vst [vmem:[#allocation69_spill] sm:$0xff] %v5590_v41  ;;  %v580_v19 = vpop.f32.mrb[4].mxu0  ;;  %v5594_v17 = vsel %vm5579_vm2, %v399_v55, %v577_v30  ;;  %v405_v28 = vadd.f32 %v404_v20, %v278_v11 }
 0x1e8   :  { %6524 = vst [vmem:[#allocation70_spill] sm:$0xff] %v5594_v17  ;;  %v581_v51 = vadd.f32 %v580_v19, %v290_v48  ;;  %v582_v37 = vpop.f32.mrb[5].mxu0 }
 0x1e9   :  { %v583_v45 = vadd.f32 %v582_v37, %v294_v43  ;;  %v408_v9 = vpop.f32.mrb[6].mxu1  ;;  %v6440_v37 = vsub.s32 2, %v5547_v22 }
 0x1ea   :  { %v5602_v5 = vsel %vm5596_vm3, %v403_v40, %v581_v51  ;;  %v409_v14 = vadd.f32 %v408_v9, %v274_v12  ;;  %v410_v41 = vpop.f32.mrb[7].mxu1  ;;  %v6442_v40 = vsub.s32 3, %v5547_v22 }
 0x1eb   :  { %6527 = vst [vmem:[#allocation71_spill] sm:$0xff] %v5602_v5  ;;  %v586_v16 = vpop.f32.mrb[6].mxu0  ;;  %v5606_v30 = vsel %vm5596_vm3, %v405_v28, %v583_v45  ;;  %v411_v20 = vadd.f32 %v410_v41, %v278_v11 }
 0x1ec   :  { %6528 = vst [vmem:[#allocation72_spill] sm:$0xff] %v5606_v30  ;;  %v587_v34 = vadd.f32 %v586_v16, %v290_v48  ;;  %v588_v38 = vpop.f32.mrb[7].mxu0  ;;  %v282_v48 = vrot.slane %v5555_v47, %v6440_v37 }
 0x1ed   :  { %v589_v19 = vadd.f32 %v588_v38, %v294_v43  ;;  %v479_v17 = vpop.f32.mrb[8].mxu1  ;;  %v286_v43 = vrot.slane %v5555_v47, %v6442_v40 }
 0x1ee   :  { %v5616_v9 = vsel %vm5608_vm4, %v409_v14, %v587_v34  ;;  %v481_v12 = vpop.f32.mrb[9].mxu1  ;;  %v297_v34 = vsub.s32 6, %v5547_v22 }
 0x1ef   :  { %6531 = vst [vmem:[#allocation73_spill] sm:$0xff] %v5616_v9  ;;  %v5620_v46 = vsel %vm5608_vm4, %v411_v20, %v589_v19  ;;  %v301_v20 = vsub.s32 7, %v5547_v22 }
 0x1f0   :  { %6532 = vst [vmem:[#allocation74_spill] sm:$0xff] %v5620_v46  ;;  %v298_v37 = vrot.slane %v5555_v47, %v297_v34 }
 0x1f1   :  { %v485_v11 = vpop.f32.mrb[10].mxu1  ;;  %v302_v40 = vrot.slane %v5555_v47, %v301_v20 }
 0x1f2   :  { %v486_v41 = vadd.f32 %v485_v11, %v282_v48  ;;  %v487_v51 = vpop.f32.mrb[11].mxu1  ;;  %v480_v11 = vadd.f32 %v479_v17, %v282_v48 }
 0x1f3   :  { %v488_v28 = vadd.f32 %v487_v51, %v286_v43 }
 0x1f5   :  { %v491_v45 = vpop.f32.mrb[12].mxu1 }
 0x1f6   :  { %v492_v14 = vadd.f32 %v491_v45, %v282_v48  ;;  %v493_v16 = vpop.f32.mrb[13].mxu1  ;;  %v482_v45 = vadd.f32 %v481_v12, %v286_v43 }
 0x1f7   :  { %v494_v38 = vadd.f32 %v493_v16, %v286_v43 }
 0x1f9   :  { %v497_v19 = vpop.f32.mrb[14].mxu1 }
 0x1fa   :  { %v498_v46 = vadd.f32 %v497_v19, %v282_v48  ;;  %v499_v9 = vpop.f32.mrb[15].mxu1 }
 0x1fb   :  { %v500_v30 = vadd.f32 %v499_v9, %v286_v43 }
 0x1fd   :  { %v657_v5 = vpop.f32.mrb[16].mxu1 }
 0x1fe   :  { %v658_v62 = vadd.f32 %v657_v5, %v298_v37  ;;  %v659_v51 = vpop.f32.mrb[17].mxu1 }
 0x1ff   :  { %v988_v39 = vpop.f32.mrb[8].mxu0  ;;  %v660_v33 = vadd.f32 %v659_v51, %v302_v40 }
 0x200   :  { %v990_v31 = vpop.f32.mrb[9].mxu0  ;;  %v5634_v16 = vsel %vm5570_vm1, %v480_v11, %v658_v62 }
 0x201   :  { %v992_v0 = vpop.f32.mrb[10].mxu0  ;;  %v663_v19 = vpop.f32.mrb[18].mxu1  ;;  %v5638_v9 = vsel %vm5570_vm1, %v482_v45, %v660_v33 }
 0x202   :  { %v993_v29 = vpop.f32.mrb[11].mxu0  ;;  %v664_v47 = vadd.f32 %v663_v19, %v298_v37  ;;  %v665_v34 = vpop.f32.mrb[19].mxu1 }
 0x203   :  { %v666_v17 = vadd.f32 %v665_v34, %v302_v40 }
 0x204   :  { %v5642_v5 = vsel %vm5579_vm2, %v486_v41, %v664_v47 }
 0x205   :  { %6533 = vst [vmem:[#allocation75_spill] sm:$0xff] %v5642_v5  ;;  %v669_v12 = vpop.f32.mrb[20].mxu1  ;;  %v5646_v0 = vsel %vm5579_vm2, %v488_v28, %v666_v17  ;;  %v6566_v5 = vld [vmem:[#allocation60_spill] sm:$0xff] }
 0x206   :  { %6534 = vst [vmem:[#allocation76_spill] sm:$0xff] %v5646_v0  ;;  %v670_v62 = vadd.f32 %v669_v12, %v298_v37  ;;  %v671_v48 = vpop.f32.mrb[21].mxu1  ;;  %v6567_v0 = vld [vmem:[#allocation45_spill] sm:$0xff] }
 0x207   :  { %v672_v43 = vadd.f32 %v671_v48, %v302_v40 }
 0x208   :  { %v5650_v32 = vsel %vm5596_vm3, %v492_v14, %v670_v62 }
 0x209   :  { %6535 = vst [vmem:[#allocation77_spill] sm:$0xff] %v5650_v32  ;;  %v675_v33 = vpop.f32.mrb[22].mxu1  ;;  %v5654_v29 = vsel %vm5596_vm3, %v494_v38, %v672_v43  ;;  %v6564_v32 = vld [vmem:[#allocation59_spill] sm:$0xff] }
 0x20a   :  { %6536 = vst [vmem:[#allocation78_spill] sm:$0xff] %v5654_v29  ;;  %v676_v20 = vadd.f32 %v675_v33, %v298_v37  ;;  %v677_v41 = vpop.f32.mrb[23].mxu1  ;;  %v6565_v29 = vld [vmem:[#allocation44_spill] sm:$0xff] }
 0x20b   :  { %v678_v11 = vadd.f32 %v677_v41, %v302_v40 }
 0x20c   :  { %v5658_v54 = vsel %vm5608_vm4, %v498_v46, %v676_v20 }
 0x20d   :  { %6537 = vst [vmem:[#allocation79_spill] sm:$0xff] %v5658_v54  ;;  %v5662_v28 = vsel %vm5608_vm4, %v500_v30, %v678_v11  ;;  %v6562_v54 = vld [vmem:[#allocation58_spill] sm:$0xff] }
 0x20e   :  { %6538 = vst [vmem:[#allocation80_spill] sm:$0xff] %v5662_v28  ;;  %v6563_v28 = vld [vmem:[#allocation42_spill] sm:$0xff] }
 0x21d   :  { %v1029_v14 = vpop.f32.mrb[24].mxu1 }
 0x21e   :  { %v1031_v51 = vpop.f32.mrb[25].mxu1 }
 0x21f   :  { %v1070_v45 = vpop.f32.mrb[12].mxu0  ;;  %v1033_v38 = vpop.f32.mrb[26].mxu1 }
 0x220   :  { %v1120_v24 = vsel %vm953_vm5, %v988_v39, %v1070_v45  ;;  %v1072_v37 = vpop.f32.mrb[13].mxu0  ;;  %v1034_v19 = vpop.f32.mrb[27].mxu1 }
 0x221   :  { %v1121_v40 = vsel %vm953_vm5, %v990_v31, %v1072_v37  ;;  %v1074_v46 = vpop.f32.mrb[14].mxu0  ;;  %v1124_v30 = vadd.f32 %v1120_v24, %v5577_v21 }
 0x222   :  { %v1075_v47 = vpop.f32.mrb[15].mxu0  ;;  %v1125_v55 = vadd.f32 %v1121_v40, %v5585_v57 }
 0x223   :  { %v3827_v17 = vmul.f32 -1.442695, %v1124_v30 }
 0x224   :  { %v3828_v34 = vmul.f32 -1.442695, %v1125_v55 }
 0x226   :  { %4501 = vpow2.f32 %v3828_v34 }
 0x227   :  { %4503 = vpow2.f32 %v3827_v17 }
 0x230   :  { %v4502_v12 = vpop.eup %4501 }
 0x231   :  { %v4504_v62 = vpop.eup %4503  ;;  %v1137_v48 = vadd.f32 1.0, %v4502_v12 }
 0x232   :  { %v1131_v39 = vadd.f32 1.0, %v4504_v62  ;;  %v6539_v62 = vld [vmem:[#allocation64_spill] sm:$0xff] }
 0x233   :  { %4505 = vrcp.f32 %v1137_v48  ;;  %v6540_v48 = vld [vmem:[#allocation66_spill] sm:$0xff] }
 0x234   :  { %4507 = vrcp.f32 %v1131_v39  ;;  %v6541_v39 = vld [vmem:[#allocation31_spill] sm:$0xff] }
 0x23d   :  { %v1111_v43 = vpop.f32.mrb[28].mxu1  ;;  %v4506_v37 = vpop.eup %4505 }
 0x23e   :  { %v1122_v33 = vsel %vm953_vm5, %v1029_v14, %v1111_v43  ;;  %v1113_v31 = vpop.f32.mrb[29].mxu1  ;;  %v4508_v40 = vpop.eup %4507  ;;  %v1147_v46 = vmul.f32 0.0, %v4506_v37  ;;  %v6542_v43 = vld [vmem:[#allocation43_spill] sm:$0xff]  ;;  %v6551_v37 = vld [vmem:[#allocation36_spill] sm:$0xff] }
 0x23f   :  { %v1126_v20 = vadd.f32 %v1122_v33, %v5634_v16  ;;  %v1123_v41 = vsel %vm953_vm5, %v1031_v51, %v1113_v31  ;;  %v1115_v11 = vpop.f32.mrb[30].mxu1  ;;  %v6543_v33 = vld [vmem:[#allocation32_spill] sm:$0xff]  ;;  %v6544_v31 = vld [vmem:[#allocation49_spill] sm:$0xff] }
 0x240   :  { %v1127_v45 = vadd.f32 %v1123_v41, %v5638_v9  ;;  %v1116_v24 = vpop.f32.mrb[31].mxu1  ;;  %v6546_v41 = vld [vmem:[#allocation50_spill] sm:$0xff] }
 0x241   :  { %4509 = vtanh.f32 %v1126_v20  ;;  %v6545_v20 = vld [vmem:[#allocation33_spill] sm:$0xff]  ;;  %v6547_v11 = vld [vmem:[#allocation34_spill] sm:$0xff]  ;;  %v6549_v24 = vld [vmem:[#allocation35_spill] sm:$0xff] }
 0x242   :  { %v3829_v38 = vmul.f32 -1.442695, %v1127_v45  ;;  %v6548_v45 = vld [vmem:[#allocation51_spill] sm:$0xff] }
 0x244   :  { %4511 = vpow2.f32 %v3829_v38  ;;  %v6550_v38 = vld [vmem:[#allocation52_spill] sm:$0xff] }
 0x24b   :  { %v4510_v19 = vpop.eup %4509 }
 0x24c   :  { %v1148_v14 = vmul.f32 %v4510_v19, %v4508_v40  ;;  %v6552_v40 = vld [vmem:[#allocation53_spill] sm:$0xff] }
 0x24d   :  { %v6553_v19 = vld [vmem:[#allocation37_spill] sm:$0xff] }
 0x24e   :  { %v4512_v47 = vpop.eup %4511  ;;  %v5677_v55 = vadd.f32 %v1148_v14, %v1147_v46  ;;  %v6554_v46 = vld [vmem:[#allocation54_spill] sm:$0xff] }
 0x24f   :  { %v1144_v30 = vadd.f32 1.0, %v4512_v47  ;;  %v6555_v14 = vld [vmem:[#allocation38_spill] sm:$0xff]  ;;  %v6556_v47 = vld [vmem:[#allocation55_spill] sm:$0xff] }
 0x250   :  { %4513 = vtanh.f32 %v5677_v55 }
 0x251   :  { %4515 = vrcp.f32 %v1144_v30  ;;  %v6557_v30 = vld [vmem:[#allocation39_spill] sm:$0xff] }
 0x25a   :  { %v4514_v51 = vpop.eup %4513 }
 0x25b   :  { %v4516_v34 = vpop.eup %4515 }
 0x25c   :  { %v1151_v17 = vmul.f32 %v4516_v34, %v4514_v51  ;;  %v6558_v51 = vld [vmem:[#allocation56_spill] sm:$0xff] }
 0x25d   :  { %v6559_v34 = vld [vmem:[#allocation40_spill] sm:$0xff] }
 0x25e   :  { %v1152_v12 = vpack.c.bf16 %v1151_v17, %v1151_v17  ;;  %v6560_v17 = vld [vmem:[#allocation57_spill] sm:$0xff] }
 0x260   :  { %1186 = vmatmul.mubr.bf16.vlgmr.msra.gmra.mrb[16].mxu0 %v1152_v12  ;;  %1227 = vmatmul.mubr.bf16.vlgmr.msra.gmra.mrb[32].mxu1 %v1152_v12 }
 0x261   :  { %1236 = vmatpush1.bf16.msra.mxu0 %v5355_v3  ;;  %1277 = vmatpush1.bf16.msra.mxu1 %v5459_v59 }
 0x262   :  { %1237 = vmatprep.subr.bf16.mxu0 %v5360_v10  ;;  %1278 = vmatprep.subr.bf16.mxu1 %v5463_v60 }
 0x263   :  { %1267 = vmatprep.mubr.bf16.mxu0 %v6515_v2  ;;  %1308 = vmatprep.mubr.bf16.mxu1 %v6515_v2 }
 0x265   :  { %1238 = vmatpush1.bf16.msra.mxu0 %v5370_v18  ;;  %1279 = vmatpush1.bf16.msra.mxu1 %v5469_v25 }
 0x266   :  { %1239 = vmatprep.subr.bf16.mxu0 %v5376_v35  ;;  %1280 = vmatprep.subr.bf16.mxu1 %v5472_v26 }
 0x269   :  { %1240 = vmatpush1.bf16.msra.mxu0 %v5387_v36  ;;  %1281 = vmatpush1.bf16.msra.mxu1 %v5479_v58 }
 0x26a   :  { %1241 = vmatprep.subr.bf16.mxu0 %v5392_v44  ;;  %1282 = vmatprep.subr.bf16.mxu1 %v5482_v4 }
 0x26d   :  { %1242 = vmatpush1.bf16.msra.mxu0 %v5402_v56  ;;  %1283 = vmatpush1.bf16.msra.mxu1 %v5487_v1 }
 0x26e   :  { %1243 = vmatprep.subr.bf16.mxu0 %v5407_v61  ;;  %1284 = vmatprep.subr.bf16.mxu1 %v5490_v27 }
 0x271   :  { %1244 = vmatpush1.bf16.msra.mxu0 %v5417_v15  ;;  %1285 = vmatpush1.bf16.msra.mxu1 %v5495_v52 }
 0x272   :  { %1245 = vmatprep.subr.bf16.mxu0 %v5422_v7  ;;  %1286 = vmatprep.subr.bf16.mxu1 %v5498_v13 }
 0x275   :  { %1246 = vmatpush1.bf16.msra.mxu0 %v5429_v50  ;;  %1287 = vmatpush1.bf16.msra.mxu1 %v5503_v63 }
 0x276   :  { %1247 = vmatprep.subr.bf16.mxu0 %v5434_v49  ;;  %1288 = vmatprep.subr.bf16.mxu1 %v5506_v42 }
 0x279   :  { %1248 = vmatpush1.bf16.msra.mxu0 %v5441_v6  ;;  %1289 = vmatpush1.bf16.msra.mxu1 %v5511_v8 }
 0x27a   :  { %1249 = vmatprep.subr.bf16.mxu0 %v5446_v23  ;;  %1290 = vmatprep.subr.bf16.mxu1 %v5514_v53 }
 0x27d   :  { %1250 = vmatpush1.bf16.msra.mxu0 %v6539_v62  ;;  %1291 = vmatpush1.bf16.msra.mxu1 %v6540_v48 }
 0x27e   :  { %1368 = vmatprep.subr.bf16.mxu0 %v6541_v39  ;;  %1409 = vmatprep.subr.bf16.mxu1 %v6542_v43 }
 0x280   :  { %1268 = vmatmul.mubr.bf16.vlgmr.msra.gmra.mrb[20].mxu0 %v1152_v12  ;;  %1309 = vmatmul.mubr.bf16.vlgmr.msra.gmra.mrb[36].mxu1 %v1152_v12  ;;  %v6561_v12 = vld [vmem:[#allocation41_spill] sm:$0xff] }
 0x281   :  { %1369 = vmatpush1.bf16.msra.mxu0 %v6543_v33  ;;  %1410 = vmatpush1.bf16.msra.mxu1 %v6544_v31 }
 0x282   :  { %1370 = vmatprep.subr.bf16.mxu0 %v6545_v20  ;;  %1411 = vmatprep.subr.bf16.mxu1 %v6546_v41 }
 0x283   :  { %1400 = vmatprep.mubr.bf16.mxu0 %v6515_v2  ;;  %1441 = vmatprep.mubr.bf16.mxu1 %v6515_v2 }
 0x285   :  { %1371 = vmatpush1.bf16.msra.mxu0 %v6547_v11  ;;  %1412 = vmatpush1.bf16.msra.mxu1 %v6548_v45 }
 0x286   :  { %1372 = vmatprep.subr.bf16.mxu0 %v6549_v24  ;;  %1413 = vmatprep.subr.bf16.mxu1 %v6550_v38 }
 0x289   :  { %1373 = vmatpush1.bf16.msra.mxu0 %v6551_v37  ;;  %1414 = vmatpush1.bf16.msra.mxu1 %v6552_v40 }
 0x28a   :  { %1374 = vmatprep.subr.bf16.mxu0 %v6553_v19  ;;  %1415 = vmatprep.subr.bf16.mxu1 %v6554_v46 }
 0x28d   :  { %1375 = vmatpush1.bf16.msra.mxu0 %v6555_v14  ;;  %1416 = vmatpush1.bf16.msra.mxu1 %v6556_v47 }
 0x28e   :  { %1376 = vmatprep.subr.bf16.mxu0 %v6557_v30  ;;  %1417 = vmatprep.subr.bf16.mxu1 %v6558_v51  ;;  %v6568_v30 = vld [vmem:[#allocation61_spill] sm:$0xff]  ;;  %v6569_v51 = vld [vmem:[#allocation46_spill] sm:$0xff] }
 0x291   :  { %1377 = vmatpush1.bf16.msra.mxu0 %v6559_v34  ;;  %1418 = vmatpush1.bf16.msra.mxu1 %v6560_v17  ;;  %v6570_v34 = vld [vmem:[#allocation62_spill] sm:$0xff]  ;;  %v6571_v17 = vld [vmem:[#allocation47_spill] sm:$0xff] }
 0x292   :  { %1378 = vmatprep.subr.bf16.mxu0 %v6561_v12  ;;  %1419 = vmatprep.subr.bf16.mxu1 %v6562_v54  ;;  %v6572_v12 = vld [vmem:[#allocation63_spill] sm:$0xff]  ;;  %v6573_v54 = vld [vmem:[#allocation48_spill] sm:$0xff] }
 0x295   :  { %1379 = vmatpush1.bf16.msra.mxu0 %v6563_v28  ;;  %1420 = vmatpush1.bf16.msra.mxu1 %v6564_v32  ;;  %v6574_v28 = vld [vmem:[#allocation65_spill] sm:$0xff] }
 0x296   :  { %1380 = vmatprep.subr.bf16.mxu0 %v6565_v29  ;;  %1421 = vmatprep.subr.bf16.mxu1 %v6566_v5 }
 0x299   :  { %1381 = vmatpush1.bf16.msra.mxu0 %v6567_v0  ;;  %1422 = vmatpush1.bf16.msra.mxu1 %v6568_v30 }
 0x29a   :  { %1382 = vmatprep.subr.bf16.mxu0 %v6569_v51  ;;  %1423 = vmatprep.subr.bf16.mxu1 %v6570_v34 }
 0x29d   :  { %1383 = vmatpush1.bf16.msra.mxu0 %v6571_v17  ;;  %1424 = vmatpush1.bf16.msra.mxu1 %v6572_v12 }
 0x29e   :  { %1450 = vmatprep.subr.bf16.mxu0 %v6573_v54  ;;  %1491 = vmatprep.subr.bf16.mxu1 %v6574_v28 }
 0x333   :  { %v1187_v32 = vpop.f32.mrb[16].mxu0  ;;  %v1228_v29 = vpop.f32.mrb[32].mxu1 }
 0x334   :  { %v1189_v47 = vpop.f32.mrb[17].mxu0  ;;  %v1230_v5 = vpop.f32.mrb[33].mxu1 }
 0x335   :  { %v1191_v14 = vpop.f32.mrb[18].mxu0  ;;  %v1232_v0 = vpop.f32.mrb[34].mxu1 }
 0x336   :  { %v1192_v46 = vpop.f32.mrb[19].mxu0  ;;  %v1233_v30 = vpop.f32.mrb[35].mxu1 }
 0x353   :  { %v1269_v19 = vpop.f32.mrb[20].mxu0  ;;  %v1310_v51 = vpop.f32.mrb[36].mxu1 }
 0x354   :  { %v1317_v34 = vsel %vm953_vm5, %v1187_v32, %v1269_v19  ;;  %v1319_v12 = vsel %vm953_vm5, %v1228_v29, %v1310_v51  ;;  %v1271_v17 = vpop.f32.mrb[21].mxu0  ;;  %v1312_v54 = vpop.f32.mrb[37].mxu1 }
 0x355   :  { %v1325_v40 = vrot.slane %v1317_v34, 4  ;;  %v1318_v28 = vsel %vm953_vm5, %v1189_v47, %v1271_v17  ;;  %v1320_v14 = vsel %vm953_vm5, %v1230_v5, %v1312_v54  ;;  %v1273_v0 = vpop.f32.mrb[22].mxu0  ;;  %v1314_v46 = vpop.f32.mrb[38].mxu1  ;;  %v1327_v47 = vrot.slane %v1319_v12, 4 }
 0x356   :  { %v1326_v30 = vrot.slane %v1318_v28, 4  ;;  %v1274_v37 = vpop.f32.mrb[23].mxu0  ;;  %v1315_v38 = vpop.f32.mrb[39].mxu1  ;;  %v1328_v51 = vrot.slane %v1320_v14, 4 }
 0x357   :  { %v1333_v24 = vadd.f32 %v1325_v40, %v5577_v21  ;;  %v1335_v5 = vadd.f32 %v1327_v47, %v5634_v16  ;;  %v1357_v37 = vrot.slane %v5677_v55, 4  ;;  %v6575_v55 = vld [vmem:[#allocation35_spill] sm:$0xff]  ;;  %v6578_v47 = vld [vmem:[#allocation53_spill] sm:$0xff] }
 0x358   :  { %v1334_v32 = vadd.f32 %v1326_v30, %v5585_v57  ;;  %v1336_v34 = vadd.f32 %v1328_v51, %v5638_v9  ;;  %v6576_v51 = vld [vmem:[#allocation52_spill] sm:$0xff] }
 0x359   :  { %v3830_v19 = vmul.f32 -1.442695, %v1333_v24 }
 0x35a   :  { %v3831_v29 = vmul.f32 -1.442695, %v1334_v32  ;;  %v3832_v17 = vmul.f32 -1.442695, %v1336_v34  ;;  %v6577_v34 = vld [vmem:[#allocation36_spill] sm:$0xff] }
 0x35b   :  { %4517 = vpow2.f32 %v3830_v19 }
 0x35c   :  { %4519 = vpow2.f32 %v3831_v29 }
 0x35d   :  { %4521 = vpow2.f32 %v3832_v17  ;;  %v6579_v17 = vld [vmem:[#allocation37_spill] sm:$0xff] }
 0x35e   :  { %4523 = vtanh.f32 %v1335_v5  ;;  %v6580_v5 = vld [vmem:[#allocation54_spill] sm:$0xff] }
 0x365   :  { %v4518_v54 = vpop.eup %4517 }
 0x366   :  { %v4520_v0 = vpop.eup %4519  ;;  %v1340_v28 = vadd.f32 1.0, %v4518_v54  ;;  %v6581_v54 = vld [vmem:[#allocation38_spill] sm:$0xff] }
 0x367   :  { %v1346_v38 = vadd.f32 1.0, %v4520_v0  ;;  %v4522_v57 = vpop.eup %4521  ;;  %v6582_v0 = vld [vmem:[#allocation55_spill] sm:$0xff] }
 0x368   :  { %4525 = vrcp.f32 %v1340_v28  ;;  %v4524_v21 = vpop.eup %4523  ;;  %v1353_v9 = vadd.f32 1.0, %v4522_v57  ;;  %v6583_v28 = vld [vmem:[#allocation39_spill] sm:$0xff]  ;;  %v6585_v57 = vld [vmem:[#allocation40_spill] sm:$0xff] }
 0x369   :  { %4527 = vrcp.f32 %v1346_v38  ;;  %v6584_v38 = vld [vmem:[#allocation56_spill] sm:$0xff] }
 0x36a   :  { %4529 = vrcp.f32 %v1353_v9  ;;  %v6591_v9 = vld [vmem:[#allocation44_spill] sm:$0xff] }
 0x372   :  { %v4526_v24 = vpop.eup %4525 }
 0x373   :  { %v4528_v40 = vpop.eup %4527  ;;  %v1360_v14 = vmul.f32 %v4526_v24, %v4524_v21  ;;  %v6586_v21 = vld [vmem:[#allocation57_spill] sm:$0xff] }
 0x374   :  { %v1359_v12 = vmul.f32 %v4528_v40, %v1357_v37  ;;  %v4530_v16 = vpop.eup %4529  ;;  %v6587_v24 = vld [vmem:[#allocation41_spill] sm:$0xff]  ;;  %v6588_v37 = vld [vmem:[#allocation58_spill] sm:$0xff] }
 0x375   :  { %v6589_v40 = vld [vmem:[#allocation42_spill] sm:$0xff] }
 0x376   :  { %v5761_v46 = vadd.f32 %v1360_v14, %v1359_v12  ;;  %v6590_v14 = vld [vmem:[#allocation59_spill] sm:$0xff]  ;;  %v6592_v12 = vld [vmem:[#allocation60_spill] sm:$0xff] }
 0x378   :  { %4531 = vtanh.f32 %v5761_v46 }
 0x382   :  { %v4532_v30 = vpop.eup %4531 }
 0x383   :  { %v1363_v32 = vmul.f32 %v4532_v30, %v4530_v16  ;;  %v6593_v16 = vld [vmem:[#allocation45_spill] sm:$0xff] }
 0x384   :  { %v6594_v30 = vld [vmem:[#allocation61_spill] sm:$0xff] }
 0x385   :  { %v1364_v19 = vpack.c.bf16 %v1363_v32, %v1363_v32  ;;  %v6595_v32 = vld [vmem:[#allocation46_spill] sm:$0xff] }
 0x387   :  { %v1366_v29 = vrot.slane %v1364_v19, 2  ;;  %v6596_v19 = vld [vmem:[#allocation62_spill] sm:$0xff] }
 0x389   :  { %1401 = vmatmul.mubr.bf16.vlgmr.msra.gmra.mrb[24].mxu0 %v1366_v29  ;;  %1442 = vmatmul.mubr.bf16.vlgmr.msra.gmra.mrb[40].mxu1 %v1366_v29 }
 0x38a   :  { %1451 = vmatpush1.bf16.msra.mxu0 %v5355_v3  ;;  %1492 = vmatpush1.bf16.msra.mxu1 %v5459_v59 }
 0x38b   :  { %1452 = vmatprep.subr.bf16.mxu0 %v5360_v10  ;;  %1493 = vmatprep.subr.bf16.mxu1 %v5463_v60 }
 0x38c   :  { %1482 = vmatprep.mubr.bf16.mxu0 %v6515_v2  ;;  %1523 = vmatprep.mubr.bf16.mxu1 %v6515_v2 }
 0x38e   :  { %1453 = vmatpush1.bf16.msra.mxu0 %v5370_v18  ;;  %1494 = vmatpush1.bf16.msra.mxu1 %v5469_v25 }
 0x38f   :  { %1454 = vmatprep.subr.bf16.mxu0 %v5376_v35  ;;  %1495 = vmatprep.subr.bf16.mxu1 %v5472_v26 }
 0x392   :  { %1455 = vmatpush1.bf16.msra.mxu0 %v5387_v36  ;;  %1496 = vmatpush1.bf16.msra.mxu1 %v5479_v58 }
 0x393   :  { %1456 = vmatprep.subr.bf16.mxu0 %v5392_v44  ;;  %1497 = vmatprep.subr.bf16.mxu1 %v5482_v4 }
 0x396   :  { %1457 = vmatpush1.bf16.msra.mxu0 %v5402_v56  ;;  %1498 = vmatpush1.bf16.msra.mxu1 %v5487_v1 }
 0x397   :  { %1458 = vmatprep.subr.bf16.mxu0 %v5407_v61  ;;  %1499 = vmatprep.subr.bf16.mxu1 %v5490_v27 }
 0x39a   :  { %1459 = vmatpush1.bf16.msra.mxu0 %v5417_v15  ;;  %1500 = vmatpush1.bf16.msra.mxu1 %v5495_v52 }
 0x39b   :  { %1460 = vmatprep.subr.bf16.mxu0 %v5422_v7  ;;  %1501 = vmatprep.subr.bf16.mxu1 %v5498_v13 }
 0x39e   :  { %1461 = vmatpush1.bf16.msra.mxu0 %v5429_v50  ;;  %1502 = vmatpush1.bf16.msra.mxu1 %v5503_v63 }
 0x39f   :  { %1462 = vmatprep.subr.bf16.mxu0 %v5434_v49  ;;  %1503 = vmatprep.subr.bf16.mxu1 %v5506_v42 }
 0x3a2   :  { %1463 = vmatpush1.bf16.msra.mxu0 %v5441_v6  ;;  %1504 = vmatpush1.bf16.msra.mxu1 %v5511_v8 }
 0x3a3   :  { %1464 = vmatprep.subr.bf16.mxu0 %v5446_v23  ;;  %1505 = vmatprep.subr.bf16.mxu1 %v5514_v53 }
 0x3a6   :  { %1465 = vmatpush1.bf16.msra.mxu0 %v6539_v62  ;;  %1506 = vmatpush1.bf16.msra.mxu1 %v6540_v48 }
 0x3a7   :  { %1568 = vmatprep.subr.bf16.mxu0 %v6541_v39  ;;  %1609 = vmatprep.subr.bf16.mxu1 %v6542_v43 }
 0x3a9   :  { %1483 = vmatmul.mubr.bf16.vlgmr.msra.gmra.mrb[28].mxu0 %v1366_v29  ;;  %1524 = vmatmul.mubr.bf16.vlgmr.msra.gmra.mrb[44].mxu1 %v1366_v29  ;;  %v6597_v29 = vld [vmem:[#allocation47_spill] sm:$0xff] }
 0x3aa   :  { %1569 = vmatpush1.bf16.msra.mxu0 %v6543_v33  ;;  %1610 = vmatpush1.bf16.msra.mxu1 %v6544_v31 }
 0x3ab   :  { %1570 = vmatprep.subr.bf16.mxu0 %v6545_v20  ;;  %1611 = vmatprep.subr.bf16.mxu1 %v6546_v41 }
 0x3ac   :  { %1600 = vmatprep.mubr.bf16.mxu0 %v6515_v2  ;;  %1641 = vmatprep.mubr.bf16.mxu1 %v6515_v2 }
 0x3ae   :  { %1571 = vmatpush1.bf16.msra.mxu0 %v6547_v11  ;;  %1612 = vmatpush1.bf16.msra.mxu1 %v6548_v45 }
 0x3af   :  { %1572 = vmatprep.subr.bf16.mxu0 %v6575_v55  ;;  %1613 = vmatprep.subr.bf16.mxu1 %v6576_v51 }
 0x3b2   :  { %1573 = vmatpush1.bf16.msra.mxu0 %v6577_v34  ;;  %1614 = vmatpush1.bf16.msra.mxu1 %v6578_v47 }
 0x3b3   :  { %1574 = vmatprep.subr.bf16.mxu0 %v6579_v17  ;;  %1615 = vmatprep.subr.bf16.mxu1 %v6580_v5 }
 0x3b6   :  { %1575 = vmatpush1.bf16.msra.mxu0 %v6581_v54  ;;  %1616 = vmatpush1.bf16.msra.mxu1 %v6582_v0  ;;  %v6601_v0 = vld [vmem:[#allocation69_spill] sm:$0xff] }
 0x3b7   :  { %1576 = vmatprep.subr.bf16.mxu0 %v6583_v28  ;;  %1617 = vmatprep.subr.bf16.mxu1 %v6584_v38 }
 0x3ba   :  { %1577 = vmatpush1.bf16.msra.mxu0 %v6585_v57  ;;  %1618 = vmatpush1.bf16.msra.mxu1 %v6586_v21 }
 0x3bb   :  { %1578 = vmatprep.subr.bf16.mxu0 %v6587_v24  ;;  %1619 = vmatprep.subr.bf16.mxu1 %v6588_v37  ;;  %v6598_v24 = vld [vmem:[#allocation63_spill] sm:$0xff]  ;;  %v6599_v37 = vld [vmem:[#allocation48_spill] sm:$0xff] }
 0x3be   :  { %1579 = vmatpush1.bf16.msra.mxu0 %v6589_v40  ;;  %1620 = vmatpush1.bf16.msra.mxu1 %v6590_v14  ;;  %v6600_v40 = vld [vmem:[#allocation65_spill] sm:$0xff] }
 0x3bf   :  { %1580 = vmatprep.subr.bf16.mxu0 %v6591_v9  ;;  %1621 = vmatprep.subr.bf16.mxu1 %v6592_v12 }
 0x3c2   :  { %1581 = vmatpush1.bf16.msra.mxu0 %v6593_v16  ;;  %1622 = vmatpush1.bf16.msra.mxu1 %v6594_v30 }
 0x3c3   :  { %1582 = vmatprep.subr.bf16.mxu0 %v6595_v32  ;;  %1623 = vmatprep.subr.bf16.mxu1 %v6596_v19 }
 0x3c6   :  { %1583 = vmatpush1.bf16.msra.mxu0 %v6597_v29  ;;  %1624 = vmatpush1.bf16.msra.mxu1 %v6598_v24 }
 0x3c7   :  { %1650 = vmatprep.subr.bf16.mxu0 %v6599_v37  ;;  %1691 = vmatprep.subr.bf16.mxu1 %v6600_v40 }
 0x45c   :  { %v1402_v14 = vpop.f32.mrb[24].mxu0  ;;  %v1443_v9 = vpop.f32.mrb[40].mxu1 }
 0x45d   :  { %v1404_v21 = vpop.f32.mrb[25].mxu0  ;;  %v1445_v12 = vpop.f32.mrb[41].mxu1 }
 0x45e   :  { %v1406_v57 = vpop.f32.mrb[26].mxu0  ;;  %v1447_v16 = vpop.f32.mrb[42].mxu1 }
 0x45f   :  { %v1407_v38 = vpop.f32.mrb[27].mxu0  ;;  %v1448_v30 = vpop.f32.mrb[43].mxu1 }
 0x460   :  { %v6602_v30 = vld [vmem:[#allocation70_spill] sm:$0xff] }
 0x47c   :  { %v1484_v28 = vpop.f32.mrb[28].mxu0  ;;  %v1525_v32 = vpop.f32.mrb[44].mxu1 }
 0x47d   :  { %v1532_v19 = vsel %vm953_vm5, %v1402_v14, %v1484_v28  ;;  %v1534_v24 = vsel %vm953_vm5, %v1443_v9, %v1525_v32  ;;  %v1486_v29 = vpop.f32.mrb[29].mxu0  ;;  %v1527_v37 = vpop.f32.mrb[45].mxu1  ;;  %v6603_v9 = vld [vmem:[#allocation76_spill] sm:$0xff] }
 0x47e   :  { %v1536_v40 = vadd.f32 %v1532_v19, %v6601_v0  ;;  %v1533_v54 = vsel %vm953_vm5, %v1404_v21, %v1486_v29  ;;  %v1535_v57 = vsel %vm953_vm5, %v1445_v12, %v1527_v37  ;;  %v1488_v38 = vpop.f32.mrb[30].mxu0  ;;  %v1529_v16 = vpop.f32.mrb[46].mxu1  ;;  %v6604_v19 = vld [vmem:[#allocation75_spill] sm:$0xff] }
 0x47f   :  { %v1537_v5 = vadd.f32 %v1533_v54, %v6602_v30  ;;  %v1489_v17 = vpop.f32.mrb[31].mxu0  ;;  %v1530_v47 = vpop.f32.mrb[47].mxu1  ;;  %v1539_v32 = vadd.f32 %v1535_v57, %v6603_v9  ;;  %v1538_v0 = vadd.f32 %v1534_v24, %v6604_v19 }
 0x480   :  { %v3833_v28 = vmul.f32 -1.442695, %v1536_v40 }
 0x481   :  { %v3834_v14 = vmul.f32 -1.442695, %v1537_v5  ;;  %v3835_v34 = vmul.f32 -1.442695, %v1539_v32  ;;  %v1560_v5 = vrot.slane %v5761_v46, 4  ;;  %v6605_v46 = vld [vmem:[#allocation52_spill] sm:$0xff] }
 0x482   :  { %4533 = vpow2.f32 %v3833_v28  ;;  %v6606_v28 = vld [vmem:[#allocation36_spill] sm:$0xff]  ;;  %v6608_v32 = vld [vmem:[#allocation37_spill] sm:$0xff] }
 0x483   :  { %4535 = vpow2.f32 %v3834_v14  ;;  %v6607_v14 = vld [vmem:[#allocation53_spill] sm:$0xff] }
 0x484   :  { %4537 = vpow2.f32 %v3835_v34 }
 0x485   :  { %4539 = vtanh.f32 %v1538_v0 }
 0x48c   :  { %v4534_v51 = vpop.eup %4533 }
 0x48d   :  { %v4536_v21 = vpop.eup %4535  ;;  %v1543_v29 = vadd.f32 1.0, %v4534_v51 }
 0x48e   :  { %v1549_v37 = vadd.f32 1.0, %v4536_v21  ;;  %v4538_v54 = vpop.eup %4537  ;;  %v6609_v21 = vld [vmem:[#allocation54_spill] sm:$0xff] }
 0x48f   :  { %4541 = vrcp.f32 %v1543_v29  ;;  %v4540_v17 = vpop.eup %4539  ;;  %v1556_v38 = vadd.f32 1.0, %v4538_v54  ;;  %v6610_v29 = vld [vmem:[#allocation38_spill] sm:$0xff]  ;;  %v6612_v54 = vld [vmem:[#allocation39_spill] sm:$0xff] }
 0x490   :  { %4543 = vrcp.f32 %v1549_v37  ;;  %v6611_v37 = vld [vmem:[#allocation55_spill] sm:$0xff] }
 0x491   :  { %4545 = vrcp.f32 %v1556_v38  ;;  %v6618_v38 = vld [vmem:[#allocation42_spill] sm:$0xff] }
 0x499   :  { %v4542_v47 = vpop.eup %4541 }
 0x49a   :  { %v4544_v40 = vpop.eup %4543  ;;  %v1563_v12 = vmul.f32 %v4542_v47, %v4540_v17  ;;  %v6613_v17 = vld [vmem:[#allocation56_spill] sm:$0xff] }
 0x49b   :  { %v1562_v57 = vmul.f32 %v4544_v40, %v1560_v5  ;;  %v4546_v51 = vpop.eup %4545  ;;  %v6614_v47 = vld [vmem:[#allocation40_spill] sm:$0xff]  ;;  %v6615_v5 = vld [vmem:[#allocation57_spill] sm:$0xff] }
 0x49c   :  { %v6616_v40 = vld [vmem:[#allocation41_spill] sm:$0xff] }
 0x49d   :  { %v5845_v16 = vadd.f32 %v1563_v12, %v1562_v57  ;;  %v6617_v12 = vld [vmem:[#allocation58_spill] sm:$0xff]  ;;  %v6619_v57 = vld [vmem:[#allocation59_spill] sm:$0xff] }
 0x49f   :  { %4547 = vtanh.f32 %v5845_v16 }
 0x4a9   :  { %v4548_v34 = vpop.eup %4547 }
 0x4aa   :  { %v1566_v0 = vmul.f32 %v4548_v34, %v4546_v51  ;;  %v6620_v51 = vld [vmem:[#allocation44_spill] sm:$0xff] }
 0x4ab   :  { %v6621_v34 = vld [vmem:[#allocation60_spill] sm:$0xff] }
 0x4ac   :  { %v1567_v24 = vpack.c.bf16 %v1566_v0, %v1566_v0  ;;  %v6622_v0 = vld [vmem:[#allocation45_spill] sm:$0xff] }
 0x4ae   :  { %1601 = vmatmul.mubr.bf16.vlgmr.msra.gmra.mrb[32].mxu0 %v1567_v24  ;;  %1642 = vmatmul.mubr.bf16.vlgmr.msra.gmra.mrb[48].mxu1 %v1567_v24 }
 0x4af   :  { %1651 = vmatpush1.bf16.msra.mxu0 %v5355_v3  ;;  %1692 = vmatpush1.bf16.msra.mxu1 %v5459_v59 }
 0x4b0   :  { %1652 = vmatprep.subr.bf16.mxu0 %v5360_v10  ;;  %1693 = vmatprep.subr.bf16.mxu1 %v5463_v60 }
 0x4b1   :  { %1682 = vmatprep.mubr.bf16.mxu0 %v6515_v2  ;;  %1723 = vmatprep.mubr.bf16.mxu1 %v6515_v2 }
 0x4b3   :  { %1653 = vmatpush1.bf16.msra.mxu0 %v5370_v18  ;;  %1694 = vmatpush1.bf16.msra.mxu1 %v5469_v25 }
 0x4b4   :  { %1654 = vmatprep.subr.bf16.mxu0 %v5376_v35  ;;  %1695 = vmatprep.subr.bf16.mxu1 %v5472_v26 }
 0x4b7   :  { %1655 = vmatpush1.bf16.msra.mxu0 %v5387_v36  ;;  %1696 = vmatpush1.bf16.msra.mxu1 %v5479_v58 }
 0x4b8   :  { %1656 = vmatprep.subr.bf16.mxu0 %v5392_v44  ;;  %1697 = vmatprep.subr.bf16.mxu1 %v5482_v4 }
 0x4bb   :  { %1657 = vmatpush1.bf16.msra.mxu0 %v5402_v56  ;;  %1698 = vmatpush1.bf16.msra.mxu1 %v5487_v1 }
 0x4bc   :  { %1658 = vmatprep.subr.bf16.mxu0 %v5407_v61  ;;  %1699 = vmatprep.subr.bf16.mxu1 %v5490_v27 }
 0x4bf   :  { %1659 = vmatpush1.bf16.msra.mxu0 %v5417_v15  ;;  %1700 = vmatpush1.bf16.msra.mxu1 %v5495_v52 }
 0x4c0   :  { %1660 = vmatprep.subr.bf16.mxu0 %v5422_v7  ;;  %1701 = vmatprep.subr.bf16.mxu1 %v5498_v13 }
 0x4c3   :  { %1661 = vmatpush1.bf16.msra.mxu0 %v5429_v50  ;;  %1702 = vmatpush1.bf16.msra.mxu1 %v5503_v63 }
 0x4c4   :  { %1662 = vmatprep.subr.bf16.mxu0 %v5434_v49  ;;  %1703 = vmatprep.subr.bf16.mxu1 %v5506_v42 }
 0x4c7   :  { %1663 = vmatpush1.bf16.msra.mxu0 %v5441_v6  ;;  %1704 = vmatpush1.bf16.msra.mxu1 %v5511_v8 }
 0x4c8   :  { %1664 = vmatprep.subr.bf16.mxu0 %v5446_v23  ;;  %1705 = vmatprep.subr.bf16.mxu1 %v5514_v53 }
 0x4cb   :  { %1665 = vmatpush1.bf16.msra.mxu0 %v6539_v62  ;;  %1706 = vmatpush1.bf16.msra.mxu1 %v6540_v48 }
 0x4cc   :  { %1783 = vmatprep.subr.bf16.mxu0 %v6541_v39  ;;  %1824 = vmatprep.subr.bf16.mxu1 %v6542_v43 }
 0x4ce   :  { %1683 = vmatmul.mubr.bf16.vlgmr.msra.gmra.mrb[36].mxu0 %v1567_v24  ;;  %1724 = vmatmul.mubr.bf16.vlgmr.msra.gmra.mrb[52].mxu1 %v1567_v24  ;;  %v6623_v24 = vld [vmem:[#allocation61_spill] sm:$0xff] }
 0x4cf   :  { %1784 = vmatpush1.bf16.msra.mxu0 %v6543_v33  ;;  %1825 = vmatpush1.bf16.msra.mxu1 %v6544_v31 }
 0x4d0   :  { %1785 = vmatprep.subr.bf16.mxu0 %v6545_v20  ;;  %1826 = vmatprep.subr.bf16.mxu1 %v6546_v41 }
 0x4d1   :  { %1815 = vmatprep.mubr.bf16.mxu0 %v6515_v2  ;;  %1856 = vmatprep.mubr.bf16.mxu1 %v6515_v2 }
 0x4d3   :  { %1786 = vmatpush1.bf16.msra.mxu0 %v6547_v11  ;;  %1827 = vmatpush1.bf16.msra.mxu1 %v6548_v45 }
 0x4d4   :  { %1787 = vmatprep.subr.bf16.mxu0 %v6575_v55  ;;  %1828 = vmatprep.subr.bf16.mxu1 %v6605_v46  ;;  %v6630_v46 = vld [vmem:[#allocation69_spill] sm:$0xff] }
 0x4d7   :  { %1788 = vmatpush1.bf16.msra.mxu0 %v6606_v28  ;;  %1829 = vmatpush1.bf16.msra.mxu1 %v6607_v14 }
 0x4d8   :  { %1789 = vmatprep.subr.bf16.mxu0 %v6608_v32  ;;  %1830 = vmatprep.subr.bf16.mxu1 %v6609_v21 }
 0x4db   :  { %1790 = vmatpush1.bf16.msra.mxu0 %v6610_v29  ;;  %1831 = vmatpush1.bf16.msra.mxu1 %v6611_v37 }
 0x4dc   :  { %1791 = vmatprep.subr.bf16.mxu0 %v6612_v54  ;;  %1832 = vmatprep.subr.bf16.mxu1 %v6613_v17  ;;  %v6624_v17 = vld [vmem:[#allocation46_spill] sm:$0xff] }
 0x4df   :  { %1792 = vmatpush1.bf16.msra.mxu0 %v6614_v47  ;;  %1833 = vmatpush1.bf16.msra.mxu1 %v6615_v5  ;;  %v6625_v47 = vld [vmem:[#allocation62_spill] sm:$0xff]  ;;  %v6626_v5 = vld [vmem:[#allocation47_spill] sm:$0xff] }
 0x4e0   :  { %1793 = vmatprep.subr.bf16.mxu0 %v6616_v40  ;;  %1834 = vmatprep.subr.bf16.mxu1 %v6617_v12  ;;  %v6627_v40 = vld [vmem:[#allocation63_spill] sm:$0xff]  ;;  %v6628_v12 = vld [vmem:[#allocation48_spill] sm:$0xff] }
 0x4e3   :  { %1794 = vmatpush1.bf16.msra.mxu0 %v6618_v38  ;;  %1835 = vmatpush1.bf16.msra.mxu1 %v6619_v57  ;;  %v6629_v38 = vld [vmem:[#allocation65_spill] sm:$0xff] }
 0x4e4   :  { %1795 = vmatprep.subr.bf16.mxu0 %v6620_v51  ;;  %1836 = vmatprep.subr.bf16.mxu1 %v6621_v34 }
 0x4e7   :  { %1796 = vmatpush1.bf16.msra.mxu0 %v6622_v0  ;;  %1837 = vmatpush1.bf16.msra.mxu1 %v6623_v24 }
 0x4e8   :  { %1797 = vmatprep.subr.bf16.mxu0 %v6624_v17  ;;  %1838 = vmatprep.subr.bf16.mxu1 %v6625_v47 }
 0x4eb   :  { %1798 = vmatpush1.bf16.msra.mxu0 %v6626_v5  ;;  %1839 = vmatpush1.bf16.msra.mxu1 %v6627_v40 }
 0x4ec   :  { %1865 = vmatprep.subr.bf16.mxu0 %v6628_v12  ;;  %1906 = vmatprep.subr.bf16.mxu1 %v6629_v38 }
 0x581   :  { %v1602_v57 = vpop.f32.mrb[32].mxu0  ;;  %v1643_v51 = vpop.f32.mrb[48].mxu1 }
 0x582   :  { %v1604_v54 = vpop.f32.mrb[33].mxu0  ;;  %v1645_v34 = vpop.f32.mrb[49].mxu1 }
 0x583   :  { %v1606_v37 = vpop.f32.mrb[34].mxu0  ;;  %v1647_v0 = vpop.f32.mrb[50].mxu1 }
 0x584   :  { %v1607_v29 = vpop.f32.mrb[35].mxu0  ;;  %v1648_v24 = vpop.f32.mrb[51].mxu1 }
 0x5a1   :  { %v1684_v21 = vpop.f32.mrb[36].mxu0  ;;  %v1725_v17 = vpop.f32.mrb[52].mxu1 }
 0x5a2   :  { %v1732_v47 = vsel %vm953_vm5, %v1602_v57, %v1684_v21  ;;  %v1734_v40 = vsel %vm953_vm5, %v1643_v51, %v1725_v17  ;;  %v1686_v5 = vpop.f32.mrb[37].mxu0  ;;  %v1727_v12 = vpop.f32.mrb[53].mxu1 }
 0x5a3   :  { %v1740_v32 = vrot.slane %v1732_v47, 4  ;;  %v1733_v38 = vsel %vm953_vm5, %v1604_v54, %v1686_v5  ;;  %v1735_v37 = vsel %vm953_vm5, %v1645_v34, %v1727_v12  ;;  %v1688_v0 = vpop.f32.mrb[38].mxu0  ;;  %v1729_v29 = vpop.f32.mrb[54].mxu1  ;;  %v1742_v54 = vrot.slane %v1734_v40, 4 }
 0x5a4   :  { %v1741_v24 = vrot.slane %v1733_v38, 4  ;;  %v1689_v14 = vpop.f32.mrb[39].mxu0  ;;  %v1730_v28 = vpop.f32.mrb[55].mxu1  ;;  %v1743_v51 = vrot.slane %v1735_v37, 4 }
 0x5a5   :  { %v1748_v55 = vadd.f32 %v1740_v32, %v6630_v46  ;;  %v1750_v12 = vadd.f32 %v1742_v54, %v6604_v19  ;;  %v1772_v14 = vrot.slane %v5845_v16, 4  ;;  %v6631_v16 = vld [vmem:[#allocation35_spill] sm:$0xff]  ;;  %v6634_v54 = vld [vmem:[#allocation53_spill] sm:$0xff] }
 0x5a6   :  { %v1749_v21 = vadd.f32 %v1741_v24, %v6602_v30  ;;  %v1751_v47 = vadd.f32 %v1743_v51, %v6603_v9  ;;  %v6632_v51 = vld [vmem:[#allocation52_spill] sm:$0xff] }
 0x5a7   :  { %v3836_v57 = vmul.f32 -1.442695, %v1748_v55 }
 0x5a8   :  { %v3837_v17 = vmul.f32 -1.442695, %v1749_v21  ;;  %v3838_v5 = vmul.f32 -1.442695, %v1751_v47  ;;  %v6633_v47 = vld [vmem:[#allocation36_spill] sm:$0xff] }
 0x5a9   :  { %4549 = vpow2.f32 %v3836_v57 }
 0x5aa   :  { %4551 = vpow2.f32 %v3837_v17 }
 0x5ab   :  { %4553 = vpow2.f32 %v3838_v5  ;;  %v6635_v5 = vld [vmem:[#allocation37_spill] sm:$0xff] }
 0x5ac   :  { %4555 = vtanh.f32 %v1750_v12  ;;  %v6636_v12 = vld [vmem:[#allocation54_spill] sm:$0xff] }
 0x5b3   :  { %v4550_v34 = vpop.eup %4549 }
 0x5b4   :  { %v4552_v0 = vpop.eup %4551  ;;  %v1755_v38 = vadd.f32 1.0, %v4550_v34  ;;  %v6637_v34 = vld [vmem:[#allocation38_spill] sm:$0xff] }
 0x5b5   :  { %v1761_v28 = vadd.f32 1.0, %v4552_v0  ;;  %v4554_v30 = vpop.eup %4553  ;;  %v6638_v0 = vld [vmem:[#allocation55_spill] sm:$0xff] }
 0x5b6   :  { %4557 = vrcp.f32 %v1755_v38  ;;  %v4556_v55 = vpop.eup %4555  ;;  %v1768_v9 = vadd.f32 1.0, %v4554_v30  ;;  %v6639_v38 = vld [vmem:[#allocation39_spill] sm:$0xff]  ;;  %v6641_v30 = vld [vmem:[#allocation40_spill] sm:$0xff] }
 0x5b7   :  { %4559 = vrcp.f32 %v1761_v28  ;;  %v6640_v28 = vld [vmem:[#allocation56_spill] sm:$0xff] }
 0x5b8   :  { %4561 = vrcp.f32 %v1768_v9  ;;  %v6647_v9 = vld [vmem:[#allocation44_spill] sm:$0xff] }
 0x5c0   :  { %v4558_v46 = vpop.eup %4557 }
 0x5c1   :  { %v4560_v32 = vpop.eup %4559  ;;  %v1775_v37 = vmul.f32 %v4558_v46, %v4556_v55  ;;  %v6642_v55 = vld [vmem:[#allocation57_spill] sm:$0xff] }
 0x5c2   :  { %v1774_v40 = vmul.f32 %v4560_v32, %v1772_v14  ;;  %v4562_v19 = vpop.eup %4561  ;;  %v6643_v46 = vld [vmem:[#allocation41_spill] sm:$0xff]  ;;  %v6644_v14 = vld [vmem:[#allocation58_spill] sm:$0xff] }
 0x5c3   :  { %v6645_v32 = vld [vmem:[#allocation42_spill] sm:$0xff] }
 0x5c4   :  { %v5929_v29 = vadd.f32 %v1775_v37, %v1774_v40  ;;  %v6646_v37 = vld [vmem:[#allocation59_spill] sm:$0xff]  ;;  %v6648_v40 = vld [vmem:[#allocation60_spill] sm:$0xff] }
 0x5c6   :  { %4563 = vtanh.f32 %v5929_v29 }
 0x5d0   :  { %v4564_v24 = vpop.eup %4563 }
 0x5d1   :  { %v1778_v21 = vmul.f32 %v4564_v24, %v4562_v19  ;;  %v6649_v19 = vld [vmem:[#allocation45_spill] sm:$0xff] }
 0x5d2   :  { %v6650_v24 = vld [vmem:[#allocation61_spill] sm:$0xff] }
 0x5d3   :  { %v1779_v57 = vpack.c.bf16 %v1778_v21, %v1778_v21  ;;  %v6651_v21 = vld [vmem:[#allocation46_spill] sm:$0xff] }
 0x5d5   :  { %v1781_v17 = vrot.slane %v1779_v57, 2  ;;  %v6652_v57 = vld [vmem:[#allocation62_spill] sm:$0xff] }
 0x5d7   :  { %1816 = vmatmul.mubr.bf16.vlgmr.msra.gmra.mrb[40].mxu0 %v1781_v17  ;;  %1857 = vmatmul.mubr.bf16.vlgmr.msra.gmra.mrb[56].mxu1 %v1781_v17 }
 0x5d8   :  { %1866 = vmatpush1.bf16.msra.mxu0 %v5355_v3  ;;  %1907 = vmatpush1.bf16.msra.mxu1 %v5459_v59 }
 0x5d9   :  { %1867 = vmatprep.subr.bf16.mxu0 %v5360_v10  ;;  %1908 = vmatprep.subr.bf16.mxu1 %v5463_v60 }
 0x5da   :  { %1897 = vmatprep.mubr.bf16.mxu0 %v6515_v2  ;;  %1938 = vmatprep.mubr.bf16.mxu1 %v6515_v2 }
 0x5dc   :  { %1868 = vmatpush1.bf16.msra.mxu0 %v5370_v18  ;;  %1909 = vmatpush1.bf16.msra.mxu1 %v5469_v25 }
 0x5dd   :  { %1869 = vmatprep.subr.bf16.mxu0 %v5376_v35  ;;  %1910 = vmatprep.subr.bf16.mxu1 %v5472_v26 }
 0x5e0   :  { %1870 = vmatpush1.bf16.msra.mxu0 %v5387_v36  ;;  %1911 = vmatpush1.bf16.msra.mxu1 %v5479_v58 }
 0x5e1   :  { %1871 = vmatprep.subr.bf16.mxu0 %v5392_v44  ;;  %1912 = vmatprep.subr.bf16.mxu1 %v5482_v4 }
 0x5e4   :  { %1872 = vmatpush1.bf16.msra.mxu0 %v5402_v56  ;;  %1913 = vmatpush1.bf16.msra.mxu1 %v5487_v1 }
 0x5e5   :  { %1873 = vmatprep.subr.bf16.mxu0 %v5407_v61  ;;  %1914 = vmatprep.subr.bf16.mxu1 %v5490_v27 }
 0x5e8   :  { %1874 = vmatpush1.bf16.msra.mxu0 %v5417_v15  ;;  %1915 = vmatpush1.bf16.msra.mxu1 %v5495_v52 }
 0x5e9   :  { %1875 = vmatprep.subr.bf16.mxu0 %v5422_v7  ;;  %1916 = vmatprep.subr.bf16.mxu1 %v5498_v13 }
 0x5ec   :  { %1876 = vmatpush1.bf16.msra.mxu0 %v5429_v50  ;;  %1917 = vmatpush1.bf16.msra.mxu1 %v5503_v63 }
 0x5ed   :  { %1877 = vmatprep.subr.bf16.mxu0 %v5434_v49  ;;  %1918 = vmatprep.subr.bf16.mxu1 %v5506_v42 }
 0x5f0   :  { %1878 = vmatpush1.bf16.msra.mxu0 %v5441_v6  ;;  %1919 = vmatpush1.bf16.msra.mxu1 %v5511_v8 }
 0x5f1   :  { %1879 = vmatprep.subr.bf16.mxu0 %v5446_v23  ;;  %1920 = vmatprep.subr.bf16.mxu1 %v5514_v53 }
 0x5f4   :  { %1880 = vmatpush1.bf16.msra.mxu0 %v6539_v62  ;;  %1921 = vmatpush1.bf16.msra.mxu1 %v6540_v48 }
 0x5f5   :  { %1983 = vmatprep.subr.bf16.mxu0 %v6541_v39  ;;  %2024 = vmatprep.subr.bf16.mxu1 %v6542_v43 }
 0x5f7   :  { %1898 = vmatmul.mubr.bf16.vlgmr.msra.gmra.mrb[44].mxu0 %v1781_v17  ;;  %1939 = vmatmul.mubr.bf16.vlgmr.msra.gmra.mrb[60].mxu1 %v1781_v17  ;;  %v6653_v17 = vld [vmem:[#allocation47_spill] sm:$0xff] }
 0x5f8   :  { %1984 = vmatpush1.bf16.msra.mxu0 %v6543_v33  ;;  %2025 = vmatpush1.bf16.msra.mxu1 %v6544_v31 }
 0x5f9   :  { %1985 = vmatprep.subr.bf16.mxu0 %v6545_v20  ;;  %2026 = vmatprep.subr.bf16.mxu1 %v6546_v41 }
 0x5fa   :  { %2015 = vmatprep.mubr.bf16.mxu0 %v6515_v2  ;;  %2056 = vmatprep.mubr.bf16.mxu1 %v6515_v2 }
 0x5fc   :  { %1986 = vmatpush1.bf16.msra.mxu0 %v6547_v11  ;;  %2027 = vmatpush1.bf16.msra.mxu1 %v6548_v45 }
 0x5fd   :  { %1987 = vmatprep.subr.bf16.mxu0 %v6631_v16  ;;  %2028 = vmatprep.subr.bf16.mxu1 %v6632_v51 }
 0x600   :  { %1988 = vmatpush1.bf16.msra.mxu0 %v6633_v47  ;;  %2029 = vmatpush1.bf16.msra.mxu1 %v6634_v54 }
 0x601   :  { %1989 = vmatprep.subr.bf16.mxu0 %v6635_v5  ;;  %2030 = vmatprep.subr.bf16.mxu1 %v6636_v12 }
 0x604   :  { %1990 = vmatpush1.bf16.msra.mxu0 %v6637_v34  ;;  %2031 = vmatpush1.bf16.msra.mxu1 %v6638_v0  ;;  %v6657_v0 = vld [vmem:[#allocation71_spill] sm:$0xff] }
 0x605   :  { %1991 = vmatprep.subr.bf16.mxu0 %v6639_v38  ;;  %2032 = vmatprep.subr.bf16.mxu1 %v6640_v28 }
 0x608   :  { %1992 = vmatpush1.bf16.msra.mxu0 %v6641_v30  ;;  %2033 = vmatpush1.bf16.msra.mxu1 %v6642_v55 }
 0x609   :  { %1993 = vmatprep.subr.bf16.mxu0 %v6643_v46  ;;  %2034 = vmatprep.subr.bf16.mxu1 %v6644_v14  ;;  %v6654_v46 = vld [vmem:[#allocation63_spill] sm:$0xff]  ;;  %v6655_v14 = vld [vmem:[#allocation48_spill] sm:$0xff] }
 0x60c   :  { %1994 = vmatpush1.bf16.msra.mxu0 %v6645_v32  ;;  %2035 = vmatpush1.bf16.msra.mxu1 %v6646_v37  ;;  %v6656_v32 = vld [vmem:[#allocation65_spill] sm:$0xff] }
 0x60d   :  { %1995 = vmatprep.subr.bf16.mxu0 %v6647_v9  ;;  %2036 = vmatprep.subr.bf16.mxu1 %v6648_v40 }
 0x610   :  { %1996 = vmatpush1.bf16.msra.mxu0 %v6649_v19  ;;  %2037 = vmatpush1.bf16.msra.mxu1 %v6650_v24 }
 0x611   :  { %1997 = vmatprep.subr.bf16.mxu0 %v6651_v21  ;;  %2038 = vmatprep.subr.bf16.mxu1 %v6652_v57 }
 0x614   :  { %1998 = vmatpush1.bf16.msra.mxu0 %v6653_v17  ;;  %2039 = vmatpush1.bf16.msra.mxu1 %v6654_v46 }
 0x615   :  { %2065 = vmatprep.subr.bf16.mxu0 %v6655_v14  ;;  %2106 = vmatprep.subr.bf16.mxu1 %v6656_v32 }
 0x6aa   :  { %v1817_v37 = vpop.f32.mrb[40].mxu0  ;;  %v1858_v9 = vpop.f32.mrb[56].mxu1 }
 0x6ab   :  { %v1819_v55 = vpop.f32.mrb[41].mxu0  ;;  %v1860_v40 = vpop.f32.mrb[57].mxu1 }
 0x6ac   :  { %v1821_v30 = vpop.f32.mrb[42].mxu0  ;;  %v1862_v19 = vpop.f32.mrb[58].mxu1 }
 0x6ad   :  { %v1822_v28 = vpop.f32.mrb[43].mxu0  ;;  %v1863_v24 = vpop.f32.mrb[59].mxu1 }
 0x6ae   :  { %v6658_v24 = vld [vmem:[#allocation72_spill] sm:$0xff] }
 0x6ca   :  { %v1899_v38 = vpop.f32.mrb[44].mxu0  ;;  %v1940_v21 = vpop.f32.mrb[60].mxu1 }
 0x6cb   :  { %v1947_v57 = vsel %vm953_vm5, %v1817_v37, %v1899_v38  ;;  %v1949_v46 = vsel %vm953_vm5, %v1858_v9, %v1940_v21  ;;  %v1901_v17 = vpop.f32.mrb[45].mxu0  ;;  %v1942_v14 = vpop.f32.mrb[61].mxu1  ;;  %v6659_v9 = vld [vmem:[#allocation78_spill] sm:$0xff] }
 0x6cc   :  { %v1951_v32 = vadd.f32 %v1947_v57, %v6657_v0  ;;  %v1948_v34 = vsel %vm953_vm5, %v1819_v55, %v1901_v17  ;;  %v1950_v30 = vsel %vm953_vm5, %v1860_v40, %v1942_v14  ;;  %v1903_v28 = vpop.f32.mrb[46].mxu0  ;;  %v1944_v19 = vpop.f32.mrb[62].mxu1  ;;  %v6660_v57 = vld [vmem:[#allocation77_spill] sm:$0xff] }
 0x6cd   :  { %v1952_v12 = vadd.f32 %v1948_v34, %v6658_v24  ;;  %v1904_v5 = vpop.f32.mrb[47].mxu0  ;;  %v1945_v54 = vpop.f32.mrb[63].mxu1  ;;  %v1954_v21 = vadd.f32 %v1950_v30, %v6659_v9  ;;  %v1953_v0 = vadd.f32 %v1949_v46, %v6660_v57 }
 0x6ce   :  { %v3839_v38 = vmul.f32 -1.442695, %v1951_v32 }
 0x6cf   :  { %v3840_v37 = vmul.f32 -1.442695, %v1952_v12  ;;  %v3841_v47 = vmul.f32 -1.442695, %v1954_v21  ;;  %v1975_v12 = vrot.slane %v5929_v29, 4  ;;  %v6661_v29 = vld [vmem:[#allocation52_spill] sm:$0xff] }
 0x6d0   :  { %4565 = vpow2.f32 %v3839_v38  ;;  %v6662_v38 = vld [vmem:[#allocation36_spill] sm:$0xff]  ;;  %v6664_v21 = vld [vmem:[#allocation37_spill] sm:$0xff] }
 0x6d1   :  { %4567 = vpow2.f32 %v3840_v37  ;;  %v6663_v37 = vld [vmem:[#allocation53_spill] sm:$0xff] }
 0x6d2   :  { %4569 = vpow2.f32 %v3841_v47 }
 0x6d3   :  { %4571 = vtanh.f32 %v1953_v0 }
 0x6da   :  { %v4566_v51 = vpop.eup %4565 }
 0x6db   :  { %v4568_v55 = vpop.eup %4567  ;;  %v1958_v17 = vadd.f32 1.0, %v4566_v51 }
 0x6dc   :  { %v1964_v14 = vadd.f32 1.0, %v4568_v55  ;;  %v4570_v34 = vpop.eup %4569  ;;  %v6665_v55 = vld [vmem:[#allocation54_spill] sm:$0xff] }
 0x6dd   :  { %4573 = vrcp.f32 %v1958_v17  ;;  %v4572_v5 = vpop.eup %4571  ;;  %v1971_v28 = vadd.f32 1.0, %v4570_v34  ;;  %v6666_v17 = vld [vmem:[#allocation38_spill] sm:$0xff]  ;;  %v6668_v34 = vld [vmem:[#allocation39_spill] sm:$0xff] }
 0x6de   :  { %4575 = vrcp.f32 %v1964_v14  ;;  %v6667_v14 = vld [vmem:[#allocation55_spill] sm:$0xff] }
 0x6df   :  { %4577 = vrcp.f32 %v1971_v28  ;;  %v6674_v28 = vld [vmem:[#allocation42_spill] sm:$0xff] }
 0x6e7   :  { %v4574_v54 = vpop.eup %4573 }
 0x6e8   :  { %v4576_v32 = vpop.eup %4575  ;;  %v1978_v40 = vmul.f32 %v4574_v54, %v4572_v5  ;;  %v6669_v5 = vld [vmem:[#allocation56_spill] sm:$0xff] }
 0x6e9   :  { %v1977_v30 = vmul.f32 %v4576_v32, %v1975_v12  ;;  %v4578_v51 = vpop.eup %4577  ;;  %v6670_v54 = vld [vmem:[#allocation40_spill] sm:$0xff]  ;;  %v6671_v12 = vld [vmem:[#allocation57_spill] sm:$0xff] }
 0x6ea   :  { %v6672_v32 = vld [vmem:[#allocation41_spill] sm:$0xff] }
 0x6eb   :  { %v6013_v19 = vadd.f32 %v1978_v40, %v1977_v30  ;;  %v6673_v40 = vld [vmem:[#allocation58_spill] sm:$0xff]  ;;  %v6675_v30 = vld [vmem:[#allocation59_spill] sm:$0xff] }
 0x6ed   :  { %4579 = vtanh.f32 %v6013_v19 }
 0x6f7   :  { %v4580_v47 = vpop.eup %4579 }
 0x6f8   :  { %v1981_v0 = vmul.f32 %v4580_v47, %v4578_v51  ;;  %v6676_v51 = vld [vmem:[#allocation44_spill] sm:$0xff] }
 0x6f9   :  { %v6677_v47 = vld [vmem:[#allocation60_spill] sm:$0xff] }
 0x6fa   :  { %v1982_v46 = vpack.c.bf16 %v1981_v0, %v1981_v0  ;;  %v6678_v0 = vld [vmem:[#allocation45_spill] sm:$0xff] }
 0x6fc   :  { %2016 = vmatmul.mubr.bf16.vlgmr.msra.gmra.mrb[48].mxu0 %v1982_v46  ;;  %2057 = vmatmul.mubr.bf16.vlgmr.msra.gmra.mrb[64].mxu1 %v1982_v46 }
 0x6fd   :  { %2066 = vmatpush1.bf16.msra.mxu0 %v5355_v3  ;;  %2107 = vmatpush1.bf16.msra.mxu1 %v5459_v59 }
 0x6fe   :  { %2067 = vmatprep.subr.bf16.mxu0 %v5360_v10  ;;  %2108 = vmatprep.subr.bf16.mxu1 %v5463_v60 }
 0x6ff   :  { %2097 = vmatprep.mubr.bf16.mxu0 %v6515_v2  ;;  %2138 = vmatprep.mubr.bf16.mxu1 %v6515_v2 }
 0x701   :  { %2068 = vmatpush1.bf16.msra.mxu0 %v5370_v18  ;;  %2109 = vmatpush1.bf16.msra.mxu1 %v5469_v25 }
 0x702   :  { %2069 = vmatprep.subr.bf16.mxu0 %v5376_v35  ;;  %2110 = vmatprep.subr.bf16.mxu1 %v5472_v26 }
 0x705   :  { %2070 = vmatpush1.bf16.msra.mxu0 %v5387_v36  ;;  %2111 = vmatpush1.bf16.msra.mxu1 %v5479_v58 }
 0x706   :  { %2071 = vmatprep.subr.bf16.mxu0 %v5392_v44  ;;  %2112 = vmatprep.subr.bf16.mxu1 %v5482_v4 }
 0x709   :  { %2072 = vmatpush1.bf16.msra.mxu0 %v5402_v56  ;;  %2113 = vmatpush1.bf16.msra.mxu1 %v5487_v1 }
 0x70a   :  { %2073 = vmatprep.subr.bf16.mxu0 %v5407_v61  ;;  %2114 = vmatprep.subr.bf16.mxu1 %v5490_v27 }
 0x70d   :  { %2074 = vmatpush1.bf16.msra.mxu0 %v5417_v15  ;;  %2115 = vmatpush1.bf16.msra.mxu1 %v5495_v52 }
 0x70e   :  { %2075 = vmatprep.subr.bf16.mxu0 %v5422_v7  ;;  %2116 = vmatprep.subr.bf16.mxu1 %v5498_v13 }
 0x711   :  { %2076 = vmatpush1.bf16.msra.mxu0 %v5429_v50  ;;  %2117 = vmatpush1.bf16.msra.mxu1 %v5503_v63 }
 0x712   :  { %2077 = vmatprep.subr.bf16.mxu0 %v5434_v49  ;;  %2118 = vmatprep.subr.bf16.mxu1 %v5506_v42 }
 0x715   :  { %2078 = vmatpush1.bf16.msra.mxu0 %v5441_v6  ;;  %2119 = vmatpush1.bf16.msra.mxu1 %v5511_v8 }
 0x716   :  { %2079 = vmatprep.subr.bf16.mxu0 %v5446_v23  ;;  %2120 = vmatprep.subr.bf16.mxu1 %v5514_v53 }
 0x719   :  { %2080 = vmatpush1.bf16.msra.mxu0 %v6539_v62  ;;  %2121 = vmatpush1.bf16.msra.mxu1 %v6540_v48 }
 0x71a   :  { %2198 = vmatprep.subr.bf16.mxu0 %v6541_v39  ;;  %2239 = vmatprep.subr.bf16.mxu1 %v6542_v43 }
 0x71c   :  { %2098 = vmatmul.mubr.bf16.vlgmr.msra.gmra.mrb[52].mxu0 %v1982_v46  ;;  %2139 = vmatmul.mubr.bf16.vlgmr.msra.gmra.mrb[68].mxu1 %v1982_v46  ;;  %v6679_v46 = vld [vmem:[#allocation61_spill] sm:$0xff] }
 0x71d   :  { %2199 = vmatpush1.bf16.msra.mxu0 %v6543_v33  ;;  %2240 = vmatpush1.bf16.msra.mxu1 %v6544_v31 }
 0x71e   :  { %2200 = vmatprep.subr.bf16.mxu0 %v6545_v20  ;;  %2241 = vmatprep.subr.bf16.mxu1 %v6546_v41 }
 0x71f   :  { %2230 = vmatprep.mubr.bf16.mxu0 %v6515_v2  ;;  %2271 = vmatprep.mubr.bf16.mxu1 %v6515_v2 }
 0x721   :  { %2201 = vmatpush1.bf16.msra.mxu0 %v6547_v11  ;;  %2242 = vmatpush1.bf16.msra.mxu1 %v6548_v45 }
 0x722   :  { %2202 = vmatprep.subr.bf16.mxu0 %v6631_v16  ;;  %2243 = vmatprep.subr.bf16.mxu1 %v6661_v29  ;;  %v6686_v29 = vld [vmem:[#allocation71_spill] sm:$0xff] }
 0x725   :  { %2203 = vmatpush1.bf16.msra.mxu0 %v6662_v38  ;;  %2244 = vmatpush1.bf16.msra.mxu1 %v6663_v37 }
 0x726   :  { %2204 = vmatprep.subr.bf16.mxu0 %v6664_v21  ;;  %2245 = vmatprep.subr.bf16.mxu1 %v6665_v55 }
 0x729   :  { %2205 = vmatpush1.bf16.msra.mxu0 %v6666_v17  ;;  %2246 = vmatpush1.bf16.msra.mxu1 %v6667_v14 }
 0x72a   :  { %2206 = vmatprep.subr.bf16.mxu0 %v6668_v34  ;;  %2247 = vmatprep.subr.bf16.mxu1 %v6669_v5  ;;  %v6680_v5 = vld [vmem:[#allocation46_spill] sm:$0xff] }
 0x72d   :  { %2207 = vmatpush1.bf16.msra.mxu0 %v6670_v54  ;;  %2248 = vmatpush1.bf16.msra.mxu1 %v6671_v12  ;;  %v6681_v54 = vld [vmem:[#allocation62_spill] sm:$0xff]  ;;  %v6682_v12 = vld [vmem:[#allocation47_spill] sm:$0xff] }
 0x72e   :  { %2208 = vmatprep.subr.bf16.mxu0 %v6672_v32  ;;  %2249 = vmatprep.subr.bf16.mxu1 %v6673_v40  ;;  %v6683_v32 = vld [vmem:[#allocation63_spill] sm:$0xff]  ;;  %v6684_v40 = vld [vmem:[#allocation48_spill] sm:$0xff] }
 0x731   :  { %2209 = vmatpush1.bf16.msra.mxu0 %v6674_v28  ;;  %2250 = vmatpush1.bf16.msra.mxu1 %v6675_v30  ;;  %v6685_v28 = vld [vmem:[#allocation65_spill] sm:$0xff] }
 0x732   :  { %2210 = vmatprep.subr.bf16.mxu0 %v6676_v51  ;;  %2251 = vmatprep.subr.bf16.mxu1 %v6677_v47 }
 0x735   :  { %2211 = vmatpush1.bf16.msra.mxu0 %v6678_v0  ;;  %2252 = vmatpush1.bf16.msra.mxu1 %v6679_v46 }
 0x736   :  { %2212 = vmatprep.subr.bf16.mxu0 %v6680_v5  ;;  %2253 = vmatprep.subr.bf16.mxu1 %v6681_v54 }
 0x739   :  { %2213 = vmatpush1.bf16.msra.mxu0 %v6682_v12  ;;  %2254 = vmatpush1.bf16.msra.mxu1 %v6683_v32 }
 0x73a   :  { %2280 = vmatprep.subr.bf16.mxu0 %v6684_v40  ;;  %2321 = vmatprep.subr.bf16.mxu1 %v6685_v28 }
 0x7cf   :  { %v2017_v30 = vpop.f32.mrb[48].mxu0  ;;  %v2058_v51 = vpop.f32.mrb[64].mxu1 }
 0x7d0   :  { %v2019_v34 = vpop.f32.mrb[49].mxu0  ;;  %v2060_v47 = vpop.f32.mrb[65].mxu1 }
 0x7d1   :  { %v2021_v14 = vpop.f32.mrb[50].mxu0  ;;  %v2062_v0 = vpop.f32.mrb[66].mxu1 }
 0x7d2   :  { %v2022_v17 = vpop.f32.mrb[51].mxu0  ;;  %v2063_v46 = vpop.f32.mrb[67].mxu1 }
 0x7ef   :  { %v2099_v55 = vpop.f32.mrb[52].mxu0  ;;  %v2140_v5 = vpop.f32.mrb[68].mxu1 }
 0x7f0   :  { %v2147_v54 = vsel %vm953_vm5, %v2017_v30, %v2099_v55  ;;  %v2149_v32 = vsel %vm953_vm5, %v2058_v51, %v2140_v5  ;;  %v2101_v12 = vpop.f32.mrb[53].mxu0  ;;  %v2142_v40 = vpop.f32.mrb[69].mxu1 }
 0x7f1   :  { %v2155_v21 = vrot.slane %v2147_v54, 4  ;;  %v2148_v28 = vsel %vm953_vm5, %v2019_v34, %v2101_v12  ;;  %v2150_v14 = vsel %vm953_vm5, %v2060_v47, %v2142_v40  ;;  %v2103_v0 = vpop.f32.mrb[54].mxu0  ;;  %v2144_v17 = vpop.f32.mrb[70].mxu1  ;;  %v2157_v34 = vrot.slane %v2149_v32, 4 }
 0x7f2   :  { %v2156_v46 = vrot.slane %v2148_v28, 4  ;;  %v2104_v37 = vpop.f32.mrb[55].mxu0  ;;  %v2145_v38 = vpop.f32.mrb[71].mxu1  ;;  %v2158_v51 = vrot.slane %v2150_v14, 4 }
 0x7f3   :  { %v2163_v16 = vadd.f32 %v2155_v21, %v6686_v29  ;;  %v2165_v40 = vadd.f32 %v2157_v34, %v6660_v57  ;;  %v2187_v37 = vrot.slane %v6013_v19, 4  ;;  %v6689_v19 = vld [vmem:[#allocation36_spill] sm:$0xff]  ;;  %v6698_v34 = vld [vmem:[#allocation57_spill] sm:$0xff] }
 0x7f4   :  { %v2164_v55 = vadd.f32 %v2156_v46, %v6658_v24  ;;  %v2166_v54 = vadd.f32 %v2158_v51, %v6659_v9  ;;  %v6694_v51 = vld [vmem:[#allocation55_spill] sm:$0xff] }
 0x7f5   :  { %v3842_v30 = vmul.f32 -1.442695, %v2163_v16 }
 0x7f6   :  { %v3843_v5 = vmul.f32 -1.442695, %v2164_v55  ;;  %v3844_v12 = vmul.f32 -1.442695, %v2166_v54  ;;  %v6695_v54 = vld [vmem:[#allocation39_spill] sm:$0xff] }
 0x7f7   :  { %4581 = vpow2.f32 %v3842_v30 }
 0x7f8   :  { %4583 = vpow2.f32 %v3843_v5 }
 0x7f9   :  { %4585 = vpow2.f32 %v3844_v12  ;;  %v6699_v12 = vld [vmem:[#allocation41_spill] sm:$0xff] }
 0x7fa   :  { %4587 = vtanh.f32 %v2165_v40  ;;  %v6700_v40 = vld [vmem:[#allocation58_spill] sm:$0xff] }
 0x801   :  { %v4582_v47 = vpop.eup %4581 }
 0x802   :  { %v4584_v0 = vpop.eup %4583  ;;  %v2170_v28 = vadd.f32 1.0, %v4582_v47  ;;  %v6701_v47 = vld [vmem:[#allocation42_spill] sm:$0xff] }
 0x803   :  { %v2176_v38 = vadd.f32 1.0, %v4584_v0  ;;  %v4586_v24 = vpop.eup %4585  ;;  %v6702_v0 = vld [vmem:[#allocation59_spill] sm:$0xff] }
 0x804   :  { %4589 = vrcp.f32 %v2170_v28  ;;  %v4588_v16 = vpop.eup %4587  ;;  %v2183_v9 = vadd.f32 1.0, %v4586_v24  ;;  %v6703_v28 = vld [vmem:[#allocation44_spill] sm:$0xff]  ;;  %v6705_v24 = vld [vmem:[#allocation45_spill] sm:$0xff] }
 0x805   :  { %4591 = vrcp.f32 %v2176_v38  ;;  %v6704_v38 = vld [vmem:[#allocation60_spill] sm:$0xff] }
 0x806   :  { %4593 = vrcp.f32 %v2183_v9  ;;  %v6711_v9 = vld [vmem:[#allocation48_spill] sm:$0xff] }
 0x80e   :  { %v4590_v29 = vpop.eup %4589 }
 0x80f   :  { %v4592_v21 = vpop.eup %4591  ;;  %v2190_v14 = vmul.f32 %v4590_v29, %v4588_v16  ;;  %v6706_v16 = vld [vmem:[#allocation61_spill] sm:$0xff]  ;;  %v6707_v29 = vld [vmem:[#allocation46_spill] sm:$0xff] }
 0x810   :  { %v2189_v32 = vmul.f32 %v4592_v21, %v2187_v37  ;;  %v4594_v57 = vpop.eup %4593  ;;  %v6708_v37 = vld [vmem:[#allocation62_spill] sm:$0xff]  ;;  %v6709_v21 = vld [vmem:[#allocation47_spill] sm:$0xff] }
 0x812   :  { %v6097_v17 = vadd.f32 %v2190_v14, %v2189_v32  ;;  %v6710_v14 = vld [vmem:[#allocation63_spill] sm:$0xff]  ;;  %v6712_v32 = vld [vmem:[#allocation65_spill] sm:$0xff] }
 0x814   :  { %4595 = vtanh.f32 %v6097_v17 }
 0x81e   :  { %v4596_v46 = vpop.eup %4595 }
 0x81f   :  { %v2193_v55 = vmul.f32 %v4596_v46, %v4594_v57 }
 0x821   :  { %v2194_v30 = vpack.c.bf16 %v2193_v55, %v2193_v55 }
 0x823   :  { %v2196_v5 = vrot.slane %v2194_v30, 2 }
 0x825   :  { %2231 = vmatmul.mubr.bf16.vlgmr.msra.gmra.mrb[56].mxu0 %v2196_v5  ;;  %2272 = vmatmul.mubr.bf16.vlgmr.msra.gmra.mrb[72].mxu1 %v2196_v5 }
 0x826   :  { %2281 = vmatpush1.bf16.msra.mxu0 %v5355_v3  ;;  %2322 = vmatpush1.bf16.msra.mxu1 %v5459_v59 }
 0x827   :  { %2282 = vmatprep.subr.bf16.mxu0 %v5360_v10  ;;  %2323 = vmatprep.subr.bf16.mxu1 %v5463_v60 }
 0x828   :  { %2312 = vmatprep.mubr.bf16.mxu0 %v6515_v2  ;;  %2353 = vmatprep.mubr.bf16.mxu1 %v6515_v2 }
 0x82a   :  { %2283 = vmatpush1.bf16.msra.mxu0 %v5370_v18  ;;  %2324 = vmatpush1.bf16.msra.mxu1 %v5469_v25 }
 0x82b   :  { %2284 = vmatprep.subr.bf16.mxu0 %v5376_v35  ;;  %2325 = vmatprep.subr.bf16.mxu1 %v5472_v26 }
 0x82e   :  { %2285 = vmatpush1.bf16.msra.mxu0 %v5387_v36  ;;  %2326 = vmatpush1.bf16.msra.mxu1 %v5479_v58 }
 0x82f   :  { %2286 = vmatprep.subr.bf16.mxu0 %v5392_v44  ;;  %2327 = vmatprep.subr.bf16.mxu1 %v5482_v4 }
 0x832   :  { %2287 = vmatpush1.bf16.msra.mxu0 %v5402_v56  ;;  %2328 = vmatpush1.bf16.msra.mxu1 %v5487_v1 }
 0x833   :  { %2288 = vmatprep.subr.bf16.mxu0 %v5407_v61  ;;  %2329 = vmatprep.subr.bf16.mxu1 %v5490_v27 }
 0x836   :  { %2289 = vmatpush1.bf16.msra.mxu0 %v5417_v15  ;;  %2330 = vmatpush1.bf16.msra.mxu1 %v5495_v52 }
 0x837   :  { %2290 = vmatprep.subr.bf16.mxu0 %v5422_v7  ;;  %2331 = vmatprep.subr.bf16.mxu1 %v5498_v13 }
 0x83a   :  { %2291 = vmatpush1.bf16.msra.mxu0 %v5429_v50  ;;  %2332 = vmatpush1.bf16.msra.mxu1 %v5503_v63 }
 0x83b   :  { %2292 = vmatprep.subr.bf16.mxu0 %v5434_v49  ;;  %2333 = vmatprep.subr.bf16.mxu1 %v5506_v42 }
 0x83e   :  { %2293 = vmatpush1.bf16.msra.mxu0 %v5441_v6  ;;  %2334 = vmatpush1.bf16.msra.mxu1 %v5511_v8 }
 0x83f   :  { %2294 = vmatprep.subr.bf16.mxu0 %v5446_v23  ;;  %2335 = vmatprep.subr.bf16.mxu1 %v5514_v53 }
 0x842   :  { %2295 = vmatpush1.bf16.msra.mxu0 %v6539_v62  ;;  %2336 = vmatpush1.bf16.msra.mxu1 %v6540_v48 }
 0x843   :  { %2398 = vmatprep.subr.bf16.mxu0 %v6541_v39  ;;  %2439 = vmatprep.subr.bf16.mxu1 %v6542_v43  ;;  %v6687_v39 = vld [vmem:[#allocation35_spill] sm:$0xff]  ;;  %v6688_v43 = vld [vmem:[#allocation52_spill] sm:$0xff] }
 0x845   :  { %2313 = vmatmul.mubr.bf16.vlgmr.msra.gmra.mrb[60].mxu0 %v2196_v5  ;;  %2354 = vmatmul.mubr.bf16.vlgmr.msra.gmra.mrb[76].mxu1 %v2196_v5 }
 0x846   :  { %2399 = vmatpush1.bf16.msra.mxu0 %v6543_v33  ;;  %2440 = vmatpush1.bf16.msra.mxu1 %v6544_v31  ;;  %v6690_v33 = vld [vmem:[#allocation53_spill] sm:$0xff] }
 0x847   :  { %2400 = vmatprep.subr.bf16.mxu0 %v6545_v20  ;;  %2441 = vmatprep.subr.bf16.mxu1 %v6546_v41  ;;  %v6691_v31 = vld [vmem:[#allocation37_spill] sm:$0xff]  ;;  %v6692_v20 = vld [vmem:[#allocation54_spill] sm:$0xff] }
 0x848   :  { %2430 = vmatprep.mubr.bf16.mxu0 %v6515_v2  ;;  %2471 = vmatprep.mubr.bf16.mxu1 %v6515_v2  ;;  %v6693_v41 = vld [vmem:[#allocation38_spill] sm:$0xff] }
 0x84a   :  { %2401 = vmatpush1.bf16.msra.mxu0 %v6547_v11  ;;  %2442 = vmatpush1.bf16.msra.mxu1 %v6548_v45  ;;  %v6696_v11 = vld [vmem:[#allocation56_spill] sm:$0xff] }
 0x84b   :  { %2402 = vmatprep.subr.bf16.mxu0 %v6687_v39  ;;  %2443 = vmatprep.subr.bf16.mxu1 %v6688_v43  ;;  %v6697_v45 = vld [vmem:[#allocation40_spill] sm:$0xff] }
 0x84e   :  { %2403 = vmatpush1.bf16.msra.mxu0 %v6689_v19  ;;  %2444 = vmatpush1.bf16.msra.mxu1 %v6690_v33 }
 0x84f   :  { %2404 = vmatprep.subr.bf16.mxu0 %v6691_v31  ;;  %2445 = vmatprep.subr.bf16.mxu1 %v6692_v20 }
 0x852   :  { %2405 = vmatpush1.bf16.msra.mxu0 %v6693_v41  ;;  %2446 = vmatpush1.bf16.msra.mxu1 %v6694_v51 }
 0x853   :  { %2406 = vmatprep.subr.bf16.mxu0 %v6695_v54  ;;  %2447 = vmatprep.subr.bf16.mxu1 %v6696_v11  ;;  %v6713_v11 = vld [vmem:[#allocation73_spill] sm:$0xff] }
 0x856   :  { %2407 = vmatpush1.bf16.msra.mxu0 %v6697_v45  ;;  %2448 = vmatpush1.bf16.msra.mxu1 %v6698_v34 }
 0x857   :  { %2408 = vmatprep.subr.bf16.mxu0 %v6699_v12  ;;  %2449 = vmatprep.subr.bf16.mxu1 %v6700_v40 }
 0x85a   :  { %2409 = vmatpush1.bf16.msra.mxu0 %v6701_v47  ;;  %2450 = vmatpush1.bf16.msra.mxu1 %v6702_v0  ;;  %v6714_v0 = vld [vmem:[#allocation74_spill] sm:$0xff] }
 0x85b   :  { %2410 = vmatprep.subr.bf16.mxu0 %v6703_v28  ;;  %2451 = vmatprep.subr.bf16.mxu1 %v6704_v38 }
 0x85e   :  { %2411 = vmatpush1.bf16.msra.mxu0 %v6705_v24  ;;  %2452 = vmatpush1.bf16.msra.mxu1 %v6706_v16 }
 0x85f   :  { %2412 = vmatprep.subr.bf16.mxu0 %v6707_v29  ;;  %2453 = vmatprep.subr.bf16.mxu1 %v6708_v37  ;;  %v6715_v37 = vld [vmem:[#allocation80_spill] sm:$0xff] }
 0x862   :  { %2413 = vmatpush1.bf16.msra.mxu0 %v6709_v21  ;;  %2454 = vmatpush1.bf16.msra.mxu1 %v6710_v14 }
 0x863   :  { %2480 = vmatprep.subr.bf16.mxu0 %v6711_v9  ;;  %2521 = vmatprep.subr.bf16.mxu1 %v6712_v32  ;;  %v6716_v9 = vld [vmem:[#allocation79_spill] sm:$0xff] }
 0x8f8   :  { %v2232_v57 = vpop.f32.mrb[56].mxu0  ;;  %v2273_v46 = vpop.f32.mrb[72].mxu1 }
 0x8f9   :  { %v2234_v55 = vpop.f32.mrb[57].mxu0  ;;  %v2275_v30 = vpop.f32.mrb[73].mxu1 }
 0x8fa   :  { %v2236_v5 = vpop.f32.mrb[58].mxu0  ;;  %v2277_v39 = vpop.f32.mrb[74].mxu1 }
 0x8fb   :  { %v2237_v43 = vpop.f32.mrb[59].mxu0  ;;  %v2278_v19 = vpop.f32.mrb[75].mxu1 }
 0x8fc   :  { %v2390_v19 = vrot.slane %v6097_v17, 4 }
 0x918   :  { %v2314_v33 = vpop.f32.mrb[60].mxu0  ;;  %v2355_v31 = vpop.f32.mrb[76].mxu1 }
 0x919   :  { %v2362_v20 = vsel %vm953_vm5, %v2232_v57, %v2314_v33  ;;  %v2364_v41 = vsel %vm953_vm5, %v2273_v46, %v2355_v31  ;;  %v2316_v51 = vpop.f32.mrb[61].mxu0  ;;  %v2357_v54 = vpop.f32.mrb[77].mxu1 }
 0x91a   :  { %v2366_v45 = vadd.f32 %v2362_v20, %v6713_v11  ;;  %v2363_v34 = vsel %vm953_vm5, %v2234_v55, %v2316_v51  ;;  %v2365_v12 = vsel %vm953_vm5, %v2275_v30, %v2357_v54  ;;  %v2318_v40 = vpop.f32.mrb[62].mxu0  ;;  %v2359_v47 = vpop.f32.mrb[78].mxu1  ;;  %v2368_v32 = vadd.f32 %v2364_v41, %v6716_v9 }
 0x91b   :  { %v2367_v28 = vadd.f32 %v2363_v34, %v6714_v0  ;;  %v2319_v38 = vpop.f32.mrb[63].mxu0  ;;  %v2360_v24 = vpop.f32.mrb[79].mxu1  ;;  %v2369_v21 = vadd.f32 %v2365_v12, %v6715_v37  ;;  %v2621_v47 = vld [vmem:[#allocation10 + $0x50] sm:$0xff] }
 0x91c   :  { %v3845_v16 = vmul.f32 -1.442695, %v2366_v45  ;;  %v2639_v38 = vld [vmem:[#allocation10 + $0xe0] sm:$0xff]  ;;  %v2640_v24 = vld [vmem:[#allocation10 + $0xe8] sm:$0xff] }
 0x91d   :  { %v3846_v29 = vmul.f32 -1.442695, %v2367_v28  ;;  %v3847_v14 = vmul.f32 -1.442695, %v2369_v21  ;;  %v2622_v28 = vld [vmem:[#allocation10 + $0x58] sm:$0xff]  ;;  %v2623_v21 = vld [vmem:[#allocation10 + $0x60] sm:$0xff] }
 0x91e   :  { %4597 = vpow2.f32 %v3845_v16  ;;  %v4233_v16 = vpack.c.bf16 %v2622_v28, %v2621_v47 }
 0x91f   :  { %4599 = vpow2.f32 %v3846_v29  ;;  %v4235_v29 = vpack.c.bf16 %v2640_v24, %v2639_v38  ;;  %v3143_v38 = vld [vmem:[#allocation14 + $0x40] sm:$0xff]  ;;  %v3144_v24 = vld [vmem:[#allocation14 + $0x48] sm:$0xff] }
 0x920   :  { %4601 = vpow2.f32 %v3847_v14  ;;  %v2624_v14 = vld [vmem:[#allocation10 + $0x68] sm:$0xff] }
 0x921   :  { %4603 = vtanh.f32 %v2368_v32  ;;  %v2641_v32 = vld [vmem:[#allocation10 + $0xf0] sm:$0xff] }
 0x928   :  { %v4598_v57 = vpop.eup %4597 }
 0x929   :  { %v4600_v46 = vpop.eup %4599  ;;  %v2373_v55 = vadd.f32 1.0, %v4598_v57  ;;  %v2642_v57 = vld [vmem:[#allocation10 + $0xf8] sm:$0xff] }
 0x92a   :  { %v2379_v30 = vadd.f32 1.0, %v4600_v46  ;;  %v4602_v5 = vpop.eup %4601  ;;  %v4237_v46 = vpack.c.bf16 %v2624_v14, %v2623_v21  ;;  %v4312_v21 = vpack.c.bf16 %v3144_v24, %v3143_v38  ;;  %v3145_v14 = vld [vmem:[#allocation14 + $0x50] sm:$0xff] }
 0x92b   :  { %4605 = vrcp.f32 %v2373_v55  ;;  %v4604_v39 = vpop.eup %4603  ;;  %v2386_v20 = vadd.f32 1.0, %v4602_v5  ;;  %v4239_v55 = vpack.c.bf16 %v2642_v57, %v2641_v32  ;;  %v2626_v5 = vld [vmem:[#allocation10 + $0x78] sm:$0xff]  ;;  %v2835_v24 = vld [vmem:[#allocation13 + $0x30] sm:$0xff] }
 0x92c   :  { %4607 = vrcp.f32 %v2379_v30  ;;  %v2625_v30 = vld [vmem:[#allocation10 + $0x70] sm:$0xff]  ;;  %v3146_v32 = vld [vmem:[#allocation14 + $0x58] sm:$0xff] }
 0x92d   :  { %4609 = vrcp.f32 %v2386_v20  ;;  %v2731_v20 = vld [vmem:[#allocation11 + $0x18] sm:$0xff]  ;;  %v4315_v57 = vpack.c.bf16 %v3146_v32, %v3145_v14  ;;  %v2838_v14 = vld [vmem:[#allocation13 + $0x48] sm:$0xff] }
 0x935   :  { %v4606_v43 = vpop.eup %4605 }
 0x936   :  { %v4608_v33 = vpop.eup %4607  ;;  %v2393_v31 = vmul.f32 %v4606_v43, %v4604_v39  ;;  %v4241_v39 = vpack.c.bf16 %v2626_v5, %v2625_v30  ;;  %v2728_v43 = vld [vmem:[#allocation11] sm:$0xff] }
 0x937   :  { %v2392_v51 = vmul.f32 %v4608_v33, %v2390_v19  ;;  %v4610_v41 = vpop.eup %4609  ;;  %v2729_v19 = vld [vmem:[#allocation11 + $0x8] sm:$0xff]  ;;  %v2730_v33 = vld [vmem:[#allocation11 + $0x10] sm:$0xff] }
 0x939   :  { %v6181_v54 = vadd.f32 %v2393_v31, %v2392_v51  ;;  %v4243_v31 = vpack.c.bf16 %v2729_v19, %v2728_v43  ;;  %v4961_v51 = vmov 0.0|0.0  }
 0x93b   :  { %4611 = vtanh.f32 %v6181_v54 }
 0x945   :  { %v4612_v45 = vpop.eup %4611 }
 0x946   :  { %v2396_v34 = vmul.f32 %v4612_v45, %v4610_v41  ;;  %v4247_v41 = vpack.c.bf16 %v2731_v20, %v2730_v33  ;;  %v2732_v45 = vld [vmem:[#allocation11 + $0x20] sm:$0xff] }
 0x948   :  { %v2397_v12 = vpack.c.bf16 %v2396_v34, %v2396_v34  ;;  %v2733_v34 = vld [vmem:[#allocation11 + $0x28] sm:$0xff] }
 0x94a   :  { %2431 = vmatmul.mubr.bf16.vlgmr.msra.gmra.mrb[64].mxu0 %v2397_v12  ;;  %2472 = vmatmul.mubr.bf16.vlgmr.msra.gmra.mrb[80].mxu1 %v2397_v12 }
 0x94b   :  { %2481 = vmatpush1.bf16.msra.mxu0 %v5355_v3  ;;  %2522 = vmatpush1.bf16.msra.mxu1 %v5459_v59  ;;  %v2611_v3 = vld [vmem:[#allocation10] sm:$0xff]  ;;  %v2633_v59 = vld [vmem:[#allocation10 + $0xb0] sm:$0xff] }
 0x94c   :  { %2482 = vmatprep.subr.bf16.mxu0 %v5360_v10  ;;  %2523 = vmatprep.subr.bf16.mxu1 %v5463_v60  ;;  %v2612_v10 = vld [vmem:[#allocation10 + $0x8] sm:$0xff]  ;;  %v2634_v60 = vld [vmem:[#allocation10 + $0xb8] sm:$0xff] }
 0x94d   :  { %2512 = vmatprep.mubr.bf16.mxu0 %v6515_v2  ;;  %2553 = vmatprep.mubr.bf16.mxu1 %v6515_v2  ;;  %v2620_v2 = vld [vmem:[#allocation10 + $0x48] sm:$0xff] }
 0x94f   :  { %2483 = vmatpush1.bf16.msra.mxu0 %v5370_v18  ;;  %2524 = vmatpush1.bf16.msra.mxu1 %v5469_v25  ;;  %v4213_v18 = vpack.c.bf16 %v2612_v10, %v2611_v3  ;;  %v4223_v25 = vpack.c.bf16 %v2634_v60, %v2633_v59  ;;  %v2736_v10 = vld [vmem:[#allocation11 + $0x40] sm:$0xff]  ;;  %v6220_v59 = vld [vmem:[#allocation5 + $0x8] sm:$0xff] }
 0x950   :  { %2484 = vmatprep.subr.bf16.mxu0 %v5376_v35  ;;  %2525 = vmatprep.subr.bf16.mxu1 %v5472_v26  ;;  %v2629_v35 = vld [vmem:[#allocation10 + $0x90] sm:$0xff] }
 0x951   :  { %v2617_v26 = vld [vmem:[#allocation10 + $0x30] sm:$0xff] }
 0x953   :  { %2485 = vmatpush1.bf16.msra.mxu0 %v5387_v36  ;;  %2526 = vmatpush1.bf16.msra.mxu1 %v5479_v58  ;;  %v2618_v58 = vld [vmem:[#allocation10 + $0x38] sm:$0xff] }
 0x954   :  { %2486 = vmatprep.subr.bf16.mxu0 %v5392_v44  ;;  %2527 = vmatprep.subr.bf16.mxu1 %v5482_v4  ;;  %v2613_v44 = vld [vmem:[#allocation10 + $0x10] sm:$0xff]  ;;  %v4225_v4 = vpack.c.bf16 %v2618_v58, %v2617_v26  ;;  %v3138_v26 = vld [vmem:[#allocation14 + $0x18] sm:$0xff] }
 0x957   :  { %2487 = vmatpush1.bf16.msra.mxu0 %v5402_v56  ;;  %2528 = vmatpush1.bf16.msra.mxu1 %v5487_v1  ;;  %v2627_v1 = vld [vmem:[#allocation10 + $0x80] sm:$0xff]  ;;  %v2614_v56 = vld [vmem:[#allocation10 + $0x18] sm:$0xff] }
 0x958   :  { %2488 = vmatprep.subr.bf16.mxu0 %v5407_v61  ;;  %2529 = vmatprep.subr.bf16.mxu1 %v5490_v27  ;;  %v4217_v61 = vpack.c.bf16 %v2614_v56, %v2613_v44  ;;  %v2635_v27 = vld [vmem:[#allocation10 + $0xc0] sm:$0xff] }
 0x959   :  { %v2740_v56 = vld [vmem:[#allocation11 + $0x60] sm:$0xff] }
 0x95b   :  { %2489 = vmatpush1.bf16.msra.mxu0 %v5417_v15  ;;  %2530 = vmatpush1.bf16.msra.mxu1 %v5495_v52  ;;  %v2628_v52 = vld [vmem:[#allocation10 + $0x88] sm:$0xff]  ;;  %v2631_v15 = vld [vmem:[#allocation10 + $0xa0] sm:$0xff] }
 0x95c   :  { %2490 = vmatprep.subr.bf16.mxu0 %v5422_v7  ;;  %2531 = vmatprep.subr.bf16.mxu1 %v5498_v13  ;;  %v2632_v7 = vld [vmem:[#allocation10 + $0xa8] sm:$0xff] }
 0x95d   :  { %v2636_v13 = vld [vmem:[#allocation10 + $0xc8] sm:$0xff] }
 0x95f   :  { %2491 = vmatpush1.bf16.msra.mxu0 %v5429_v50  ;;  %2532 = vmatpush1.bf16.msra.mxu1 %v5503_v63  ;;  %v4211_v63 = vpack.c.bf16 %v2628_v52, %v2627_v1  ;;  %v4219_v50 = vpack.c.bf16 %v2632_v7, %v2631_v15  ;;  %v6217_v1 = vld [vmem:[#allocation5] sm:$0xff]  ;;  %v2734_v52 = vld [vmem:[#allocation11 + $0x30] sm:$0xff] }
 0x960   :  { %2492 = vmatprep.subr.bf16.mxu0 %v5434_v49  ;;  %2533 = vmatprep.subr.bf16.mxu1 %v5506_v42  ;;  %v2615_v49 = vld [vmem:[#allocation10 + $0x20] sm:$0xff]  ;;  %v2742_v7 = vld [vmem:[#allocation11 + $0x70] sm:$0xff] }
 0x961   :  { %v2619_v42 = vld [vmem:[#allocation10 + $0x40] sm:$0xff] }
 0x962   :  { %v4229_v17 = vpack.c.bf16 %v2620_v2, %v2619_v42  ;;  %v3141_v42 = vld [vmem:[#allocation14 + $0x30] sm:$0xff] }
 0x963   :  { %2493 = vmatpush1.bf16.msra.mxu0 %v5441_v6  ;;  %2534 = vmatpush1.bf16.msra.mxu1 %v5511_v8  ;;  %v2630_v8 = vld [vmem:[#allocation10 + $0x98] sm:$0xff]  ;;  %v2616_v6 = vld [vmem:[#allocation10 + $0x28] sm:$0xff] }
 0x964   :  { %2494 = vmatprep.subr.bf16.mxu0 %v5446_v23  ;;  %2535 = vmatprep.subr.bf16.mxu1 %v5514_v53  ;;  %v4215_v36 = vpack.c.bf16 %v2630_v8, %v2629_v35  ;;  %v4221_v23 = vpack.c.bf16 %v2616_v6, %v2615_v49  ;;  %v4227_v53 = vpack.c.bf16 %v2636_v13, %v2635_v27  ;;  %v2738_v8 = vld [vmem:[#allocation11 + $0x50] sm:$0xff]  ;;  %v3135_v6 = vld [vmem:[#allocation14] sm:$0xff]  ;;  %v3140_v27 = vld [vmem:[#allocation14 + $0x28] sm:$0xff] }
 0x967   :  { %2495 = vmatpush1.bf16.msra.mxu0 %v6539_v62  ;;  %2536 = vmatpush1.bf16.msra.mxu1 %v6540_v48  ;;  %v2637_v62 = vld [vmem:[#allocation10 + $0xd0] sm:$0xff]  ;;  %v2638_v48 = vld [vmem:[#allocation10 + $0xd8] sm:$0xff] }
 0x968   :  { %4212 = vmatprep.subr.bf16.mxu0 %v4211_v63  ;;  %v4231_v40 = vpack.c.bf16 %v2638_v48, %v2637_v62  ;;  %4244 = vmatprep.subr.bf16.mxu1 %v4243_v31  ;;  %v2735_v63 = vld [vmem:[#allocation11 + $0x38] sm:$0xff] }
 0x969   :  { %v4255_v3 = vpack.c.bf16 %v2735_v63, %v2734_v52 }
 0x96a   :  { %2513 = vmatmul.mubr.bf16.vlgmr.msra.gmra.mrb[68].mxu0 %v2397_v12  ;;  %2554 = vmatmul.mubr.bf16.vlgmr.msra.gmra.mrb[84].mxu1 %v2397_v12  ;;  %v4251_v12 = vpack.c.bf16 %v2733_v34, %v2732_v45 }
 0x96b   :  { %4214 = vmatpush3.bf16.msra.mxu0 %v4213_v18  ;;  %4246 = vmatpush3.bf16.msra.mxu1 %v4243_v31  ;;  %v2737_v18 = vld [vmem:[#allocation11 + $0x48] sm:$0xff] }
 0x96c   :  { %4216 = vmatprep.subr.bf16.mxu0 %v4215_v36  ;;  %4248 = vmatprep.subr.bf16.mxu1 %v4247_v41  ;;  %v4259_v35 = vpack.c.bf16 %v2737_v18, %v2736_v10  ;;  %v2739_v36 = vld [vmem:[#allocation11 + $0x58] sm:$0xff] }
 0x96d   :  { %4068 = vmatprep.mubr.f32.mxu1 %v6217_v1  ;;  %v4263_v44 = vpack.c.bf16 %v2739_v36, %v2738_v8 }
 0x96f   :  { %4218 = vmatpush3.bf16.msra.mxu0 %v4217_v61  ;;  %4250 = vmatpush3.bf16.msra.mxu1 %v4247_v41  ;;  %v2741_v61 = vld [vmem:[#allocation11 + $0x68] sm:$0xff] }
 0x970   :  { %4220 = vmatprep.subr.bf16.mxu0 %v4219_v50  ;;  %4252 = vmatprep.subr.bf16.mxu1 %v4251_v12  ;;  %v4267_v15 = vpack.c.bf16 %v2741_v61, %v2740_v56  ;;  %v2743_v50 = vld [vmem:[#allocation11 + $0x78] sm:$0xff] }
 0x971   :  { %v4271_v49 = vpack.c.bf16 %v2743_v50, %v2742_v7 }
 0x973   :  { %4222 = vmatpush3.bf16.msra.mxu0 %v4221_v23  ;;  %4254 = vmatpush3.bf16.msra.mxu1 %v4251_v12  ;;  %v3136_v23 = vld [vmem:[#allocation14 + $0x8] sm:$0xff] }
 0x974   :  { %4224 = vmatprep.subr.bf16.mxu0 %v4223_v25  ;;  %4256 = vmatprep.subr.bf16.mxu1 %v4255_v3  ;;  %v4300_v60 = vpack.c.bf16 %v3136_v23, %v3135_v6  ;;  %v3137_v25 = vld [vmem:[#allocation14 + $0x10] sm:$0xff] }
 0x975   :  { %v4303_v58 = vpack.c.bf16 %v3138_v26, %v3137_v25 }
 0x977   :  { %4226 = vmatpush3.bf16.msra.mxu0 %v4225_v4  ;;  %4258 = vmatpush3.bf16.msra.mxu1 %v4255_v3  ;;  %v3139_v4 = vld [vmem:[#allocation14 + $0x20] sm:$0xff] }
 0x978   :  { %4228 = vmatprep.subr.bf16.mxu0 %v4227_v53  ;;  %4260 = vmatprep.subr.bf16.mxu1 %v4259_v35  ;;  %v4306_v13 = vpack.c.bf16 %v3140_v27, %v3139_v4  ;;  %v3142_v53 = vld [vmem:[#allocation14 + $0x38] sm:$0xff] }
 0x97b   :  { %4230 = vmatpush3.bf16.msra.mxu0 %v4229_v17  ;;  %4262 = vmatpush3.bf16.msra.mxu1 %v4259_v35 }
 0x97c   :  { %4232 = vmatprep.subr.bf16.mxu0 %v4231_v40  ;;  %4264 = vmatprep.subr.bf16.mxu1 %v4263_v44  ;;  %v4309_v40 = vpack.c.bf16 %v3142_v53, %v3141_v42  ;;  %v2830_v42 = vld [vmem:[#allocation13 + $0x8] sm:$0xff] }
 0x97f   :  { %4234 = vmatpush3.bf16.msra.mxu0 %v4233_v16  ;;  %4266 = vmatpush3.bf16.msra.mxu1 %v4263_v44 }
 0x980   :  { %4236 = vmatprep.subr.bf16.mxu0 %v4235_v29  ;;  %4268 = vmatprep.subr.bf16.mxu1 %v4267_v15 }
 0x983   :  { %4238 = vmatpush3.bf16.msra.mxu0 %v4237_v46  ;;  %4270 = vmatpush3.bf16.msra.mxu1 %v4267_v15  ;;  %v3147_v46 = vld [vmem:[#allocation14 + $0x60] sm:$0xff] }
 0x984   :  { %4240 = vmatprep.subr.bf16.mxu0 %v4239_v55  ;;  %4272 = vmatprep.subr.bf16.mxu1 %v4271_v49  ;;  %v3148_v55 = vld [vmem:[#allocation14 + $0x68] sm:$0xff] }
 0x985   :  { %v4318_v30 = vpack.c.bf16 %v3148_v55, %v3147_v46  ;;  %v2840_v46 = vld [vmem:[#allocation13 + $0x58] sm:$0xff] }
 0x987   :  { %4242 = vmatpush3.bf16.msra.mxu0 %v4241_v39  ;;  %4274 = vmatpush3.bf16.msra.mxu1 %v4271_v49 }
 0x988   :  { %4275 = vmatprep.subr.bf16.mxu0 %v4961_v51  ;;  %4299 = vmatprep.subr.bf16.mxu1 %v4961_v51 }
 0x98a   :  { %4069 = vmatmul.mubr.f32.vlgmr.msra.gmra.mrb[88].mxu1 %v6220_v59 }
 0x98b   :  { %4301 = vmatpush3.bf16.msra.mxu1 %v4300_v60  ;;  %v2602_v60 = vrot.slane %v6181_v54, 4 }
 0x98c   :  { %4302 = vmatprep.subr.bf16.mxu1 %v4961_v51 }
 0x98f   :  { %4304 = vmatpush3.bf16.msra.mxu1 %v4303_v58 }
 0x990   :  { %4305 = vmatprep.subr.bf16.mxu1 %v4961_v51 }
 0x993   :  { %4307 = vmatpush3.bf16.msra.mxu1 %v4306_v13  ;;  %v2829_v13 = vld [vmem:[#allocation13] sm:$0xff] }
 0x994   :  { %4308 = vmatprep.subr.bf16.mxu1 %v4961_v51 }
 0x997   :  { %4310 = vmatpush3.bf16.msra.mxu1 %v4309_v40  ;;  %v2832_v40 = vld [vmem:[#allocation13 + $0x18] sm:$0xff] }
 0x998   :  { %4311 = vmatprep.subr.bf16.mxu1 %v4961_v51 }
 0x99b   :  { %4313 = vmatpush3.bf16.msra.mxu1 %v4312_v21  ;;  %v2837_v21 = vld [vmem:[#allocation13 + $0x40] sm:$0xff] }
 0x99c   :  { %4314 = vmatprep.subr.bf16.mxu1 %v4961_v51  ;;  %v4288_v32 = vpack.c.bf16 %v2838_v14, %v2837_v21  ;;  %v6719_v21 = vlaneseq }
 0x99e   :  { %v2991_v14 = vand.u32 127, %v6719_v21 }
 0x99f   :  { %4316 = vmatpush3.bf16.msra.mxu1 %v4315_v57  ;;  %v2839_v57 = vld [vmem:[#allocation13 + $0x50] sm:$0xff] }
 0x9a0   :  { %4317 = vmatprep.subr.bf16.mxu1 %v4961_v51  ;;  %v4291_v55 = vpack.c.bf16 %v2840_v46, %v2839_v57 }
 0x9a3   :  { %4319 = vmatpush3.bf16.msra.mxu1 %v4318_v30  ;;  %v2841_v30 = vld [vmem:[#allocation13 + $0x60] sm:$0xff] }
 0x9a4   :  { %4320 = vmatprep.subr.bf16.mxu1 %v4961_v51 }
 0xa1d   :  { %v2432_v2 = vpop.f32.mrb[64].mxu0  ;;  %v2473_v62 = vpop.f32.mrb[80].mxu1 }
 0xa1e   :  { %v2434_v48 = vpop.f32.mrb[65].mxu0  ;;  %v2475_v17 = vpop.f32.mrb[81].mxu1 }
 0xa1f   :  { %v2436_v47 = vpop.f32.mrb[66].mxu0  ;;  %v2477_v28 = vpop.f32.mrb[82].mxu1 }
 0xa20   :  { %v2437_v16 = vpop.f32.mrb[67].mxu0  ;;  %v2478_v29 = vpop.f32.mrb[83].mxu1  ;;  %v2833_v47 = vld [vmem:[#allocation13 + $0x20] sm:$0xff]  ;;  %v2834_v28 = vld [vmem:[#allocation13 + $0x28] sm:$0xff] }
 0xa21   :  { %v4282_v38 = vpack.c.bf16 %v2834_v28, %v2833_v47  ;;  %v2836_v16 = vld [vmem:[#allocation13 + $0x38] sm:$0xff] }
 0xa22   :  { %v4285_v29 = vpack.c.bf16 %v2836_v16, %v2835_v24 }
 0xa3d   :  { %v2514_v5 = vpop.f32.mrb[68].mxu0  ;;  %v2555_v39 = vpop.f32.mrb[84].mxu1 }
 0xa3e   :  { %v2562_v43 = vsel %vm953_vm5, %v2432_v2, %v2514_v5  ;;  %v2564_v19 = vsel %vm953_vm5, %v2473_v62, %v2555_v39  ;;  %v2516_v33 = vpop.f32.mrb[69].mxu0  ;;  %v2557_v31 = vpop.f32.mrb[85].mxu1  ;;  %v2842_v5 = vld [vmem:[#allocation13 + $0x68] sm:$0xff] }
 0xa3f   :  { %v2570_v20 = vrot.slane %v2562_v43, 4  ;;  %v2563_v41 = vsel %vm953_vm5, %v2434_v48, %v2516_v33  ;;  %v2565_v45 = vsel %vm953_vm5, %v2475_v17, %v2557_v31  ;;  %v2518_v34 = vpop.f32.mrb[70].mxu0  ;;  %v2559_v12 = vpop.f32.mrb[86].mxu1  ;;  %v2572_v56 = vrot.slane %v2564_v19, 4  ;;  %v2831_v17 = vld [vmem:[#allocation13 + $0x10] sm:$0xff]  ;;  %v2844_v33 = vld [vmem:[#allocation13 + $0x78] sm:$0xff] }
 0xa40   :  { %v2571_v52 = vrot.slane %v2563_v41, 4  ;;  %v2519_v63 = vpop.f32.mrb[71].mxu0  ;;  %v2560_v3 = vpop.f32.mrb[87].mxu1  ;;  %v2573_v36 = vrot.slane %v2565_v45, 4  ;;  %v4276_v48 = vpack.c.bf16 %v2830_v42, %v2829_v13  ;;  %v4279_v54 = vpack.c.bf16 %v2832_v40, %v2831_v17  ;;  %v6251_v43 = vld [vmem:[#allocation5 + $0x10] sm:$0xff]  ;;  %v6254_v31 = vld [vmem:[#allocation5 + $0x18] sm:$0xff] }
 0xa41   :  { %v2578_v10 = vadd.f32 %v2570_v20, %v6713_v11  ;;  %v2580_v15 = vadd.f32 %v2572_v56, %v6716_v9  ;;  %v4294_v39 = vpack.c.bf16 %v2842_v5, %v2841_v30  ;;  %v2843_v19 = vld [vmem:[#allocation13 + $0x70] sm:$0xff]  ;;  %4071 = vmatprep.mubr.f32.mxu1 %v6251_v43  ;;  %v3150_v45 = vld [vmem:[#allocation14 + $0x78] sm:$0xff]  ;;  %v6717_v12 = vmov 0.0  }
 0xa42   :  { %v2579_v18 = vadd.f32 %v2571_v52, %v6714_v0  ;;  %v2581_v44 = vadd.f32 %v2573_v36, %v6715_v37  ;;  %v4297_v20 = vpack.c.bf16 %v2844_v33, %v2843_v19  ;;  %v3149_v41 = vld [vmem:[#allocation14 + $0x70] sm:$0xff]  ;;  %4072 = vmatmul.mubr.f32.gmra.mrb[90].mxu1 %v6254_v31  ;;  %v4963_v56 = vmov 1966171168  }
 0xa43   :  { %v3848_v35 = vmul.f32 -1.442695, %v2578_v10  ;;  %v4321_v34 = vpack.c.bf16 %v3150_v45, %v3149_v41  ;;  %4141 = vmatprep.mubr.msk.f32.mxu1 %vm4962_vm6, %v6717_v12  ;;  %v3851_v10 = vld [vmem:[%s6344_s6] ss:$0 sm:$0xff]  ;;  %v2994_v30 = vsub.s32 %v2991_v14, %v5547_v22 }
 0xa44   :  { %v3849_v8 = vmul.f32 -1.442695, %v2579_v18  ;;  %v3850_v61 = vmul.f32 -1.442695, %v2581_v44 }
 0xa45   :  { %4613 = vpow2.f32 %v3848_v35  ;;  %4322 = vmatpush3.bf16.msra.mxu1 %v4321_v34 }
 0xa46   :  { %4615 = vpow2.f32 %v3849_v8 }
 0xa47   :  { %4617 = vpow2.f32 %v3850_v61  ;;  %v2917_v61 = vunpack.c.l.s4 %v4963_v56 }
 0xa48   :  { %4619 = vtanh.f32 %v2580_v15 }
 0xa49   :  { %v2918_v15 = vunpack.c.0.s8 %v2917_v61 }
 0xa4f   :  { %v4614_v7 = vpop.eup %4613 }
 0xa50   :  { %v4616_v50 = vpop.eup %4615  ;;  %v2585_v49 = vadd.f32 1.0, %v4614_v7  ;;  %v2921_v7 = vsub.s32 %v2918_v15, %v5547_v22 }
 0xa51   :  { %v2591_v6 = vadd.f32 1.0, %v4616_v50  ;;  %v4618_v11 = vpop.eup %4617 }
 0xa52   :  { %4621 = vrcp.f32 %v2585_v49  ;;  %v4620_v0 = vpop.eup %4619  ;;  %v2598_v37 = vadd.f32 1.0, %v4618_v11 }
 0xa53   :  { %4623 = vrcp.f32 %v2591_v6 }
 0xa54   :  { %4625 = vrcp.f32 %v2598_v37 }
 0xa5c   :  { %v4622_v23 = vpop.eup %4621 }
 0xa5d   :  { %v4624_v25 = vpop.eup %4623  ;;  %v2605_v26 = vmul.f32 %v4622_v23, %v4620_v0  ;;  %v4070_v52 = vpop.f32.mrb[88].mxu1 }
 0xa5e   :  { %v2604_v58 = vmul.f32 %v4624_v25, %v2602_v60  ;;  %v4626_v9 = vpop.eup %4625  ;;  %v2810_v63 = vpop.f32.mrb[89].mxu1 }
 0xa60   :  { %v2606_v4 = vadd.f32 %v2605_v26, %v2604_v58  ;;  %v6718_v26 = vld [vmem:[#allocation67_spill] sm:$0xff]  ;;  %v3853_v58 = vld [vmem:[%s6347_s9] ss:$0 sm:$0xff] }
 0xa62   :  { %4627 = vtanh.f32 %v2606_v4 }
 0xa6c   :  { %v4628_v27 = vpop.eup %4627 }
 0xa6d   :  { %v2608_v53 = vmul.f32 %v4628_v27, %v4626_v9 }
 0xa6f   :  { %v3852_v2 = vrot.slane %v2608_v53, 6  ;;  %v2650_v62 = vrot.slane %v2608_v53, 4 }
 0xa71   :  { %2718 = vmatprep.mubr.f32.mxu0 %v3852_v2 }
 0xa72   :  { %2719 = vmatmul.mubr.f32.vlgmr.msra.gmra.mrb[72].mxu0 %v2650_v62  ;;  %v3854_v62 = vld [vmem:[%s6348_s10] ss:$0 sm:$0xff] }
 0xa73   :  { %4277 = vmatpush3.bf16.msra.mxu0 %v4276_v48  ;;  %4106 = vmatprep.mubr.msk.f32.mxu0 %vm4962_vm6, %v6717_v12 }
 0xa74   :  { %4278 = vmatprep.subr.bf16.mxu0 %v4961_v51 }
 0xa77   :  { %4280 = vmatpush3.bf16.msra.mxu0 %v4279_v54 }
 0xa78   :  { %4281 = vmatprep.subr.bf16.mxu0 %v4961_v51 }
 0xa7b   :  { %4283 = vmatpush3.bf16.msra.mxu0 %v4282_v38 }
 0xa7c   :  { %4284 = vmatprep.subr.bf16.mxu0 %v4961_v51 }
 0xa7f   :  { %4286 = vmatpush3.bf16.msra.mxu0 %v4285_v29 }
 0xa80   :  { %4287 = vmatprep.subr.bf16.mxu0 %v4961_v51 }
 0xa83   :  { %4289 = vmatpush3.bf16.msra.mxu0 %v4288_v32  ;;  %v2996_v32 = vadd.s32 4294967288, %v2991_v14 }
 0xa84   :  { %4290 = vmatprep.subr.bf16.mxu0 %v4961_v51 }
 0xa85   :  { %v2999_v46 = vsub.s32 %v2996_v32, %v5547_v22 }
 0xa87   :  { %4292 = vmatpush3.bf16.msra.mxu0 %v4291_v55 }
 0xa88   :  { %4293 = vmatprep.subr.bf16.mxu0 %v4961_v51 }
 0xa8b   :  { %4295 = vmatpush3.bf16.msra.mxu0 %v4294_v39 }
 0xa8c   :  { %4296 = vmatprep.subr.bf16.mxu0 %v4961_v51 }
 0xa8f   :  { %4298 = vmatpush3.bf16.msra.mxu0 %v4297_v20 }
 0xa90   :  { %4323 = vmatprep.subr.bf16.mxu0 %v4961_v51 }
 0xb15   :  { %v4073_v36 = vpop.f32.mrb[90].mxu1 }
 0xb16   :  { %v2820_v44 = vpop.f32.mrb[91].mxu1 }
 0xb45   :  { %v3892_v3 = vpop.f32.mrb[72].mxu0 }
 0xb46   :  { %v3893_v18 = vpop.f32.mrb[73].mxu0 }
 0xb47   :  { %v3894_v35 = vadd.f32 %v3893_v18, %v3892_v3  ;;  %v6720_v18 = vld [vmem:[#allocation68_spill] sm:$0xff] }
 0xb49   :  { %v2721_v8 = vadd.f32 %v3894_v35, %v3851_v10 }
 0xb4b   :  { %4107 = vmatmul.mubr.f32.vlgmr.msra.gmra.mrb[74].mxu0 %v2721_v8  ;;  %4142 = vmatmul.mubr.f32.vlgmr.msra.gmra.mrb[92].mxu1 %v2721_v8 }
 0xb4c   :  { %4176 = vmatprep.mubr.msk.f32.mxu0 %vm4962_vm6, %v6717_v12  ;;  %3478 = vmatprep.mubr.f32.mxu1 %v6717_v12 }
 0xc1e   :  { %v2911_v50 = vpop.f32.mrb[74].mxu0  ;;  %v6266_v49 = vpop.f32.mrb[92].mxu1 }
 0xc1f   :  { %v2922_v6 = vrot.slane %v2911_v50, %v2921_v7  ;;  %v4108_v11 = vpop.f32.mrb[75].mxu0  ;;  %v4143_v0 = vpop.f32.mrb[93].mxu1 }
 0xc21   :  { %v2923_v23 = vcombine.high %v2922_v6, %v2922_v6  ;;  %v2930_v60 = vrot.slane %v2922_v6, %v2921_v7 }
 0xc23   :  { %v2937_v25 = vrot.slane %v2923_v23, %v2921_v7  ;;  %v2941_v37 = vrot.slane %v2930_v60, %v6718_v26 }
 0xc25   :  { %v2948_v4 = vadd.f32 %v2941_v37, %v2810_v63  ;;  %v2945_v9 = vrot.slane %v2937_v25, %v6718_v26  ;;  %v2949_v27 = vadd.f32 %v4070_v52, %v2941_v37 }
 0xc27   :  { %v2959_v13 = vadd.f32 %v3853_v58, %v2948_v4  ;;  %v2950_v42 = vadd.f32 %v2945_v9, %v2820_v44  ;;  %v2960_v53 = vadd.f32 %v3853_v58, %v2949_v27  ;;  %v2951_v2 = vadd.f32 %v4073_v36, %v2945_v9 }
 0xc29   :  { %v2963_v48 = vmax.f32 %v2959_v13, 0.0  ;;  %v2961_v17 = vadd.f32 %v3853_v58, %v2950_v42  ;;  %v2962_v40 = vadd.f32 %v3853_v58, %v2951_v2  ;;  %v2964_v28 = vmax.f32 %v2960_v53, 0.0 }
 0xc2b   :  { %v2974_v54 = vmul.f32 %v3854_v62, %v2963_v48  ;;  %v2965_v47 = vmax.f32 %v2961_v17, 0.0  ;;  %v2966_v24 = vmax.f32 %v2962_v40, 0.0  ;;  %v2975_v16 = vmul.f32 %v3854_v62, %v2964_v28  ;;  %v3229_v48 = vld [vmem:[#allocation16] sm:$0xff]  ;;  %v3230_v17 = vld [vmem:[#allocation16 + $0x8] sm:$0xff] }
 0xc2c   :  { %v4324_v40 = vpack.c.bf16 %v3230_v17, %v3229_v48  ;;  %v3352_v17 = vld [vmem:[#allocation17 + $0xc0] sm:$0xff] }
 0xc2d   :  { %2978 = vadd.xlane.f32.xlu0 %v2974_v54  ;;  %v2976_v38 = vmul.f32 %v3854_v62, %v2965_v47  ;;  %v2977_v29 = vmul.f32 %v3854_v62, %v2966_v24  ;;  %v3231_v24 = vld [vmem:[#allocation16 + $0x10] sm:$0xff] }
 0xc2e   :  { %4325 = vmatpush3.bf16.msra.mxu0 %v4324_v40  ;;  %v3356_v40 = vld [vmem:[#allocation17 + $0xe0] sm:$0xff] }
 0xc2f   :  { %2982 = vadd.xlane.f32.xlu1 %v2976_v38  ;;  %4326 = vmatprep.subr.bf16.mxu0 %v4961_v51 }
 0xc31   :  { %2980 = vadd.xlane.f32.xlu0 %v2975_v16  ;;  %v3232_v16 = vld [vmem:[#allocation16 + $0x18] sm:$0xff] }
 0xc33   :  { %2984 = vadd.xlane.f32.xlu1 %v2977_v29  ;;  %v4327_v29 = vpack.c.bf16 %v3232_v16, %v3231_v24  ;;  %v3360_v24 = vld [vmem:[#allocation17 + $0x100] sm:$0xff] }
 0xc34   :  { %v3364_v16 = vld [vmem:[#allocation17 + $0x120] sm:$0xff] }
 0xc35   :  { %4328 = vmatpush3.bf16.msra.mxu0 %v4327_v29  ;;  %v4365_v29 = vpack.c.bf16 %v3364_v16, %v3360_v24  ;;  %v3362_v24 = vld [vmem:[#allocation17 + $0x110] sm:$0xff]  ;;  %v3371_v16 = vld [vmem:[#allocation17 + $0x158] sm:$0xff] }
 0xc36   :  { %4329 = vmatprep.subr.bf16.mxu0 %v4961_v51 }
 0xcba   :  { %v2979_v57 = vpop.xlane.xlu0 %2978 }
 0xcbb   :  { %v2995_v33 = vrot.slane %v2979_v57, %v2994_v30 }
 0xcbc   :  { %v2983_v55 = vpop.xlane.xlu1 %2982 }
 0xcbd   :  { %v3006_v20 = vrot.slane %v2983_v55, %v2994_v30 }
 0xcbe   :  { %v2981_v5 = vpop.xlane.xlu0 %2980 }
 0xcbf   :  { %v3000_v39 = vrot.slane %v2981_v5, %v2999_v46 }
 0xcc0   :  { %v2985_v19 = vpop.xlane.xlu1 %2984 }
 0xcc1   :  { %v3010_v41 = vrot.slane %v2985_v19, %v2999_v46  ;;  %v3002_v45 = vsel %vm3001_vm7, %v3000_v39, %v2995_v33  ;;  %v3236_v39 = vld [vmem:[#allocation16 + $0x38] sm:$0xff]  ;;  %v3237_v33 = vld [vmem:[#allocation16 + $0x40] sm:$0xff] }
 0xcc3   :  { %v3011_v34 = vsel %vm3001_vm7, %v3010_v41, %v3006_v20  ;;  %v3238_v20 = vld [vmem:[#allocation16 + $0x48] sm:$0xff] }
 0xcc4   :  { %v3013_v52 = vsel %vm3012_vm8, %v3011_v34, %v3002_v45  ;;  %v4336_v41 = vpack.c.bf16 %v3238_v20, %v3237_v33  ;;  %v3239_v45 = vld [vmem:[#allocation16 + $0x50] sm:$0xff]  ;;  %v3240_v34 = vld [vmem:[#allocation16 + $0x58] sm:$0xff] }
 0xcc5   :  { %v3016_v63 = vsel %vm3015_vm9, %v3013_v52, -inf  ;;  %v4339_v52 = vpack.c.bf16 %v3240_v34, %v3239_v45 }
 0xcc6   :  { %3017 = vmax.xlane.f32.xlu0 %v3016_v63  ;;  %v3241_v63 = vld [vmem:[#allocation16 + $0x60] sm:$0xff] }
 0xd53   :  { %v3018_v3 = vpop.xlane.xlu0 %3017 }
 0xd54   :  { %v3023_v10 = vrot.slane %v3018_v3, %v6718_v26  ;;  %v3027_v35 = vrot.slane %v3018_v3, %v6720_v18  ;;  %v3242_v3 = vld [vmem:[#allocation16 + $0x68] sm:$0xff] }
 0xd56   :  { %v3030_v8 = vsub.f32 %v2979_v57, %v3023_v10  ;;  %v3031_v36 = vsub.f32 %v2981_v5, %v3023_v10  ;;  %v3032_v44 = vsub.f32 %v2983_v55, %v3027_v35  ;;  %v3033_v15 = vsub.f32 %v2985_v19, %v3027_v35  ;;  %v3233_v57 = vld [vmem:[#allocation16 + $0x20] sm:$0xff]  ;;  %v3235_v5 = vld [vmem:[#allocation16 + $0x30] sm:$0xff] }
 0xd57   :  { %v4333_v19 = vpack.c.bf16 %v3236_v39, %v3235_v5  ;;  %v4342_v10 = vpack.c.bf16 %v3242_v3, %v3241_v63  ;;  %v3243_v35 = vld [vmem:[#allocation16 + $0x70] sm:$0xff]  ;;  %v3381_v5 = vld [vmem:[#allocation17 + $0x1a8] sm:$0xff] }
 0xd58   :  { %v3034_v56 = vmul.f32 1.442695, %v3030_v8  ;;  %v3036_v61 = vmul.f32 1.442695, %v3031_v36  ;;  %v3038_v7 = vmul.f32 1.442695, %v3032_v44 }
 0xd59   :  { %v3040_v50 = vmul.f32 1.442695, %v3033_v15  ;;  %v3244_v8 = vld [vmem:[#allocation16 + $0x78] sm:$0xff]  ;;  %v3329_v44 = vld [vmem:[#allocation17 + $0x8] sm:$0xff] }
 0xd5a   :  { %4629 = vpow2.f32 %v3034_v56  ;;  %v4345_v36 = vpack.c.bf16 %v3244_v8, %v3243_v35  ;;  %v3333_v56 = vld [vmem:[#allocation17 + $0x28] sm:$0xff] }
 0xd5b   :  { %4631 = vpow2.f32 %v3036_v61  ;;  %v3331_v61 = vld [vmem:[#allocation17 + $0x18] sm:$0xff]  ;;  %v4347_v15 = vpack.c.bf16 %v3333_v56, %v3329_v44 }
 0xd5c   :  { %4633 = vpow2.f32 %v3038_v7  ;;  %v3335_v7 = vld [vmem:[#allocation17 + $0x38] sm:$0xff] }
 0xd5d   :  { %4635 = vpow2.f32 %v3040_v50  ;;  %v3328_v50 = vld [vmem:[#allocation17] sm:$0xff]  ;;  %4348 = vmatprep.subr.bf16.mxu1 %v4347_v15 }
 0xd64   :  { %v4630_v6 = vpop.eup %4629 }
 0xd65   :  { %v4632_v11 = vpop.eup %4631  ;;  %3047 = vperm.xlu1 %4499, %v4630_v6  }
 0xd66   :  { %3050 = vperm.xlu0 %4500, %v4632_v11   ;;  %v4634_v0 = vpop.eup %4633 }
 0xd67   :  { %v4636_v23 = vpop.eup %4635 }
 0xd69   :  { %3053 = vperm.xlu1 %4499, %v4634_v0  }
 0xd6d   :  { %3056 = vperm.xlu1 %4499, %v4636_v23  }
 0xde4   :  { %v3048_v60 = vpop.permute.xlu1 %3047 }
 0xde5   :  { %v3051_v25 = vpop.permute.xlu0 %3050  ;;  %v3061_v4 = vrot.slane %v3048_v60, %v2994_v30  ;;  %v3341_v60 = vld [vmem:[#allocation17 + $0x68] sm:$0xff] }
 0xde6   :  { %v3065_v58 = vrot.slane %v3051_v25, %v2999_v46 }
 0xde8   :  { %v3054_v37 = vpop.permute.xlu1 %3053  ;;  %v3066_v42 = vsel %vm3001_vm7, %v3065_v58, %v3061_v4  ;;  %v3340_v58 = vld [vmem:[#allocation17 + $0x60] sm:$0xff] }
 0xde9   :  { %v3070_v27 = vrot.slane %v3054_v37, %v2994_v30  ;;  %v3336_v37 = vld [vmem:[#allocation17 + $0x40] sm:$0xff] }
 0xdea   :  { %v4353_v4 = vpack.c.bf16 %v3340_v58, %v3336_v37  ;;  %v3342_v58 = vld [vmem:[#allocation17 + $0x70] sm:$0xff] }
 0xdec   :  { %v3057_v9 = vpop.permute.xlu1 %3056 }
 0xded   :  { %v3074_v13 = vrot.slane %v3057_v9, %v2999_v46  ;;  %v3234_v46 = vld [vmem:[#allocation16 + $0x28] sm:$0xff] }
 0xdee   :  { %v4330_v55 = vpack.c.bf16 %v3234_v46, %v3233_v57  ;;  %v3349_v9 = vld [vmem:[#allocation17 + $0xa8] sm:$0xff]  ;;  %v3368_v57 = vld [vmem:[#allocation17 + $0x140] sm:$0xff] }
 0xdef   :  { %v3075_v53 = vsel %vm3001_vm7, %v3074_v13, %v3070_v27  ;;  %v3344_v13 = vld [vmem:[#allocation17 + $0x80] sm:$0xff] }
 0xdf0   :  { %v3076_v2 = vsel %vm3012_vm8, %v3075_v53, %v3066_v42  ;;  %4331 = vmatpush3.bf16.msra.mxu0 %v4330_v55  ;;  %v3348_v42 = vld [vmem:[#allocation17 + $0xa0] sm:$0xff] }
 0xdf1   :  { %v3078_v62 = vsel %vm3015_vm9, %v3076_v2, 0.0  ;;  %4332 = vmatprep.subr.bf16.mxu0 %v4961_v51  ;;  %v4357_v53 = vpack.c.bf16 %v3348_v42, %v3344_v13  ;;  %v3353_v2 = vld [vmem:[#allocation17 + $0xc8] sm:$0xff]  ;;  %v3372_v46 = vld [vmem:[#allocation17 + $0x160] sm:$0xff]  ;;  %v3346_v13 = vld [vmem:[#allocation17 + $0x90] sm:$0xff] }
 0xdf2   :  { %3079 = vadd.xlane.f32.xlu1 %v3078_v62  ;;  %v3357_v62 = vld [vmem:[#allocation17 + $0xe8] sm:$0xff]  ;;  %v4369_v55 = vpack.c.bf16 %v3372_v46, %v3368_v57  ;;  %v3350_v42 = vld [vmem:[#allocation17 + $0xb0] sm:$0xff]  ;;  %v3379_v46 = vld [vmem:[#allocation17 + $0x198] sm:$0xff] }
 0xdf3   :  { %v4359_v48 = vpack.c.bf16 %v3357_v62, %v3353_v2  ;;  %v3359_v2 = vld [vmem:[#allocation17 + $0xf8] sm:$0xff]  ;;  %v4389_v62 = vpack.c.bf16 %v3350_v42, %v3346_v13  ;;  %v3374_v57 = vld [vmem:[#allocation17 + $0x170] sm:$0xff] }
 0xdf4   :  { %4334 = vmatpush3.bf16.msra.mxu0 %v4333_v19  ;;  %v3687_v13 = vld [vmem:[#allocation20 + $0x90] sm:$0xff]  ;;  %v3688_v42 = vld [vmem:[#allocation20 + $0x98] sm:$0xff] }
 0xdf5   :  { %4335 = vmatprep.subr.bf16.mxu0 %v4961_v51 }
 0xdf8   :  { %4337 = vmatpush3.bf16.msra.mxu0 %v4336_v41 }
 0xdf9   :  { %4338 = vmatprep.subr.bf16.mxu0 %v4961_v51 }
 0xdfc   :  { %4340 = vmatpush3.bf16.msra.mxu0 %v4339_v52 }
 0xdfd   :  { %4341 = vmatprep.subr.bf16.mxu0 %v4961_v51 }
 0xe00   :  { %4343 = vmatpush3.bf16.msra.mxu0 %v4342_v10 }
 0xe01   :  { %4344 = vmatprep.subr.bf16.mxu0 %v4961_v51  ;;  %v3345_v51 = vld [vmem:[#allocation17 + $0x88] sm:$0xff] }
 0xe02   :  { %v4355_v27 = vpack.c.bf16 %v3349_v9, %v3345_v51  ;;  %v3351_v51 = vld [vmem:[#allocation17 + $0xb8] sm:$0xff] }
 0xe04   :  { %4346 = vmatpush3.bf16.msra.mxu0 %v4345_v36 }
 0xe7f   :  { %v3080_v54 = vpop.xlane.xlu1 %3079 }
 0xe80   :  { %4637 = vrcp.f32 %v3080_v54  ;;  %v4361_v54 = vpack.c.bf16 %v3356_v40, %v3352_v17  ;;  %v3354_v17 = vld [vmem:[#allocation17 + $0xd0] sm:$0xff] }
 0xe81   :  { %v3358_v40 = vld [vmem:[#allocation17 + $0xf0] sm:$0xff] }
 0xe8a   :  { %v4638_v47 = vpop.eup %4637 }
 0xe8b   :  { %v3086_v28 = vrot.slane %v4638_v47, %v6718_v26  ;;  %v3090_v14 = vrot.slane %v4638_v47, %v6720_v18  ;;  %v3361_v47 = vld [vmem:[#allocation17 + $0x108] sm:$0xff] }
 0xe8d   :  { %v3093_v38 = vmul.f32 %v4630_v6, %v3086_v28  ;;  %v3094_v21 = vmul.f32 %v4632_v11, %v3086_v28  ;;  %v3095_v32 = vmul.f32 %v4634_v0, %v3090_v14  ;;  %v3096_v30 = vmul.f32 %v4636_v23, %v3090_v14  ;;  %v3332_v6 = vld [vmem:[#allocation17 + $0x20] sm:$0xff]  ;;  %v3337_v23 = vld [vmem:[#allocation17 + $0x48] sm:$0xff] }
 0xe8e   :  { %v4379_v11 = vpack.c.bf16 %v3335_v7, %v3331_v61  ;;  %v4349_v0 = vpack.c.bf16 %v3332_v6, %v3328_v50  ;;  %v4351_v25 = vpack.c.bf16 %v3341_v60, %v3337_v23  ;;  %v3365_v28 = vld [vmem:[#allocation17 + $0x128] sm:$0xff]  ;;  %v3334_v6 = vld [vmem:[#allocation17 + $0x30] sm:$0xff] }
 0xe8f   :  { %3099 = vperm.xlu0 %4500, %v3093_v38   ;;  %v4363_v38 = vpack.c.bf16 %v3365_v28, %v3361_v47  ;;  %v3373_v14 = vld [vmem:[#allocation17 + $0x168] sm:$0xff]  ;;  %v3367_v47 = vld [vmem:[#allocation17 + $0x138] sm:$0xff]  ;;  %v4393_v28 = vpack.c.bf16 %v3358_v40, %v3354_v17  ;;  %v3562_v17 = vld [vmem:[#allocation19 + $0x10] sm:$0xff] }
 0xe90   :  { %4380 = vmatprep.subr.bf16.mxu0 %v4379_v11  ;;  %4350 = vmatpush1.bf16.msra.mxu1 %v4349_v0  ;;  %v3339_v11 = vld [vmem:[#allocation17 + $0x58] sm:$0xff] }
 0xe91   :  { %4352 = vmatprep.subr.bf16.mxu1 %v4351_v25  ;;  %v3343_v0 = vld [vmem:[#allocation17 + $0x78] sm:$0xff] }
 0xe92   :  { %v4383_v37 = vpack.c.bf16 %v3343_v0, %v3339_v11  ;;  %v3855_v0 = vld [vmem:[%s6350_s12] ss:$0 sm:$0xff]  ;;  %v3563_v40 = vld [vmem:[#allocation19 + $0x18] sm:$0xff] }
 0xe93   :  { %3104 = vperm.xlu0 %4500, %v3094_v21   ;;  %v3369_v21 = vld [vmem:[#allocation17 + $0x148] sm:$0xff] }
 0xe94   :  { %4354 = vmatpush1.bf16.msra.mxu1 %v4353_v4  ;;  %v3347_v4 = vld [vmem:[#allocation17 + $0x98] sm:$0xff] }
 0xe95   :  { %4356 = vmatprep.subr.bf16.mxu1 %v4355_v27  ;;  %v4387_v27 = vpack.c.bf16 %v3351_v51, %v3347_v4  ;;  %v3669_v4 = vld [vmem:[#allocation20] sm:$0xff]  ;;  %v3670_v51 = vld [vmem:[#allocation20 + $0x8] sm:$0xff] }
 0xe97   :  { %3109 = vperm.xlu0 %4500, %v3095_v32   ;;  %v4367_v32 = vpack.c.bf16 %v3373_v14, %v3369_v21 }
 0xe98   :  { %4358 = vmatpush1.bf16.msra.mxu1 %v4357_v53  ;;  %v3355_v53 = vld [vmem:[#allocation17 + $0xd8] sm:$0xff] }
 0xe99   :  { %4360 = vmatprep.subr.bf16.mxu1 %v4359_v48  ;;  %v4391_v48 = vpack.c.bf16 %v3359_v2, %v3355_v53 }
 0xe9b   :  { %3114 = vperm.xlu0 %4500, %v3096_v30   ;;  %v3377_v30 = vld [vmem:[#allocation17 + $0x188] sm:$0xff] }
 0xe9c   :  { %4362 = vmatpush1.bf16.msra.mxu1 %v4361_v54  ;;  %v4371_v39 = vpack.c.bf16 %v3381_v5, %v3377_v30  ;;  %v3363_v54 = vld [vmem:[#allocation17 + $0x118] sm:$0xff] }
 0xe9d   :  { %4364 = vmatprep.subr.bf16.mxu1 %v4363_v38  ;;  %v4395_v38 = vpack.c.bf16 %v3367_v47, %v3363_v54 }
 0xea0   :  { %4366 = vmatpush1.bf16.msra.mxu1 %v4365_v29  ;;  %v3375_v29 = vld [vmem:[#allocation17 + $0x178] sm:$0xff] }
 0xea1   :  { %4368 = vmatprep.subr.bf16.mxu1 %v4367_v32  ;;  %v4399_v14 = vpack.c.bf16 %v3375_v29, %v3371_v16  ;;  %v3370_v32 = vld [vmem:[#allocation17 + $0x150] sm:$0xff]  ;;  %v3689_v16 = vld [vmem:[#allocation20 + $0xa0] sm:$0xff]  ;;  %v3690_v29 = vld [vmem:[#allocation20 + $0xa8] sm:$0xff] }
 0xea2   :  { %v4401_v30 = vpack.c.bf16 %v3374_v57, %v3370_v32  ;;  %v3564_v32 = vld [vmem:[#allocation19 + $0x20] sm:$0xff]  ;;  %v3565_v57 = vld [vmem:[#allocation19 + $0x28] sm:$0xff] }
 0xea4   :  { %4370 = vmatpush1.bf16.msra.mxu1 %v4369_v55  ;;  %v3383_v55 = vld [vmem:[#allocation17 + $0x1b8] sm:$0xff] }
 0xea5   :  { %4372 = vmatprep.subr.bf16.mxu1 %v4371_v39  ;;  %v4403_v5 = vpack.c.bf16 %v3383_v55, %v3379_v46  ;;  %v3376_v39 = vld [vmem:[#allocation17 + $0x180] sm:$0xff]  ;;  %v4451_v55 = vpack.c.bf16 %v3690_v29, %v3689_v16  ;;  %v3591_v16 = vld [vmem:[#allocation19 + $0xf8] sm:$0xff]  ;;  %v3699_v29 = vld [vmem:[#allocation20 + $0xf0] sm:$0xff] }
 0xf0e   :  { %v3100_v19 = vpop.permute.xlu0 %3099 }
 0xf0f   :  { %v3117_v20 = vmul.f32 %v3100_v19, %v6217_v1  ;;  %v3330_v1 = vld [vmem:[#allocation17 + $0x10] sm:$0xff]  ;;  %v3380_v19 = vld [vmem:[#allocation17 + $0x1a0] sm:$0xff] }
 0xf10   :  { %v4381_v25 = vpack.c.bf16 %v3334_v6, %v3330_v1  ;;  %v3685_v1 = vld [vmem:[#allocation20 + $0x80] sm:$0xff] }
 0xf12   :  { %v3105_v33 = vpop.permute.xlu0 %3104 }
 0xf13   :  { %v3118_v41 = vmul.f32 %v3105_v33, %v6220_v59  ;;  %v3378_v33 = vld [vmem:[#allocation17 + $0x190] sm:$0xff] }
 0xf15   :  { %v3121_v45 = vadd.f32 %v3118_v41, %v3117_v20  ;;  %v4373_v20 = vpack.c.bf16 %v3380_v19, %v3376_v39  ;;  %v3382_v41 = vld [vmem:[#allocation17 + $0x1b0] sm:$0xff]  ;;  %v3583_v19 = vld [vmem:[#allocation19 + $0xb8] sm:$0xff] }
 0xf16   :  { %v3110_v34 = vpop.permute.xlu0 %3109  ;;  %v3582_v39 = vld [vmem:[#allocation19 + $0xb0] sm:$0xff] }
 0xf17   :  { %v3122_v52 = vrot.slane %v3121_v45, 4  ;;  %v3119_v10 = vmul.f32 %v3110_v34, %v6251_v43  ;;  %v3338_v43 = vld [vmem:[#allocation17 + $0x50] sm:$0xff]  ;;  %4374 = vmatpush1.bf16.msra.mxu1 %v4373_v20  ;;  %v3385_v34 = vld [vmem:[#allocation17 + $0x1c8] sm:$0xff]  ;;  %v3692_v20 = vld [vmem:[#allocation20 + $0xb8] sm:$0xff] }
 0xf18   :  { %v4385_v9 = vpack.c.bf16 %v3342_v58, %v3338_v43  ;;  %v3561_v43 = vld [vmem:[#allocation19 + $0x8] sm:$0xff] }
 0xf19   :  { %v3123_v63 = vadd.f32 %v3122_v52, %v3121_v45  ;;  %v4405_v45 = vpack.c.bf16 %v3382_v41, %v3378_v33  ;;  %v3389_v52 = vld [vmem:[#allocation17 + $0x1e8] sm:$0xff]  ;;  %v3691_v33 = vld [vmem:[#allocation20 + $0xb0] sm:$0xff]  ;;  %v4421_v41 = vpack.c.bf16 %v3565_v57, %v3564_v32  ;;  %v3575_v57 = vld [vmem:[#allocation19 + $0x78] sm:$0xff] }
 0xf1a   :  { %v3115_v3 = vpop.permute.xlu0 %3114  ;;  %v3574_v32 = vld [vmem:[#allocation19 + $0x70] sm:$0xff] }
 0xf1b   :  { %v3120_v35 = vmul.f32 %v3115_v3, %v6254_v31  ;;  %v3124_v8 = vrot.slane %v3123_v63, 2  ;;  %v4375_v3 = vpack.c.bf16 %v3389_v52, %v3385_v34  ;;  %v3566_v34 = vld [vmem:[#allocation19 + $0x30] sm:$0xff]  ;;  %v3567_v52 = vld [vmem:[#allocation19 + $0x38] sm:$0xff] }
 0xf1d   :  { %v3128_v36 = vadd.f32 %v3120_v35, %v3119_v10  ;;  %v3125_v56 = vadd.f32 %v3124_v8, %v3123_v63  ;;  %v3387_v63 = vld [vmem:[#allocation17 + $0x1d8] sm:$0xff]  ;;  %v3384_v35 = vld [vmem:[#allocation17 + $0x1c0] sm:$0xff]  ;;  %4376 = vmatprep.subr.bf16.mxu1 %v4375_v3  ;;  %v4455_v3 = vpack.c.bf16 %v3692_v20, %v3691_v33  ;;  %v6721_v20 = vsub.s32 2, %v5547_v22 }
 0xf1e   :  { %v3391_v10 = vld [vmem:[#allocation17 + $0x1f8] sm:$0xff]  ;;  %v3388_v8 = vld [vmem:[#allocation17 + $0x1e0] sm:$0xff] }
 0xf1f   :  { %v3129_v44 = vrot.slane %v3128_v36, 4  ;;  %v3126_v7 = vrot.slane %v3125_v56, 1 }
 0xf21   :  { %v3130_v61 = vadd.f32 %v3129_v44, %v3128_v36  ;;  %v3127_v23 = vadd.f32 %v3126_v7, %v3125_v56  ;;  %v4407_v36 = vpack.c.bf16 %v3391_v10, %v3387_v63  ;;  %v4377_v44 = vpack.c.bf16 %v3388_v8, %v3384_v35  ;;  %v3386_v56 = vld [vmem:[#allocation17 + $0x1d0] sm:$0xff]  ;;  %v3576_v7 = vld [vmem:[#allocation19 + $0x80] sm:$0xff]  ;;  %v3676_v35 = vld [vmem:[#allocation20 + $0x38] sm:$0xff] }
 0xf22   :  { %v4423_v63 = vpack.c.bf16 %v3583_v19, %v3582_v39  ;;  %v3675_v10 = vld [vmem:[#allocation20 + $0x30] sm:$0xff]  ;;  %v3584_v8 = vld [vmem:[#allocation19 + $0xc0] sm:$0xff] }
 0xf23   :  { %v3131_v15 = vrot.slane %v3130_v61, 2  ;;  %4378 = vmatpush1.bf16.msra.mxu1 %v4377_v44  ;;  %v3693_v44 = vld [vmem:[#allocation20 + $0xc0] sm:$0xff] }
 0xf24   :  { %v3392_v19 = vld [vmem:[%s6354_s16] sm:$0xf] }
 0xf25   :  { %v3132_v50 = vadd.f32 %v3131_v15, %v3130_v61  ;;  %v3390_v61 = vld [vmem:[#allocation17 + $0x1f0] sm:$0xff]  ;;  %v3397_v33 = vrot.slane %v3392_v19, %v6718_v26 }
 0xf26   :  { %v4409_v15 = vpack.c.bf16 %v3390_v61, %v3386_v56  ;;  %v3694_v56 = vld [vmem:[#allocation20 + $0xc8] sm:$0xff]  ;;  %v4425_v61 = vpack.c.bf16 %v3567_v52, %v3566_v34  ;;  %v6722_v34 = vsub.s32 3, %v5547_v22  ;;  %v3857_v22 = vld [vmem:[%s6723_s13] ss:$0 sm:$0xff] }
 0xf27   :  { %v3133_v59 = vrot.slane %v3132_v50, 1 }
 0xf28   :  { %v3409_v52 = vrot.slane %v3392_v19, %v6722_v34 }
 0xf29   :  { %v3134_v60 = vadd.f32 %v3133_v59, %v3132_v50  ;;  %v3577_v50 = vld [vmem:[#allocation19 + $0x88] sm:$0xff] }
 0xf2a   :  { %v4411_v6 = vpack.c.bf16 %v3577_v50, %v3576_v7  ;;  %v3686_v59 = vld [vmem:[#allocation20 + $0x88] sm:$0xff]  ;;  %v3568_v7 = vld [vmem:[#allocation19 + $0x40] sm:$0xff] }
 0xf2b   :  { %v3254_v31 = vsel %vm3012_vm8, %v3134_v60, %v3127_v23  ;;  %v4443_v11 = vpack.c.bf16 %v3686_v59, %v3685_v1  ;;  %v3856_v23 = vld [vmem:[%s6352_s14] ss:$0 sm:$0xff]  ;;  %v3225_v60 = vadd.f32 %v3855_v0, %v6266_v49  ;;  %v4447_v49 = vpack.c.bf16 %v3688_v42, %v3687_v13  ;;  %v3569_v50 = vld [vmem:[#allocation19 + $0x48] sm:$0xff]  ;;  %v3586_v0 = vld [vmem:[#allocation19 + $0xd0] sm:$0xff] }
 0xf2c   :  { %4177 = vmatmul.mubr.f32.vlgmr.msra.gmra.mrb[76].mxu0 %v3254_v31  ;;  %4412 = vmatprep.subr.bf16.mxu1 %v4411_v6  ;;  %v4459_v6 = vpack.c.bf16 %v3694_v56, %v3693_v44  ;;  %v3677_v59 = vld [vmem:[#allocation20 + $0x40] sm:$0xff]  ;;  %v3589_v42 = vld [vmem:[#allocation19 + $0xe8] sm:$0xff] }
 0xf2d   :  { %4382 = vmatpush1.bf16.msra.mxu0 %v4381_v25  ;;  %3549 = vmatprep.mubr.f32.mxu0 %v6717_v12  ;;  %v3366_v12 = vld [vmem:[#allocation17 + $0x130] sm:$0xff]  ;;  %v3228_v53 = vmax.f32 %v3225_v60, 0.0  ;;  %v3588_v13 = vld [vmem:[#allocation19 + $0xe0] sm:$0xff] }
 0xf2e   :  { %4384 = vmatprep.subr.bf16.mxu0 %v4383_v37  ;;  %v4397_v21 = vpack.c.bf16 %v3366_v12, %v3362_v24  ;;  %v3560_v37 = vld [vmem:[#allocation19] sm:$0xff]  ;;  %v3581_v12 = vld [vmem:[#allocation19 + $0xa8] sm:$0xff]  ;;  %v3695_v60 = vld [vmem:[#allocation20 + $0xd0] sm:$0xff] }
 0xf2f   :  { %v3580_v24 = vld [vmem:[#allocation19 + $0xa0] sm:$0xff] }
 0xf30   :  { %v4419_v46 = vpack.c.bf16 %v3581_v12, %v3580_v24  ;;  %v3590_v12 = vld [vmem:[#allocation19 + $0xf0] sm:$0xff] }
 0xf31   :  { %4386 = vmatpush1.bf16.msra.mxu0 %v4385_v9  ;;  %v3578_v9 = vld [vmem:[#allocation19 + $0x90] sm:$0xff] }
 0xf32   :  { %4388 = vmatprep.subr.bf16.mxu0 %v4387_v27  ;;  %v3579_v27 = vld [vmem:[#allocation19 + $0x98] sm:$0xff] }
 0xf33   :  { %v4415_v47 = vpack.c.bf16 %v3579_v27, %v3578_v9  ;;  %v3679_v9 = vld [vmem:[#allocation20 + $0x50] sm:$0xff]  ;;  %v3680_v27 = vld [vmem:[#allocation20 + $0x58] sm:$0xff] }
 0xf35   :  { %4390 = vmatpush1.bf16.msra.mxu0 %v4389_v62  ;;  %v4413_v62 = vpack.c.bf16 %v3561_v43, %v3560_v37  ;;  %v4429_v37 = vpack.c.bf16 %v3569_v50, %v3568_v7 }
 0xf36   :  { %4392 = vmatprep.subr.bf16.mxu0 %v4391_v48  ;;  %v4445_v48 = vpack.c.bf16 %v3670_v51, %v3669_v4 }
 0xf39   :  { %4394 = vmatpush1.bf16.msra.mxu0 %v4393_v28  ;;  %v3671_v28 = vld [vmem:[#allocation20 + $0x10] sm:$0xff] }
 0xf3a   :  { %4396 = vmatprep.subr.bf16.mxu0 %v4395_v38  ;;  %v3672_v38 = vld [vmem:[#allocation20 + $0x18] sm:$0xff] }
 0xf3d   :  { %4398 = vmatpush1.bf16.msra.mxu0 %v4397_v21  ;;  %v4417_v21 = vpack.c.bf16 %v3563_v40, %v3562_v17  ;;  %v4435_v17 = vpack.c.bf16 %v3589_v42, %v3588_v13 }
 0xf3e   :  { %4400 = vmatprep.subr.bf16.mxu0 %v4399_v14  ;;  %v4449_v14 = vpack.c.bf16 %v3672_v38, %v3671_v28  ;;  %v3682_v38 = vld [vmem:[#allocation20 + $0x68] sm:$0xff] }
 0xf41   :  { %4402 = vmatpush1.bf16.msra.mxu0 %v4401_v30  ;;  %v3673_v30 = vld [vmem:[#allocation20 + $0x20] sm:$0xff] }
 0xf42   :  { %4404 = vmatprep.subr.bf16.mxu0 %v4403_v5  ;;  %v3674_v5 = vld [vmem:[#allocation20 + $0x28] sm:$0xff] }
 0xf45   :  { %4406 = vmatpush1.bf16.msra.mxu0 %v4405_v45  ;;  %v4453_v45 = vpack.c.bf16 %v3674_v5, %v3673_v30  ;;  %v3683_v30 = vld [vmem:[#allocation20 + $0x70] sm:$0xff]  ;;  %v3684_v5 = vld [vmem:[#allocation20 + $0x78] sm:$0xff] }
 0xf46   :  { %4408 = vmatprep.subr.bf16.mxu0 %v4407_v36  ;;  %v3585_v36 = vld [vmem:[#allocation19 + $0xc8] sm:$0xff]  ;;  %v4473_v39 = vpack.c.bf16 %v3684_v5, %v3683_v30 }
 0xf47   :  { %v4427_v1 = vpack.c.bf16 %v3585_v36, %v3584_v8 }
 0xf49   :  { %4410 = vmatpush1.bf16.msra.mxu0 %v4409_v15  ;;  %v4457_v15 = vpack.c.bf16 %v3676_v35, %v3675_v10 }
 0xf4a   :  { %4444 = vmatprep.subr.bf16.mxu0 %v4443_v11  ;;  %v3678_v11 = vld [vmem:[#allocation20 + $0x48] sm:$0xff] }
 0xf4b   :  { %v4461_v43 = vpack.c.bf16 %v3678_v11, %v3677_v59 }
 0xfff   :  { %v3322_v25 = vpop.f32.mrb[76].mxu0 }
0x1000   :  { %v3323_v58 = vadd.f32 %v3856_v23, %v3322_v25  ;;  %v4178_v31 = vpop.f32.mrb[77].mxu0  ;;  %v3587_v23 = vld [vmem:[#allocation19 + $0xd8] sm:$0xff] }
0x1001   :  { %v3696_v25 = vld [vmem:[#allocation20 + $0xd8] sm:$0xff]  ;;  %v4431_v4 = vpack.c.bf16 %v3587_v23, %v3586_v0 }
0x1002   :  { %v3326_v2 = vmax.f32 %v3323_v58, 0.0  ;;  %v3570_v58 = vld [vmem:[#allocation19 + $0x50] sm:$0xff]  ;;  %v3571_v31 = vld [vmem:[#allocation19 + $0x58] sm:$0xff]  ;;  %v4463_v51 = vpack.c.bf16 %v3696_v25, %v3695_v60 }
0x1004   :  { %v3327_v54 = vmul.f32 %v3326_v2, %v3228_v53  ;;  %v3697_v53 = vld [vmem:[#allocation20 + $0xe0] sm:$0xff]  ;;  %v3698_v2 = vld [vmem:[#allocation20 + $0xe8] sm:$0xff] }
0x1005   :  { %v4467_v40 = vpack.c.bf16 %v3698_v2, %v3697_v53 }
0x1006   :  { %3479 = vmatmul.mubr.f32.vlgmr.msra.gmra.mrb[94].mxu1 %v3327_v54  ;;  %3550 = vmatmul.mubr.f32.vlgmr.msra.gmra.mrb[78].mxu0 %v3327_v54  ;;  %v3572_v54 = vld [vmem:[#allocation19 + $0x60] sm:$0xff] }
0x1007   :  { %4414 = vmatpush3.bf16.msra.mxu1 %v4413_v62  ;;  %4446 = vmatpush3.bf16.msra.mxu0 %v4445_v48  ;;  %v4433_v62 = vpack.c.bf16 %v3571_v31, %v3570_v58  ;;  %v4465_v48 = vpack.c.bf16 %v3680_v27, %v3679_v9 }
0x1008   :  { %4416 = vmatprep.subr.bf16.mxu1 %v4415_v47  ;;  %4448 = vmatprep.subr.bf16.mxu0 %v4447_v49  ;;  %v3573_v47 = vld [vmem:[#allocation19 + $0x68] sm:$0xff]  ;;  %v3681_v49 = vld [vmem:[#allocation20 + $0x60] sm:$0xff] }
0x1009   :  { %v4437_v28 = vpack.c.bf16 %v3573_v47, %v3572_v54  ;;  %v4469_v24 = vpack.c.bf16 %v3682_v38, %v3681_v49 }
0x100b   :  { %4418 = vmatpush3.bf16.msra.mxu1 %v4417_v21  ;;  %4450 = vmatpush3.bf16.msra.mxu0 %v4449_v14  ;;  %v4439_v21 = vpack.c.bf16 %v3591_v16, %v3590_v12  ;;  %v3700_v14 = vld [vmem:[#allocation20 + $0xf8] sm:$0xff] }
0x100c   :  { %4420 = vmatprep.subr.bf16.mxu1 %v4419_v46  ;;  %4452 = vmatprep.subr.bf16.mxu0 %v4451_v55  ;;  %v4471_v46 = vpack.c.bf16 %v3700_v14, %v3699_v29  ;;  %v4441_v55 = vpack.c.bf16 %v3575_v57, %v3574_v32 }
0x100f   :  { %4422 = vmatpush3.bf16.msra.mxu1 %v4421_v41  ;;  %4454 = vmatpush3.bf16.msra.mxu0 %v4453_v45  ;;  %v3405_v41 = vrot.slane %v3392_v19, %v6721_v20  ;;  %v3401_v45 = vrot.slane %v3392_v19, %v6720_v18 }
0x1010   :  { %4424 = vmatprep.subr.bf16.mxu1 %v4423_v63  ;;  %4456 = vmatprep.subr.bf16.mxu0 %v4455_v3 }
0x1013   :  { %4426 = vmatpush3.bf16.msra.mxu1 %v4425_v61  ;;  %4458 = vmatpush3.bf16.msra.mxu0 %v4457_v15 }
0x1014   :  { %4428 = vmatprep.subr.bf16.mxu1 %v4427_v1  ;;  %4460 = vmatprep.subr.bf16.mxu0 %v4459_v6  ;;  %v3858_v6 = vld [vmem:[%s6724_s1] ss:$0 sm:$0xff] }
0x1017   :  { %4430 = vmatpush3.bf16.msra.mxu1 %v4429_v37  ;;  %4462 = vmatpush3.bf16.msra.mxu0 %v4461_v43 }
0x1018   :  { %4432 = vmatprep.subr.bf16.mxu1 %v4431_v4  ;;  %4464 = vmatprep.subr.bf16.mxu0 %v4463_v51 }
0x101b   :  { %4434 = vmatpush3.bf16.msra.mxu1 %v4433_v62  ;;  %4466 = vmatpush3.bf16.msra.mxu0 %v4465_v48 }
0x101c   :  { %4436 = vmatprep.subr.bf16.mxu1 %v4435_v17  ;;  %4468 = vmatprep.subr.bf16.mxu0 %v4467_v40 }
0x101f   :  { %4438 = vmatpush3.bf16.msra.mxu1 %v4437_v28  ;;  %4470 = vmatpush3.bf16.msra.mxu0 %v4469_v24 }
0x1020   :  { %4440 = vmatprep.subr.bf16.mxu1 %v4439_v21  ;;  %4472 = vmatprep.subr.bf16.mxu0 %v4471_v46 }
0x1023   :  { %4442 = vmatpush3.bf16.msra.mxu1 %v4441_v55  ;;  %4474 = vmatpush3.bf16.msra.mxu0 %v4473_v39 }
0x10d9   :  { %v3480_v63 = vpop.f32.mrb[94].mxu1  ;;  %v3551_v3 = vpop.f32.mrb[78].mxu0 }
0x10da   :  { %v3481_v10 = vadd.f32 %v3480_v63, %v3397_v33  ;;  %v3552_v35 = vadd.f32 %v3551_v3, %v3405_v41  ;;  %v3482_v8 = vpop.f32.mrb[95].mxu1  ;;  %v3553_v36 = vpop.f32.mrb[79].mxu0 }
0x10db   :  { %v3483_v44 = vadd.f32 %v3482_v8, %v3401_v45  ;;  %v3554_v56 = vadd.f32 %v3553_v36, %v3409_v52 }
0x10dc   :  { %v3556_v7 = vmax.f32 %v3481_v10, 0.0  ;;  %v3558_v26 = vmax.f32 %v3552_v35, 0.0 }
0x10dd   :  { %v3557_v61 = vmax.f32 %v3483_v44, 0.0  ;;  %v3559_v15 = vmax.f32 %v3554_v56, 0.0 }
0x10df   :  { %3663 = vmatprep.mubr.f32.mxu1 %v3557_v61  ;;  %3772 = vmatprep.mubr.f32.mxu0 %v3559_v15 }
0x10e0   :  { %3664 = vmatmul.mubr.f32.vlgmr.msra.gmra.mrb[96].mxu1 %v3556_v7  ;;  %3773 = vmatmul.mubr.f32.vlgmr.msra.gmra.mrb[80].mxu0 %v3558_v26 }
0x11b3   :  { %v3998_v18 = vpop.f32.mrb[96].mxu1  ;;  %v4033_v50 = vpop.f32.mrb[80].mxu0 }
0x11b4   :  { %v3999_v1 = vpop.f32.mrb[97].mxu1  ;;  %v4034_v59 = vpop.f32.mrb[81].mxu0 }
0x11b5   :  { %v4000_v11 = vadd.f32 %v3999_v1, %v3998_v18  ;;  %v4035_v0 = vadd.f32 %v4034_v59, %v4033_v50 }
0x11b7   :  { %v3666_v23 = vadd.f32 %v4000_v11, %v3857_v22  ;;  %v3775_v60 = vadd.f32 %v4035_v0, %v3858_v6 }
0x11b9   :  { %v3780_v25 = vcombine.low %v3666_v23, %v3775_v60 }
0x11bb   :  { %3859 = vst.sshfl [vmem:[#allocation22] sm:$0x33 pattern:$0x76325410] %v3780_v25 }
0x11bc   :  { %4914 = shalt.err (!%p4911_p2)
}
0x11bd   :  { %s6725_s8 = sld [smem:[#allocation89_spill]] }
0x11c3   :  { %s4915_s18 = scalar_lea.hbm %s6725_s8, 64 }
0x11c4   :  { %p4916_p3 = scmp.ne.s32.totalorder %s6725_s8, %s4915_s18  ;;  %p4919_p4 = scmp.lt.u32.totalorder %s4915_s18, %s6725_s8 }
0x11c6   :  { %p4921_p5 = pnand %p4919_p4, %p4916_p3 }
0x11c8   :  { %4924 = shalt.err (!%p4921_p5)
}
0x11c9   :  { %3799 = dma.vmem_to_hbm [thread:$0]  %s3797_s30, 64, %s6725_s8, [#allocation4]  }
0x11ca   :  { %4939 = dma.done.wait [#allocation4], 64  }
0x11cb   :  { %4940 = vsyncadd [#allocation4], 4294967232 }
0x11cc   :  { %3803 = vsyncpa [#allocation3], 1 }
0x11cd   :  { %3804 = vsyncpa [#allocation6], 1 }
0x11ce   :  { %3805 = vsyncpa [#allocation9], 1 }
0x11cf   :  { %3806 = vsyncpa [#allocation12], 1 }
0x11d0   :  { %3807 = vsyncpa [#allocation15], 1 }
0x11d1   :  { %3808 = vsyncpa [#allocation18], 1 }
0x11d2   :  { %3809 = vsyncpa [#allocation21], 1 }
0x11d3   :  { %3810 = vsyncpa [#allocation4], 1 }

</bundles_post_ra>
